<compile_context>
chip_gen: v5e
topology: v5e:2x2
jax: 0.10.0
libtpu: 0.0.40
codegen_flags: <defaults>
</compile_context>

<pallas_src>
import functools
import math

import jax
import jax.numpy as jnp
from jax.experimental import pallas as pl
from jax.experimental.pallas import tpu as pltpu

BN_EPS = 0.8
LRELU_SLOPE = 0.2

# Hidden widths are fixed by the module architecture.
H1, H2, H3, H4 = 128, 256, 512, 1024

# Packed small-vector slab layout: [b1 | g2 | be2 | g3 | be3 | g4 | be4].
# Every offset is a multiple of 128 -> static, lane-aligned in-kernel slices.
_OFF_B1 = 0
_OFF_G2 = _OFF_B1 + H1
_OFF_BE2 = _OFF_G2 + H2
_OFF_G3 = _OFF_BE2 + H2
_OFF_BE3 = _OFF_G3 + H3
_OFF_G4 = _OFF_BE3 + H3
_OFF_BE4 = _OFF_G4 + H4
_VEC_LEN = _OFF_BE4 + H4


def _leaky_relu(x):
    # max(x, 0.2*x) == LeakyReLU(0.2) for slope < 1 (one mul + one max on the VPU).
    return jnp.maximum(x, LRELU_SLOPE * x)


def _round_up(x, m):
    return -(-x // m) * m


def _head_tiling(out_dim, max_tn=2048):
    """(padded output width, column tile) for the final Linear + Tanh.

    Pad only to a multiple of 128 (no padded-column DMA waste), then pick tn as
    the largest 128-multiple divisor of the padded width that fits under
    max_tn.  Mild preference for an even number of tiles so
    dimension_semantics=("parallel",) gives both v7x TensorCores equal work.
    """
    pad128 = _round_up(out_dim, 128)
    n_tiles = pad128 // 128
    divisors = [d for d in range(1, n_tiles + 1)
                if n_tiles % d == 0 and d * 128 <= max_tn]
    best = max(divisors)
    even = [d for d in divisors if (n_tiles // d) % 2 == 0]
    if even and max(even) * 2 >= best:       # accept at most halving the tile
        best = max(even)
    return pad128, best * 128


def _clamp_vmem(nbytes):
    # Raise above the scoped default (16 MiB v5e / 32 MiB v6e,v7x) when the
    # computed footprint demands it, but never above v7x's 64 MiB physical VMEM.
    return int(min(max(nbytes, 32 << 20), 64 << 20))


# ---------------------------------------------------------------------------
# Kernels
# ---------------------------------------------------------------------------
def trunk_kernel(z_ref, w1_ref, w2_ref, w3_ref, w4_ref, vec_ref, h_ref):
    """z (B, latent) -> hidden activations h (B, 1024), stored as bf16.

    Gridless on purpose: the whole batch stays resident so training-mode
    BatchNorm1d batch statistics (biased variance) match PyTorch exactly.
    (On v7x this runs on a single TensorCore; acceptable at moderate B.)
    """
    x = z_ref[...].astype(jnp.bfloat16)

    # Block 1: Linear + LeakyReLU (no BatchNorm).
    h = jnp.dot(x, w1_ref[...], preferred_element_type=jnp.float32)
    h = _leaky_relu(h + vec_ref[:, _OFF_B1:_OFF_B1 + H1]).astype(jnp.bfloat16)

    def bn_block(h, w_ref, gamma, beta):
        # Linear bias intentionally omitted: it is exactly cancelled by the
        # batch-mean subtraction of training-mode BatchNorm below.
        y = jnp.dot(h, w_ref[...], preferred_element_type=jnp.float32)
        mean = jnp.mean(y, axis=0, keepdims=True)
        var = jnp.mean(y * y, axis=0, keepdims=True) - mean * mean  # biased var
        var = jnp.maximum(var, 0.0)          # (1,N) row op; guards cancellation
        scale = gamma * jax.lax.rsqrt(var + BN_EPS)                 # folded affine
        shift = beta - mean * scale
        # y*scale + shift: 2 VALU ops/element vs 3 for (y - mean)*scale + beta.
        return _leaky_relu(y * scale + shift).astype(jnp.bfloat16)

    h = bn_block(h, w2_ref,
                 vec_ref[:, _OFF_G2:_OFF_G2 + H2],
                 vec_ref[:, _OFF_BE2:_OFF_BE2 + H2])
    h = bn_block(h, w3_ref,
                 vec_ref[:, _OFF_G3:_OFF_G3 + H3],
                 vec_ref[:, _OFF_BE3:_OFF_BE3 + H3])
    h = bn_block(h, w4_ref,
                 vec_ref[:, _OFF_G4:_OFF_G4 + H4],
                 vec_ref[:, _OFF_BE4:_OFF_BE4 + H4])

    h_ref[...] = h


def head_kernel(h_ref, w5_ref, b5_ref, out_ref):
    """One lane-dense output-column tile of the final Linear + Tanh."""
    y = jnp.dot(h_ref[...], w5_ref[...], preferred_element_type=jnp.float32)
    out_ref[...] = jnp.tanh(y + b5_ref[...])


# ---------------------------------------------------------------------------
# Wrapper
# ---------------------------------------------------------------------------
def generator_forward(z, prep, img_shape):
    """z: (B, latent_dim) f32 -> img: (B, *img_shape) f32."""
    B, latent = z.shape
    out_dim = math.prod(img_shape)
    out_pad, tn = _head_tiling(out_dim)

    vmem = pl.BlockSpec(memory_space=pltpu.MemorySpace.VMEM)

    # Trunk: gridless, whole batch resident (required for exact BN batch stats).
    trunk_bytes = (
        2 * ((latent * H1 + H1 * H2 + H2 * H3 + H3 * H4) * 2   # bf16 weights
             + _VEC_LEN * 4
             + B * latent * 4 + B * H4 * 2)                    # z in / h out
        + 2 * B * (H3 + H4) * 4                                # live f32 y's
        + (4 << 20))                                           # compiler slack
    h = pl.pallas_call(
        trunk_kernel,
        out_shape=jax.ShapeDtypeStruct((B, H4), jnp.bfloat16),
        in_specs=[vmem] * 6,
        out_specs=vmem,
        compiler_params=pltpu.CompilerParams(
            vmem_limit_bytes=_clamp_vmem(trunk_bytes)),
    )(z, prep["w1"], prep["w2"], prep["w3"], prep["w4"], prep["vec"])

    # Head: final Linear + Tanh tiled over 128-padded output columns.
    # Pure w5-streaming, HBM-bound; big lane-dense tiles + "parallel" axis.
    head_bytes = (2 * (H4 * tn * 2 + tn * 4 + B * H4 * 2 + B * tn * 4)
                  + (2 << 20))
    cost = pl.CostEstimate(
        flops=2 * B * H4 * out_pad,
        transcendentals=B * out_pad,
        bytes_accessed=(H4 * out_pad * 2 + out_pad * 4          # w5 + b5
                        + B * H4 * 2 + B * out_pad * 4),        # h + out
    )
    out = pl.pallas_call(
        head_kernel,
        out_shape=jax.ShapeDtypeStruct((B, out_pad), jnp.float32),
        grid=(out_pad // tn,),
        in_specs=[
            pl.BlockSpec((B, H4), lambda j: (0, 0)),
            pl.BlockSpec((H4, tn), lambda j: (0, j)),
            pl.BlockSpec((1, tn), lambda j: (0, j)),
        ],
        out_specs=pl.BlockSpec((B, tn), lambda j: (0, j)),
        compiler_params=pltpu.CompilerParams(
            dimension_semantics=("parallel",),
            vmem_limit_bytes=_clamp_vmem(head_bytes)),
        cost_estimate=cost,
    )(h, prep["w5"], prep["b5"])

    if out_pad != out_dim:
        out = out[:, :out_dim]
    return out.reshape((B,) + tuple(img_shape))


# ---------------------------------------------------------------------------
# Parameters
# ---------------------------------------------------------------------------
def init_params(key, latent_dim, img_shape):
    """PyTorch-style f32 params (Linear default U[-1/sqrt(in), 1/sqrt(in)];
    BatchNorm gamma=1, beta=0). Weights stored as (in, out) so x @ W == torch."""
    out_dim = math.prod(img_shape)
    dims = [latent_dim, H1, H2, H3, H4, out_dim]
    params = {}
    keys = jax.random.split(key, 10)
    for i in range(5):
        fan_in, fan_out = dims[i], dims[i + 1]
        bound = 1.0 / math.sqrt(fan_in)
        params[f"w{i + 1}"] = jax.random.uniform(
            keys[2 * i], (fan_in, fan_out), jnp.float32, -bound, bound)
        params[f"b{i + 1}"] = jax.random.uniform(
            keys[2 * i + 1], (1, fan_out), jnp.float32, -bound, bound)
    for i in (2, 3, 4):
        params[f"g{i}"] = jnp.ones((1, dims[i]), jnp.float32)
        params[f"be{i}"] = jnp.zeros((1, dims[i]), jnp.float32)
    return params


def prepare_params(params, img_shape):
    """One-time prep outside the kernels: bf16 weights for the MXU, packed
    small-vector slab, 128-lane-padded final layer.

    b2/b3/b4 are deliberately not consumed: with training-mode BatchNorm the
    batch-mean subtraction cancels them exactly (numerically equivalent).
    NOTE: the bf16 weight casts trade a ~1e-2 relative tolerance vs the f32
    torch reference for the MXU bf16 fast path; keep f32 if strict parity is
    required.
    """
    out_dim = math.prod(img_shape)
    out_pad, _ = _head_tiling(out_dim)
    pad = out_pad - out_dim
    vec = jnp.concatenate(
        [params["b1"], params["g2"], params["be2"],
         params["g3"], params["be3"], params["g4"], params["be4"]], axis=1)
    assert vec.shape == (1, _VEC_LEN), vec.shape
    return {
        "w1": params["w1"].astype(jnp.bfloat16),
        "w2": params["w2"].astype(jnp.bfloat16),
        "w3": params["w3"].astype(jnp.bfloat16),
        "w4": params["w4"].astype(jnp.bfloat16),
        "w5": jnp.pad(params["w5"], ((0, 0), (0, pad))).astype(jnp.bfloat16),
        "b5": jnp.pad(params["b5"], ((0, 0), (0, pad))),  # f32, padded
        "vec": vec,                                        # f32 packed slab
    }


if __name__ == "__main__":
    latent_dim = 32
    img_shape = (1, 8, 8)   # (C, H, W) -> prod = 64
    # NOTE: B=8 (one sublane tile) keeps the demo small; for throughput the MXU
    # wants B >= 128 (v5e) / 256 (v6e, v7x). BN uses batch statistics, so never
    # zero-pad the batch -- batch real samples instead.
    B = 8

    key = jax.random.PRNGKey(0)
    k_params, k_z = jax.random.split(key)
    params = init_params(k_params, latent_dim, img_shape)
    prep = prepare_params(params, img_shape)
    z = jax.random.normal(k_z, (B, latent_dim), jnp.float32)

    fwd = jax.jit(functools.partial(generator_forward, img_shape=img_shape))
    img = fwd(z, prep)
    jax.block_until_ready(img)

    assert img.shape == (B,) + img_shape, img.shape
    assert bool(jnp.all(jnp.isfinite(img)))
    print("KERNEL_OK")
</pallas_src>

<mosaic_0001>
module attributes {stable_mosaic.version = 11 : i64} {
  func.func @head_kernel(%arg0: i32, %arg1: memref<8x1024xbf16, #tpu.memory_space<vmem>>, %arg2: memref<1024x128xbf16, #tpu.memory_space<vmem>>, %arg3: memref<1x128xf32, #tpu.memory_space<vmem>>, %arg4: memref<8x128xf32, #tpu.memory_space<vmem>>) attributes {dimension_semantics = [#tpu.dimension_semantics<parallel>], iteration_bounds = array<i64: 1>, scalar_prefetch = 0 : i64, scratch_operands = 0 : i64, tpu.core_type = #tpu.core_type<tc>, window_params = [{pipeline_mode = #tpu.pipeline_mode<synchronous>, transform_indices = @transform_0, window_bounds = array<i64: 8, 1024>}, {transform_indices = @transform_1, window_bounds = array<i64: 1024, 128>}, {transform_indices = @transform_2, window_bounds = array<i64: 1, 128>}, {transform_indices = @transform_3, window_bounds = array<i64: 8, 128>}]} {
    %c0 = arith.constant 0 : index
    %c0_0 = arith.constant 0 : index
    %0 = vector.load %arg1[%c0, %c0_0] : memref<8x1024xbf16, #tpu.memory_space<vmem>>, vector<8x1024xbf16>
    %c0_1 = arith.constant 0 : index
    %c0_2 = arith.constant 0 : index
    %1 = vector.load %arg2[%c0_1, %c0_2] : memref<1024x128xbf16, #tpu.memory_space<vmem>>, vector<1024x128xbf16>
    %cst = arith.constant dense<0.000000e+00> : vector<8x128xf32>
    %2 = tpu.matmul %0, %1, %cst {dimension_numbers = #tpu.dot_dimension_numbers<[1], [0], [0], [1], [0, 0, 1, 1], [], []>} : vector<8x1024xbf16>, vector<1024x128xbf16>, vector<8x128xf32> -> vector<8x128xf32>
    %c0_3 = arith.constant 0 : index
    %c0_4 = arith.constant 0 : index
    %3 = vector.load %arg3[%c0_3, %c0_4] : memref<1x128xf32, #tpu.memory_space<vmem>>, vector<1x128xf32>
    %4 = vector.broadcast %3 : vector<1x128xf32> to vector<8x128xf32>
    %5 = arith.addf %2, %4 : vector<8x128xf32>
    %6 = math.tanh %5 : vector<8x128xf32>
    %c0_5 = arith.constant 0 : index
    %c0_6 = arith.constant 0 : index
    %7 = vector.load %arg4[%c0_5, %c0_6] : memref<8x128xf32, #tpu.memory_space<vmem>>, vector<8x128xf32>
    tpu.vector_store %arg4[%c0_5, %c0_6], %6 {strides = array<i32>} : memref<8x128xf32, #tpu.memory_space<vmem>>, vector<8x128xf32>,
    return
  }
  func.func @transform_0(%arg0: i32) -> (i32, i32) {
    %c0_i32 = arith.constant 0 : i32
    %c0_i32_0 = arith.constant 0 : i32
    %c0_i32_1 = arith.constant 0 : i32
    return %c0_i32, %c0_i32_0 : i32, i32
  }
  func.func @transform_1(%arg0: i32) -> (i32, i32) {
    %c0_i32 = arith.constant 0 : i32
    %c0_i32_0 = arith.constant 0 : i32
    return %c0_i32, %arg0 : i32, i32
  }
  func.func @transform_2(%arg0: i32) -> (i32, i32) {
    %c0_i32 = arith.constant 0 : i32
    %c0_i32_0 = arith.constant 0 : i32
    return %c0_i32, %arg0 : i32, i32
  }
  func.func @transform_3(%arg0: i32) -> (i32, i32) {
    %c0_i32 = arith.constant 0 : i32
    %c0_i32_0 = arith.constant 0 : i32
    return %c0_i32, %arg0 : i32, i32
  }
}

module attributes {stable_mosaic.version = 11 : i64} {
  func.func @trunk_kernel(%arg0: memref<8x32xf32, #tpu.memory_space<vmem>>, %arg1: memref<32x128xbf16, #tpu.memory_space<vmem>>, %arg2: memref<128x256xbf16, #tpu.memory_space<vmem>>, %arg3: memref<256x512xbf16, #tpu.memory_space<vmem>>, %arg4: memref<512x1024xbf16, #tpu.memory_space<vmem>>, %arg5: memref<1x3712xf32, #tpu.memory_space<vmem>>, %arg6: memref<8x1024xbf16, #tpu.memory_space<vmem>>) attributes {dimension_semantics = [], scalar_prefetch = 0 : i64, scratch_operands = 0 : i64, tpu.core_type = #tpu.core_type<tc>} {
    %c0 = arith.constant 0 : index
    %c0_0 = arith.constant 0 : index
    %0 = vector.load %arg0[%c0, %c0_0] : memref<8x32xf32, #tpu.memory_space<vmem>>, vector<8x32xf32>
    %1 = arith.truncf %0 : vector<8x32xf32> to vector<8x32xbf16>
    %c0_1 = arith.constant 0 : index
    %c0_2 = arith.constant 0 : index
    %2 = vector.load %arg1[%c0_1, %c0_2] : memref<32x128xbf16, #tpu.memory_space<vmem>>, vector<32x128xbf16>
    %cst = arith.constant dense<0.000000e+00> : vector<8x128xf32>
    %3 = tpu.matmul %1, %2, %cst {dimension_numbers = #tpu.dot_dimension_numbers<[1], [0], [0], [1], [0, 0, 1, 1], [], []>} : vector<8x32xbf16>, vector<32x128xbf16>, vector<8x128xf32> -> vector<8x128xf32>
    %c0_3 = arith.constant 0 : index
    %c0_4 = arith.constant 0 : index
    %4 = vector.load %arg5[%c0_3, %c0_4] : memref<1x3712xf32, #tpu.memory_space<vmem>>, vector<1x128xf32>
    %5 = vector.broadcast %4 : vector<1x128xf32> to vector<8x128xf32>
    %6 = arith.addf %3, %5 : vector<8x128xf32>
    %cst_5 = arith.constant 2.000000e-01 : f32
    %7 = vector.broadcast %cst_5 : f32 to vector<8x128xf32>
    %8 = arith.mulf %7, %6 : vector<8x128xf32>
    %9 = arith.maximumf %6, %8 : vector<8x128xf32>
    %10 = arith.truncf %9 : vector<8x128xf32> to vector<8x128xbf16>
    %c0_6 = arith.constant 0 : index
    %c128 = arith.constant 128 : index
    %11 = vector.load %arg5[%c0_6, %c128] : memref<1x3712xf32, #tpu.memory_space<vmem>>, vector<1x256xf32>
    %c0_7 = arith.constant 0 : index
    %c384 = arith.constant 384 : index
    %12 = vector.load %arg5[%c0_7, %c384] : memref<1x3712xf32, #tpu.memory_space<vmem>>, vector<1x256xf32>
    %c0_8 = arith.constant 0 : index
    %c0_9 = arith.constant 0 : index
    %13 = vector.load %arg2[%c0_8, %c0_9] : memref<128x256xbf16, #tpu.memory_space<vmem>>, vector<128x256xbf16>
    %cst_10 = arith.constant dense<0.000000e+00> : vector<8x256xf32>
    %14 = tpu.matmul %10, %13, %cst_10 {dimension_numbers = #tpu.dot_dimension_numbers<[1], [0], [0], [1], [0, 0, 1, 1], [], []>} : vector<8x128xbf16>, vector<128x256xbf16>, vector<8x256xf32> -> vector<8x256xf32>
    %cst_11 = arith.constant dense<0.000000e+00> : vector<256xf32>
    %15 = vector.multi_reduction <add>, %14, %cst_11 [0] : vector<8x256xf32> to vector<256xf32>
    %16 = vector.shape_cast %15 : vector<256xf32> to vector<1x256xf32>
    %cst_12 = arith.constant 8.000000e+00 : f32
    %17 = vector.broadcast %cst_12 : f32 to vector<1x256xf32>
    %18 = arith.divf %16, %17 : vector<1x256xf32>
    %19 = arith.mulf %14, %14 : vector<8x256xf32>
    %cst_13 = arith.constant dense<0.000000e+00> : vector<256xf32>
    %20 = vector.multi_reduction <add>, %19, %cst_13 [0] : vector<8x256xf32> to vector<256xf32>
    %21 = vector.shape_cast %20 : vector<256xf32> to vector<1x256xf32>
    %cst_14 = arith.constant 8.000000e+00 : f32
    %22 = vector.broadcast %cst_14 : f32 to vector<1x256xf32>
    %23 = arith.divf %21, %22 : vector<1x256xf32>
    %24 = arith.mulf %18, %18 : vector<1x256xf32>
    %25 = arith.subf %23, %24 : vector<1x256xf32>
    %cst_15 = arith.constant 0.000000e+00 : f32
    %26 = vector.broadcast %cst_15 : f32 to vector<1x256xf32>
    %27 = arith.maximumf %25, %26 : vector<1x256xf32>
    %cst_16 = arith.constant 8.000000e-01 : f32
    %28 = vector.broadcast %cst_16 : f32 to vector<1x256xf32>
    %29 = arith.addf %27, %28 : vector<1x256xf32>
    %30 = math.rsqrt %29 : vector<1x256xf32>
    %31 = arith.mulf %11, %30 : vector<1x256xf32>
    %32 = arith.mulf %18, %31 : vector<1x256xf32>
    %33 = arith.subf %12, %32 : vector<1x256xf32>
    %34 = vector.broadcast %31 : vector<1x256xf32> to vector<8x256xf32>
    %35 = arith.mulf %14, %34 : vector<8x256xf32>
    %36 = vector.broadcast %33 : vector<1x256xf32> to vector<8x256xf32>
    %37 = arith.addf %35, %36 : vector<8x256xf32>
    %cst_17 = arith.constant 2.000000e-01 : f32
    %38 = vector.broadcast %cst_17 : f32 to vector<8x256xf32>
    %39 = arith.mulf %38, %37 : vector<8x256xf32>
    %40 = arith.maximumf %37, %39 : vector<8x256xf32>
    %41 = arith.truncf %40 : vector<8x256xf32> to vector<8x256xbf16>
    %c0_18 = arith.constant 0 : index
    %c640 = arith.constant 640 : index
    %42 = vector.load %arg5[%c0_18, %c640] : memref<1x3712xf32, #tpu.memory_space<vmem>>, vector<1x512xf32>
    %c0_19 = arith.constant 0 : index
    %c1152 = arith.constant 1152 : index
    %43 = vector.load %arg5[%c0_19, %c1152] : memref<1x3712xf32, #tpu.memory_space<vmem>>, vector<1x512xf32>
    %c0_20 = arith.constant 0 : index
    %c0_21 = arith.constant 0 : index
    %44 = vector.load %arg3[%c0_20, %c0_21] : memref<256x512xbf16, #tpu.memory_space<vmem>>, vector<256x512xbf16>
    %cst_22 = arith.constant dense<0.000000e+00> : vector<8x512xf32>
    %45 = tpu.matmul %41, %44, %cst_22 {dimension_numbers = #tpu.dot_dimension_numbers<[1], [0], [0], [1], [0, 0, 1, 1], [], []>} : vector<8x256xbf16>, vector<256x512xbf16>, vector<8x512xf32> -> vector<8x512xf32>
    %cst_23 = arith.constant dense<0.000000e+00> : vector<512xf32>
    %46 = vector.multi_reduction <add>, %45, %cst_23 [0] : vector<8x512xf32> to vector<512xf32>
    %47 = vector.shape_cast %46 : vector<512xf32> to vector<1x512xf32>
    %cst_24 = arith.constant 8.000000e+00 : f32
    %48 = vector.broadcast %cst_24 : f32 to vector<1x512xf32>
    %49 = arith.divf %47, %48 : vector<1x512xf32>
    %50 = arith.mulf %45, %45 : vector<8x512xf32>
    %cst_25 = arith.constant dense<0.000000e+00> : vector<512xf32>
    %51 = vector.multi_reduction <add>, %50, %cst_25 [0] : vector<8x512xf32> to vector<512xf32>
    %52 = vector.shape_cast %51 : vector<512xf32> to vector<1x512xf32>
    %cst_26 = arith.constant 8.000000e+00 : f32
    %53 = vector.broadcast %cst_26 : f32 to vector<1x512xf32>
    %54 = arith.divf %52, %53 : vector<1x512xf32>
    %55 = arith.mulf %49, %49 : vector<1x512xf32>
    %56 = arith.subf %54, %55 : vector<1x512xf32>
    %cst_27 = arith.constant 0.000000e+00 : f32
    %57 = vector.broadcast %cst_27 : f32 to vector<1x512xf32>
    %58 = arith.maximumf %56, %57 : vector<1x512xf32>
    %cst_28 = arith.constant 8.000000e-01 : f32
    %59 = vector.broadcast %cst_28 : f32 to vector<1x512xf32>
    %60 = arith.addf %58, %59 : vector<1x512xf32>
    %61 = math.rsqrt %60 : vector<1x512xf32>
    %62 = arith.mulf %42, %61 : vector<1x512xf32>
    %63 = arith.mulf %49, %62 : vector<1x512xf32>
    %64 = arith.subf %43, %63 : vector<1x512xf32>
    %65 = vector.broadcast %62 : vector<1x512xf32> to vector<8x512xf32>
    %66 = arith.mulf %45, %65 : vector<8x512xf32>
    %67 = vector.broadcast %64 : vector<1x512xf32> to vector<8x512xf32>
    %68 = arith.addf %66, %67 : vector<8x512xf32>
    %cst_29 = arith.constant 2.000000e-01 : f32
    %69 = vector.broadcast %cst_29 : f32 to vector<8x512xf32>
    %70 = arith.mulf %69, %68 : vector<8x512xf32>
    %71 = arith.maximumf %68, %70 : vector<8x512xf32>
    %72 = arith.truncf %71 : vector<8x512xf32> to vector<8x512xbf16>
    %c0_30 = arith.constant 0 : index
    %c1664 = arith.constant 1664 : index
    %73 = vector.load %arg5[%c0_30, %c1664] : memref<1x3712xf32, #tpu.memory_space<vmem>>, vector<1x1024xf32>
    %c0_31 = arith.constant 0 : index
    %c2688 = arith.constant 2688 : index
    %74 = vector.load %arg5[%c0_31, %c2688] : memref<1x3712xf32, #tpu.memory_space<vmem>>, vector<1x1024xf32>
    %c0_32 = arith.constant 0 : index
    %c0_33 = arith.constant 0 : index
    %75 = vector.load %arg4[%c0_32, %c0_33] : memref<512x1024xbf16, #tpu.memory_space<vmem>>, vector<512x1024xbf16>
    %cst_34 = arith.constant dense<0.000000e+00> : vector<8x1024xf32>
    %76 = tpu.matmul %72, %75, %cst_34 {dimension_numbers = #tpu.dot_dimension_numbers<[1], [0], [0], [1], [0, 0, 1, 1], [], []>} : vector<8x512xbf16>, vector<512x1024xbf16>, vector<8x1024xf32> -> vector<8x1024xf32>
    %cst_35 = arith.constant dense<0.000000e+00> : vector<1024xf32>
    %77 = vector.multi_reduction <add>, %76, %cst_35 [0] : vector<8x1024xf32> to vector<1024xf32>
    %78 = vector.shape_cast %77 : vector<1024xf32> to vector<1x1024xf32>
    %cst_36 = arith.constant 8.000000e+00 : f32
    %79 = vector.broadcast %cst_36 : f32 to vector<1x1024xf32>
    %80 = arith.divf %78, %79 : vector<1x1024xf32>
    %81 = arith.mulf %76, %76 : vector<8x1024xf32>
    %cst_37 = arith.constant dense<0.000000e+00> : vector<1024xf32>
    %82 = vector.multi_reduction <add>, %81, %cst_37 [0] : vector<8x1024xf32> to vector<1024xf32>
    %83 = vector.shape_cast %82 : vector<1024xf32> to vector<1x1024xf32>
    %cst_38 = arith.constant 8.000000e+00 : f32
    %84 = vector.broadcast %cst_38 : f32 to vector<1x1024xf32>
    %85 = arith.divf %83, %84 : vector<1x1024xf32>
    %86 = arith.mulf %80, %80 : vector<1x1024xf32>
    %87 = arith.subf %85, %86 : vector<1x1024xf32>
    %cst_39 = arith.constant 0.000000e+00 : f32
    %88 = vector.broadcast %cst_39 : f32 to vector<1x1024xf32>
    %89 = arith.maximumf %87, %88 : vector<1x1024xf32>
    %cst_40 = arith.constant 8.000000e-01 : f32
    %90 = vector.broadcast %cst_40 : f32 to vector<1x1024xf32>
    %91 = arith.addf %89, %90 : vector<1x1024xf32>
    %92 = math.rsqrt %91 : vector<1x1024xf32>
    %93 = arith.mulf %73, %92 : vector<1x1024xf32>
    %94 = arith.mulf %80, %93 : vector<1x1024xf32>
    %95 = arith.subf %74, %94 : vector<1x1024xf32>
    %96 = vector.broadcast %93 : vector<1x1024xf32> to vector<8x1024xf32>
    %97 = arith.mulf %76, %96 : vector<8x1024xf32>
    %98 = vector.broadcast %95 : vector<1x1024xf32> to vector<8x1024xf32>
    %99 = arith.addf %97, %98 : vector<8x1024xf32>
    %cst_41 = arith.constant 2.000000e-01 : f32
    %100 = vector.broadcast %cst_41 : f32 to vector<8x1024xf32>
    %101 = arith.mulf %100, %99 : vector<8x1024xf32>
    %102 = arith.maximumf %99, %101 : vector<8x1024xf32>
    %103 = arith.truncf %102 : vector<8x1024xf32> to vector<8x1024xbf16>
    %c0_42 = arith.constant 0 : index
    %c0_43 = arith.constant 0 : index
    %104 = vector.load %arg6[%c0_42, %c0_43] : memref<8x1024xbf16, #tpu.memory_space<vmem>>, vector<8x1024xbf16>
    tpu.vector_store %arg6[%c0_42, %c0_43], %103 {strides = array<i32>} : memref<8x1024xbf16, #tpu.memory_space<vmem>>, vector<8x1024xbf16>,
    return
  }
}

</mosaic_0001>

<bundles_post_ra>
// kernel: generator_forward.3
= control target key start
LH: loop header
LB: loop body
LE: loop exit
PB: predicated region body
PF: predicated region fallthrough
CT: control target
= control target key end

     0   :  { %8 = vsyncpa [#allocation3], 0  ;;  %s1041_s15 = smov [#allocation2]   ;;  %s1042_s17 = smov 64   ;;  %s1085_s0 = inlined_call_operand.vmem [shape: bf16[8,1024], index: 0, kind: input, shape index: {}]   ;;  %s1086_s1 = inlined_call_operand.hbm [shape: bf16[1024,128], index: 1, kind: input, shape index: {}]   ;;  %s1087_s2 = inlined_call_operand.vmem [shape: f32[1,128], index: 2, kind: input, shape index: {}]   ;;  %s1088_s3 = inlined_call_operand.vmem [shape: f32[8,128], index: 3, kind: output, shape index: {}]  }
   0x1   :  { %s15_s14 = sshll.u32 %s1086_s1, 4  ;;  %s17_s16 = sshll.u32 %s1041_s15, 4  ;;  %s16_s14 = int_to_ptr.hbm [resolvable:$true] %s15_s14  ;;  %s18_s16 = int_to_ptr.vmem [resolvable:$true] %s17_s16 }
   0x2   :  { %s1043_s18 = smov 4  }
   0x3   :  { %23 = dma.hbm_to_vmem [thread:$0]  %s16_s14, 8192, %s18_s16, [#allocation3], %s1042_s17, %s1042_s17, %s1043_s18  }
   0x4   :  { %1039 = dma.done.wait [#allocation3], 8192  }
   0x5   :  { %1040 = vsyncadd [#allocation3], 4294959104  ;;  %v952_v0 = vld [vmem:[#allocation2 + $0x38] sm:$0xff]  ;;  %v951_v4 = vld [vmem:[#allocation2 + $0x30] sm:$0xff] }
   0x6   :  { %v960_v1 = vld [vmem:[#allocation2 + $0x78] sm:$0xff]  ;;  %578 = vmatpush.bf16.msra.mxu0 %v952_v0  ;;  %v959_v5 = vld [vmem:[#allocation2 + $0x70] sm:$0xff]  ;;  %v950_v8 = vld [vmem:[#allocation2 + $0x28] sm:$0xff] }
   0x7   :  { %v968_v2 = vld [vmem:[#allocation2 + $0xb8] sm:$0xff]  ;;  %591 = vmatpush.bf16.msra.mxu1 %v960_v1  ;;  %v967_v6 = vld [vmem:[#allocation2 + $0xb0] sm:$0xff]  ;;  %v958_v9 = vld [vmem:[#allocation2 + $0x68] sm:$0xff] }
   0x8   :  { %v976_v3 = vld [vmem:[#allocation2 + $0xf8] sm:$0xff]  ;;  %604 = vmatpush.bf16.msra.mxu2 %v968_v2  ;;  %v975_v7 = vld [vmem:[#allocation2 + $0xf0] sm:$0xff]  ;;  %v966_v10 = vld [vmem:[#allocation2 + $0xa8] sm:$0xff] }
   0x9   :  { %617 = vmatpush.bf16.msra.mxu3 %v976_v3  ;;  %v974_v11 = vld [vmem:[#allocation2 + $0xe8] sm:$0xff]  ;;  %v949_v12 = vld [vmem:[#allocation2 + $0x20] sm:$0xff]  ;;  %v948_v16 = vld [vmem:[#allocation2 + $0x18] sm:$0xff] }
   0xa   :  { %579 = vmatpush.bf16.msra.mxu0 %v951_v4  ;;  %v957_v13 = vld [vmem:[#allocation2 + $0x60] sm:$0xff]  ;;  %v956_v17 = vld [vmem:[#allocation2 + $0x58] sm:$0xff]  ;;  %v947_v20 = vld [vmem:[#allocation2 + $0x10] sm:$0xff] }
   0xb   :  { %592 = vmatpush.bf16.msra.mxu1 %v959_v5  ;;  %v965_v14 = vld [vmem:[#allocation2 + $0xa0] sm:$0xff]  ;;  %v964_v18 = vld [vmem:[#allocation2 + $0x98] sm:$0xff]  ;;  %v955_v21 = vld [vmem:[#allocation2 + $0x50] sm:$0xff] }
   0xc   :  { %605 = vmatpush.bf16.msra.mxu2 %v967_v6  ;;  %v973_v15 = vld [vmem:[#allocation2 + $0xe0] sm:$0xff]  ;;  %v972_v19 = vld [vmem:[#allocation2 + $0xd8] sm:$0xff]  ;;  %v963_v22 = vld [vmem:[#allocation2 + $0x90] sm:$0xff] }
   0xd   :  { %618 = vmatpush.bf16.msra.mxu3 %v975_v7  ;;  %v971_v23 = vld [vmem:[#allocation2 + $0xd0] sm:$0xff]  ;;  %v946_v24 = vld [vmem:[#allocation2 + $0x8] sm:$0xff]  ;;  %v30_v29 = vld [vmem:[%s1085_s0] sm:$0xff] }
   0xe   :  { %580 = vmatpush.bf16.msra.mxu0 %v950_v8  ;;  %v954_v25 = vld [vmem:[#allocation2 + $0x48] sm:$0xff]  ;;  %v945_v30 = vld [vmem:[#allocation2] sm:$0xff]  ;;  %v170_v33 = vunpack.c.l.b16 %v30_v29  ;;  %v171_v37 = vunpack.c.h.b16 %v30_v29  ;;  %v984_v38 = vld [vmem:[#allocation2 + $0x138] sm:$0xff] }
   0xf   :  { %593 = vmatpush.bf16.msra.mxu1 %v958_v9  ;;  %v962_v26 = vld [vmem:[#allocation2 + $0x88] sm:$0xff]  ;;  %v953_v31 = vld [vmem:[#allocation2 + $0x40] sm:$0xff]  ;;  %v992_v39 = vld [vmem:[#allocation2 + $0x178] sm:$0xff] }
  0x10   :  { %606 = vmatpush.bf16.msra.mxu2 %v966_v10  ;;  %v970_v27 = vld [vmem:[#allocation2 + $0xc8] sm:$0xff]  ;;  %v961_v34 = vld [vmem:[#allocation2 + $0x80] sm:$0xff]  ;;  %v1000_v40 = vld [vmem:[#allocation2 + $0x1b8] sm:$0xff]  ;;  %v178_v43 = vpack.c.b16 %v170_v33, %v170_v33  ;;  %v179_v45 = vpack.c.b16 %v171_v37, %v171_v37 }
  0x11   :  { %619 = vmatpush.bf16.msra.mxu3 %v974_v11  ;;  %v31_v28 = vld [vmem:[%s1085_s0 + $0x8] sm:$0xff]  ;;  %v969_v35 = vld [vmem:[#allocation2 + $0xc0] sm:$0xff]  ;;  %v1008_v41 = vld [vmem:[#allocation2 + $0x1f8] sm:$0xff] }
  0x12   :  { %581 = vmatpush.bf16.msra.mxu0 %v949_v12  ;;  %v172_v32 = vunpack.c.l.b16 %v31_v28  ;;  %v173_v36 = vunpack.c.h.b16 %v31_v28  ;;  %v983_v46 = vld [vmem:[#allocation2 + $0x130] sm:$0xff]  ;;  %v982_v50 = vld [vmem:[#allocation2 + $0x128] sm:$0xff]  ;;  %v981_v54 = vld [vmem:[#allocation2 + $0x120] sm:$0xff] }
  0x13   :  { %594 = vmatpush.bf16.msra.mxu1 %v957_v13  ;;  %v991_v47 = vld [vmem:[#allocation2 + $0x170] sm:$0xff]  ;;  %v990_v51 = vld [vmem:[#allocation2 + $0x168] sm:$0xff]  ;;  %v989_v55 = vld [vmem:[#allocation2 + $0x160] sm:$0xff] }
  0x14   :  { %607 = vmatpush.bf16.msra.mxu2 %v965_v14  ;;  %v180_v42 = vpack.c.b16 %v172_v32, %v172_v32  ;;  %v181_v44 = vpack.c.b16 %v173_v36, %v173_v36  ;;  %v999_v48 = vld [vmem:[#allocation2 + $0x1b0] sm:$0xff]  ;;  %v998_v52 = vld [vmem:[#allocation2 + $0x1a8] sm:$0xff]  ;;  %v997_v56 = vld [vmem:[#allocation2 + $0x1a0] sm:$0xff] }
  0x15   :  { %620 = vmatpush.bf16.msra.mxu3 %v973_v15  ;;  %v1007_v49 = vld [vmem:[#allocation2 + $0x1f0] sm:$0xff]  ;;  %v1006_v53 = vld [vmem:[#allocation2 + $0x1e8] sm:$0xff]  ;;  %v1005_v57 = vld [vmem:[#allocation2 + $0x1e0] sm:$0xff] }
  0x16   :  { %582 = vmatpush.bf16.msra.mxu0 %v948_v16  ;;  %v980_v58 = vld [vmem:[#allocation2 + $0x118] sm:$0xff]  ;;  %v979_v62 = vld [vmem:[#allocation2 + $0x110] sm:$0xff]  ;;  %v978_v2 = vld [vmem:[#allocation2 + $0x108] sm:$0xff] }
  0x17   :  { %595 = vmatpush.bf16.msra.mxu1 %v956_v17  ;;  %v988_v59 = vld [vmem:[#allocation2 + $0x158] sm:$0xff]  ;;  %v987_v63 = vld [vmem:[#allocation2 + $0x150] sm:$0xff]  ;;  %v986_v3 = vld [vmem:[#allocation2 + $0x148] sm:$0xff] }
  0x18   :  { %608 = vmatpush.bf16.msra.mxu2 %v964_v18  ;;  %v996_v60 = vld [vmem:[#allocation2 + $0x198] sm:$0xff]  ;;  %v995_v0 = vld [vmem:[#allocation2 + $0x190] sm:$0xff]  ;;  %v994_v5 = vld [vmem:[#allocation2 + $0x188] sm:$0xff] }
  0x19   :  { %621 = vmatpush.bf16.msra.mxu3 %v972_v19  ;;  %v1004_v61 = vld [vmem:[#allocation2 + $0x1d8] sm:$0xff]  ;;  %v1003_v1 = vld [vmem:[#allocation2 + $0x1d0] sm:$0xff]  ;;  %v1002_v6 = vld [vmem:[#allocation2 + $0x1c8] sm:$0xff] }
  0x1a   :  { %583 = vmatpush.bf16.msra.mxu0 %v947_v20  ;;  %v32_v4 = vld [vmem:[%s1085_s0 + $0x10] sm:$0xff]  ;;  %v33_v7 = vld [vmem:[%s1085_s0 + $0x18] sm:$0xff]  ;;  %v977_v10 = vld [vmem:[#allocation2 + $0x100] sm:$0xff] }
  0x1b   :  { %596 = vmatpush.bf16.msra.mxu1 %v955_v21  ;;  %v174_v8 = vunpack.c.l.b16 %v32_v4  ;;  %v175_v9 = vunpack.c.h.b16 %v32_v4  ;;  %v985_v11 = vld [vmem:[#allocation2 + $0x140] sm:$0xff]  ;;  %v176_v12 = vunpack.c.l.b16 %v33_v7  ;;  %v177_v13 = vunpack.c.h.b16 %v33_v7 }
  0x1c   :  { %609 = vmatpush.bf16.msra.mxu2 %v963_v22  ;;  %v993_v14 = vld [vmem:[#allocation2 + $0x180] sm:$0xff] }
  0x1d   :  { %622 = vmatpush.bf16.msra.mxu3 %v971_v23  ;;  %v1001_v15 = vld [vmem:[#allocation2 + $0x1c0] sm:$0xff]  ;;  %v182_v16 = vpack.c.b16 %v174_v8, %v174_v8  ;;  %v183_v17 = vpack.c.b16 %v175_v9, %v175_v9  ;;  %v184_v18 = vpack.c.b16 %v176_v12, %v176_v12  ;;  %v185_v19 = vpack.c.b16 %v177_v13, %v177_v13 }
  0x1e   :  { %584 = vmatpush.bf16.msra.mxu0 %v946_v24 }
  0x1f   :  { %597 = vmatpush.bf16.msra.mxu1 %v954_v25 }
  0x20   :  { %610 = vmatpush.bf16.msra.mxu2 %v962_v26  ;;  %v1012_v26 = vld [vmem:[%s1087_s2] ss:$0 sm:$0xff] }
  0x21   :  { %623 = vmatpush.bf16.msra.mxu3 %v970_v27 }
  0x22   :  { %585 = vmatpush.bf16.msra.mxu0 %v945_v30 }
  0x23   :  { %598 = vmatpush.bf16.msra.mxu1 %v953_v31 }
  0x24   :  { %611 = vmatpush.bf16.msra.mxu2 %v961_v34 }
  0x25   :  { %624 = vmatpush.bf16.msra.mxu3 %v969_v35  ;;  %586 = vmatmul.bf16.vlgmr.msra.gmra.mxu0 %v178_v43 }
  0x26   :  { %630 = vmatpush.bf16.msrb.mxu0 %v984_v38  ;;  %599 = vmatmul.bf16.vlgmr.msra.gmra.mxu1 %v179_v45 }
  0x27   :  { %643 = vmatpush.bf16.msrb.mxu1 %v992_v39  ;;  %612 = vmatmul.bf16.vlgmr.msra.gmra.mxu2 %v180_v42 }
  0x28   :  { %656 = vmatpush.bf16.msrb.mxu2 %v1000_v40  ;;  %625 = vmatmul.bf16.vlgmr.msra.gmra.mxu3 %v181_v44 }
  0x29   :  { %669 = vmatpush.bf16.msrb.mxu3 %v1008_v41 }
  0x2a   :  { %631 = vmatpush.bf16.msrb.mxu0 %v983_v46 }
  0x2b   :  { %644 = vmatpush.bf16.msrb.mxu1 %v991_v47 }
  0x2c   :  { %657 = vmatpush.bf16.msrb.mxu2 %v999_v48 }
  0x2d   :  { %670 = vmatpush.bf16.msrb.mxu3 %v1007_v49 }
  0x2e   :  { %632 = vmatpush.bf16.msrb.mxu0 %v982_v50 }
  0x2f   :  { %645 = vmatpush.bf16.msrb.mxu1 %v990_v51 }
  0x30   :  { %658 = vmatpush.bf16.msrb.mxu2 %v998_v52 }
  0x31   :  { %671 = vmatpush.bf16.msrb.mxu3 %v1006_v53 }
  0x32   :  { %633 = vmatpush.bf16.msrb.mxu0 %v981_v54 }
  0x33   :  { %646 = vmatpush.bf16.msrb.mxu1 %v989_v55 }
  0x34   :  { %659 = vmatpush.bf16.msrb.mxu2 %v997_v56 }
  0x35   :  { %672 = vmatpush.bf16.msrb.mxu3 %v1005_v57 }
  0x36   :  { %634 = vmatpush.bf16.msrb.mxu0 %v980_v58 }
  0x37   :  { %647 = vmatpush.bf16.msrb.mxu1 %v988_v59 }
  0x38   :  { %660 = vmatpush.bf16.msrb.mxu2 %v996_v60 }
  0x39   :  { %673 = vmatpush.bf16.msrb.mxu3 %v1004_v61 }
  0x3a   :  { %635 = vmatpush.bf16.msrb.mxu0 %v979_v62 }
  0x3b   :  { %648 = vmatpush.bf16.msrb.mxu1 %v987_v63 }
  0x3c   :  { %661 = vmatpush.bf16.msrb.mxu2 %v995_v0 }
  0x3d   :  { %674 = vmatpush.bf16.msrb.mxu3 %v1003_v1 }
  0x3e   :  { %636 = vmatpush.bf16.msrb.mxu0 %v978_v2 }
  0x3f   :  { %649 = vmatpush.bf16.msrb.mxu1 %v986_v3 }
  0x40   :  { %662 = vmatpush.bf16.msrb.mxu2 %v994_v5 }
  0x41   :  { %675 = vmatpush.bf16.msrb.mxu3 %v1002_v6 }
  0x42   :  { %637 = vmatpush.bf16.msrb.mxu0 %v977_v10 }
  0x43   :  { %650 = vmatpush.bf16.msrb.mxu1 %v985_v11 }
  0x44   :  { %663 = vmatpush.bf16.msrb.mxu2 %v993_v14 }
  0x45   :  { %676 = vmatpush.bf16.msrb.mxu3 %v1001_v15  ;;  %638 = vmatmul.bf16.vlgmr.msrb.gmra.mxu0 %v182_v16 }
  0x46   :  { %651 = vmatmul.bf16.vlgmr.msrb.gmra.mxu1 %v183_v17 }
  0x47   :  { %664 = vmatmul.bf16.vlgmr.msrb.gmra.mxu2 %v184_v18 }
  0x48   :  { %677 = vmatmul.bf16.vlgmr.msrb.gmra.mxu3 %v185_v19 }
  0xa2   :  { %v587_v20 = vpop.f32.mrf.mxu0 }
  0xa3   :  { %v600_v21 = vpop.f32.mrf.mxu1  ;;  %v588_v29 = vadd.f32 %v1012_v26, %v587_v20 }
  0xa5   :  { %v601_v30 = vadd.f32 %v600_v21, %v588_v29 }
  0xaa   :  { %v613_v22 = vpop.f32.mrf.mxu2  ;;  %v589_v24 = vpop.f32.mrf.mxu0 }
  0xab   :  { %v626_v23 = vpop.f32.mrf.mxu3  ;;  %v602_v25 = vpop.f32.mrf.mxu1  ;;  %v614_v31 = vadd.f32 %v613_v22, %v601_v30 }
  0xad   :  { %v627_v32 = vadd.f32 %v626_v23, %v614_v31 }
  0xb2   :  { %v615_v27 = vpop.f32.mrf.mxu2 }
  0xb3   :  { %v628_v28 = vpop.f32.mrf.mxu3 }
  0xc2   :  { %v639_v33 = vpop.f32.mrf.mxu0 }
  0xc3   :  { %v652_v34 = vpop.f32.mrf.mxu1  ;;  %v640_v35 = vadd.f32 %v639_v33, %v627_v32 }
  0xc5   :  { %v653_v36 = vadd.f32 %v652_v34, %v640_v35 }
  0xca   :  { %v665_v37 = vpop.f32.mrf.mxu2  ;;  %v641_v40 = vpop.f32.mrf.mxu0 }
  0xcb   :  { %v678_v38 = vpop.f32.mrf.mxu3  ;;  %v666_v39 = vadd.f32 %v665_v37, %v653_v36  ;;  %v654_v41 = vpop.f32.mrf.mxu1 }
  0xcd   :  { %v679_v42 = vadd.f32 %v678_v38, %v666_v39 }
  0xcf   :  { %1013 = vtanh.f32 %v679_v42 }
  0xd2   :  { %v667_v43 = vpop.f32.mrf.mxu2 }
  0xd3   :  { %v680_v44 = vpop.f32.mrf.mxu3 }
  0xd5   :  { %v1014_v45 = vpop.eup %1013 }
  0xd6   :  { %683 = vst [vmem:[%s1088_s3] sm:$0xff] %v1014_v45 }
  0xd7   :  { %688 = vsyncpa [#allocation3], 1 }

// kernel: generator_forward.2
= control target key start
LH: loop header
LB: loop body
LE: loop exit
PB: predicated region body
PF: predicated region fallthrough
CT: control target
= control target key end

     0   :  { %11 = vsyncpa [#allocation3], 0  ;;  %s5749_s0 = inlined_call_operand.hbm [shape: f32[8,32], index: 0, kind: input, shape index: {}]   ;;  %s5750_s1 = inlined_call_operand.hbm [shape: bf16[32,128], index: 1, kind: input, shape index: {}]   ;;  %s5751_s2 = inlined_call_operand.hbm [shape: bf16[128,256], index: 2, kind: input, shape index: {}]   ;;  %s5752_s3 = inlined_call_operand.hbm [shape: bf16[256,512], index: 3, kind: input, shape index: {}]   ;;  %s5753_s4 = inlined_call_operand.hbm [shape: bf16[512,1024], index: 4, kind: input, shape index: {}]   ;;  %s5754_s5 = inlined_call_operand.hbm [shape: f32[1,3712], index: 5, kind: input, shape index: {}]   ;;  %s5755_s6 = inlined_call_operand.vmem [shape: bf16[8,1024], index: 6, kind: output, shape index: {}]  }
   0x1   :  { %12 = vsyncpa [#allocation5], 0 }
   0x2   :  { %13 = vsyncpa [#allocation8], 0  ;;  %s30_s23 = sshll.u32 %s5750_s1, 4  ;;  %s31_s23 = int_to_ptr.hbm [resolvable:$true] %s30_s23 }
   0x3   :  { %14 = vsyncpa [#allocation11], 0  ;;  %s5271_s24 = smov [#allocation4]   ;;  %s56_s28 = sshll.u32 %s5752_s3, 4  ;;  %s57_s28 = int_to_ptr.hbm [resolvable:$true] %s56_s28 }
   0x4   :  { %s32_s25 = sshll.u32 %s5271_s24, 4  ;;  %s5272_s29 = smov 64   ;;  %s33_s25 = int_to_ptr.vmem [resolvable:$true] %s32_s25 }
   0x5   :  { %s5273_s30 = smov 4   ;;  %s5274_s7 = smov [#allocation7]  }
   0x6   :  { %38 = dma.hbm_to_vmem [thread:$0]  %s31_s23, 256, %s33_s25, [#allocation5], %s5272_s29, %s5272_s29, %s5273_s30  }
   0x7   :  { %s58_s8 = sshll.u32 %s5274_s7, 4  ;;  %s5275_s9 = smov 256   ;;  %s59_s8 = int_to_ptr.vmem [resolvable:$true] %s58_s8 }
   0x8   :  { %s5276_s10 = smov 16   ;;  %s20_s12 = sshll.u32 %s5749_s0, 4  ;;  %s21_s12 = int_to_ptr.hbm [resolvable:$true] %s20_s12 }
   0x9   :  { %64 = dma.hbm_to_vmem [thread:$0]  %s57_s28, 8192, %s59_s8, [#allocation8], %s5275_s9, %s5275_s9, %s5276_s10  }
   0xa   :  { %s5277_s13 = smov [#allocation2]   ;;  %s43_s16 = sshll.u32 %s5751_s2, 4  ;;  %s44_s16 = int_to_ptr.hbm [resolvable:$true] %s43_s16 }
   0xb   :  { %s22_s14 = sshll.u32 %s5277_s13, 4  ;;  %s5278_s17 = smov [#allocation6]   ;;  %s23_s14 = int_to_ptr.vmem [resolvable:$true] %s22_s14 }
   0xc   :  { %25 = dma.hbm_to_vmem [thread:$0]  %s21_s12, 128, %s23_s14, [#allocation3]  }
   0xd   :  { %s45_s18 = sshll.u32 %s5278_s17, 4  ;;  %s5279_s19 = smov 128   ;;  %s46_s18 = int_to_ptr.vmem [resolvable:$true] %s45_s18 }
   0xe   :  { %s5280_s20 = smov 8   ;;  %s69_s0 = sshll.u32 %s5753_s4, 4  ;;  %s70_s0 = int_to_ptr.hbm [resolvable:$true] %s69_s0 }
   0xf   :  { %51 = dma.hbm_to_vmem [thread:$0]  %s44_s16, 2048, %s46_s18, [#allocation5], %s5279_s19, %s5279_s19, %s5280_s20  }
  0x10   :  { %s5281_s23 = smov [#allocation9]   ;;  %s83_s2 = sshll.u32 %s5754_s5, 4  ;;  %s84_s2 = int_to_ptr.hbm [resolvable:$true] %s83_s2 }
  0x11   :  { %s71_s24 = sshll.u32 %s5281_s23, 4  ;;  %s5282_s27 = smov 512   ;;  %s72_s24 = int_to_ptr.vmem [resolvable:$true] %s71_s24 }
  0x12   :  { %s5283_s28 = smov 32   ;;  %s5284_s29 = smov [#allocation10]  }
  0x13   :  { %77 = dma.hbm_to_vmem [thread:$0]  %s70_s0, 32768, %s72_s24, [#allocation8], %s5282_s27, %s5282_s27, %s5283_s28  }
  0x14   :  { %s85_s30 = sshll.u32 %s5284_s29, 4  ;;  %s86_s30 = int_to_ptr.vmem [resolvable:$true] %s85_s30 }
  0x15   :  { %88 = dma.hbm_to_vmem [thread:$0]  %s84_s2, 464, %s86_s30, [#allocation11]  }
  0x16   :  { %5263 = dma.done.wait [#allocation3], 128  }
  0x17   :  { %5264 = vsyncadd [#allocation3], 4294967168 }
  0x18   :  { %5265 = dma.done.wait [#allocation5], 2304  }
  0x19   :  { %5266 = vsyncadd [#allocation5], 4294964992 }
  0x1a   :  { %5267 = dma.done.wait [#allocation8], 40960  }
  0x1b   :  { %5268 = vsyncadd [#allocation8], 4294926336 }
  0x1c   :  { %5269 = dma.done.wait [#allocation11], 464  }
  0x1d   :  { %5270 = vsyncadd [#allocation11], 4294966832  ;;  %v4736_v0 = vld [vmem:[#allocation4 + $0x8] sm:$0xff]  ;;  %v4735_v1 = vld [vmem:[#allocation4] sm:$0xff]  ;;  %vm136_vm0 = vcmask 261120   ;;  %v5285_v59 = vmov 8.0  }
  0x1e   :  { %v114_v2 = vld [vmem:[#allocation2] sm:$0xff]  ;;  %v3449_v3 = vld [vmem:[#allocation6 + $0x70] sm:$0xf]  ;;  %v4752_v4 = vld [vmem:[#allocation6 + $0x74] sm:$0xf0]  ;;  %146 = vmatpush.bf16.msra.mxu0 %v4736_v0  ;;  %5089 = vrcp.f32 %v5285_v59  ;;  %vm348_vm7 = vcmask 1040384  }
  0x1f   :  { %v4751_v5 = vld [vmem:[#allocation6 + $0x74] sm:$0xf]  ;;  %v3450_v6 = vor.u32 %v4752_v4, %v3449_v3  ;;  %v3451_v7 = vld [vmem:[#allocation6 + $0x78] sm:$0xf0]  ;;  %v3441_v8 = vld [vmem:[#allocation6 + $0x60] sm:$0xf]  ;;  %v115_v14 = vpack.c.bf16 %v114_v2, %v114_v2 }
  0x20   :  { %v4750_v9 = vld [vmem:[#allocation6 + $0x64] sm:$0xf0]  ;;  %v3454_v10 = vor.u32 %v4751_v5, %v3451_v7  ;;  %v4749_v11 = vld [vmem:[#allocation6 + $0x64] sm:$0xf]  ;;  %v3443_v12 = vld [vmem:[#allocation6 + $0x68] sm:$0xf0] }
  0x21   :  { %254 = vmatpush.bf16.msra.mxu1 %v3450_v6  ;;  %v3442_v13 = vor.u32 %v4750_v9, %v3441_v8  ;;  %v3446_v15 = vor.u32 %v4749_v11, %v3443_v12  ;;  %v3433_v16 = vld [vmem:[#allocation6 + $0x50] sm:$0xf]  ;;  %v4748_v17 = vld [vmem:[#allocation6 + $0x54] sm:$0xf0]  ;;  %v4747_v18 = vld [vmem:[#allocation6 + $0x54] sm:$0xf] }
  0x22   :  { %267 = vmatpush.bf16.msra.mxu2 %v3454_v10  ;;  %147 = vmatpush.bf16.msra.mxu0 %v4735_v1  ;;  %v3435_v19 = vld [vmem:[#allocation6 + $0x58] sm:$0xf0]  ;;  %v3434_v20 = vor.u32 %v4748_v17, %v3433_v16  ;;  %v3425_v22 = vld [vmem:[#allocation6 + $0x40] sm:$0xf]  ;;  %v4746_v23 = vld [vmem:[#allocation6 + $0x44] sm:$0xf0] }
  0x23   :  { %v3438_v21 = vor.u32 %v4747_v18, %v3435_v19  ;;  %v4745_v24 = vld [vmem:[#allocation6 + $0x44] sm:$0xf]  ;;  %v3427_v25 = vld [vmem:[#allocation6 + $0x48] sm:$0xf0]  ;;  %v3426_v26 = vor.u32 %v4746_v23, %v3425_v22  ;;  %v3417_v28 = vld [vmem:[#allocation6 + $0x30] sm:$0xf] }
  0x24   :  { %v3430_v27 = vor.u32 %v4745_v24, %v3427_v25  ;;  %v4744_v29 = vld [vmem:[#allocation6 + $0x34] sm:$0xf0]  ;;  %v4743_v30 = vld [vmem:[#allocation6 + $0x34] sm:$0xf]  ;;  %v3419_v31 = vld [vmem:[#allocation6 + $0x38] sm:$0xf0]  ;;  %v5339_v60 = vpop.eup %5089 }
  0x25   :  { %255 = vmatpush.bf16.msra.mxu1 %v3442_v13  ;;  %3390 = vmatmul.msk.bf16.vlgmr.msra.gmra.mxu0 %vm136_vm0, %v115_v14  ;;  %v3418_v32 = vor.u32 %v4744_v29, %v3417_v28  ;;  %v3422_v33 = vor.u32 %v4743_v30, %v3419_v31  ;;  %v3409_v34 = vld [vmem:[#allocation6 + $0x20] sm:$0xf]  ;;  %v4742_v35 = vld [vmem:[#allocation6 + $0x24] sm:$0xf0]  ;;  %v4741_v36 = vld [vmem:[#allocation6 + $0x24] sm:$0xf]  ;;  %vm297_vm1 = vweird.f32 %v5339_v60 }
  0x26   :  { %268 = vmatpush.bf16.msra.mxu2 %v3446_v15  ;;  %v3411_v37 = vld [vmem:[#allocation6 + $0x28] sm:$0xf0]  ;;  %v3410_v38 = vor.u32 %v4742_v35, %v3409_v34  ;;  %v3401_v40 = vld [vmem:[#allocation6 + $0x10] sm:$0xf]  ;;  %v4740_v41 = vld [vmem:[#allocation6 + $0x14] sm:$0xf0] }
  0x27   :  { %v3414_v39 = vor.u32 %v4741_v36, %v3411_v37  ;;  %v4739_v42 = vld [vmem:[#allocation6 + $0x14] sm:$0xf]  ;;  %v3402_v43 = vor.u32 %v4740_v41, %v3401_v40  ;;  %v3403_v44 = vld [vmem:[#allocation6 + $0x18] sm:$0xf0]  ;;  %v3393_v46 = vld [vmem:[#allocation6] sm:$0xf] }
  0x28   :  { %v3406_v45 = vor.u32 %v4739_v42, %v3403_v44  ;;  %v4738_v47 = vld [vmem:[#allocation6 + $0x4] sm:$0xf0]  ;;  %v4737_v48 = vld [vmem:[#allocation6 + $0x4] sm:$0xf]  ;;  %v3395_v50 = vld [vmem:[#allocation6 + $0x8] sm:$0xf0] }
  0x29   :  { %256 = vmatpush.bf16.msra.mxu1 %v3434_v20  ;;  %v3394_v49 = vor.u32 %v4738_v47, %v3393_v46  ;;  %v3398_v51 = vor.u32 %v4737_v48, %v3395_v50  ;;  %v5088_v52 = vld [vmem:[#allocation10] ss:$0 sm:$0xff]  ;;  %v4783_v62 = vld [vmem:[#allocation7 + $0xec] sm:$0xf0]  ;;  %v4781_v2 = vld [vmem:[#allocation7 + $0xe4] sm:$0xf] }
  0x2a   :  { %269 = vmatpush.bf16.msra.mxu2 %v3438_v21  ;;  %v3569_v61 = vld [vmem:[#allocation7 + $0xe0] sm:$0xf]  ;;  %v4815_v1 = vld [vmem:[#allocation7 + $0x1ec] sm:$0xf0]  ;;  %v3571_v3 = vld [vmem:[#allocation7 + $0xf0] sm:$0xf0] }
  0x2b   :  { %v3697_v63 = vld [vmem:[#allocation7 + $0x1e0] sm:$0xf]  ;;  %v3570_v0 = vor.u32 %v4783_v62, %v3569_v61  ;;  %v293_v4 = vmul.f32 8.0, %v5339_v60  ;;  %v3574_v6 = vor.u32 %v4781_v2, %v3571_v3  ;;  %v4813_v7 = vld [vmem:[#allocation7 + $0x1e4] sm:$0xf] }
  0x2c   :  { %v3698_v5 = vor.u32 %v4815_v1, %v3697_v63  ;;  %v3699_v8 = vld [vmem:[#allocation7 + $0x1f0] sm:$0xf0]  ;;  %v3553_v10 = vld [vmem:[#allocation7 + $0xc0] sm:$0xf]  ;;  %v4779_v11 = vld [vmem:[#allocation7 + $0xcc] sm:$0xf0] }
  0x2d   :  { %257 = vmatpush.bf16.msra.mxu1 %v3426_v26  ;;  %766 = vmatpush.bf16.msra.mxu3 %v3570_v0  ;;  %v3702_v9 = vor.u32 %v4813_v7, %v3699_v8  ;;  %v3681_v12 = vld [vmem:[#allocation7 + $0x1c0] sm:$0xf]  ;;  %v3554_v13 = vor.u32 %v4779_v11, %v3553_v10  ;;  %v4811_v14 = vld [vmem:[#allocation7 + $0x1cc] sm:$0xf0]  ;;  %v4777_v15 = vld [vmem:[#allocation7 + $0xc4] sm:$0xf] }
  0x2e   :  { %270 = vmatpush.bf16.msra.mxu2 %v3430_v27  ;;  %779 = vmatpush.bf16.msrb.mxu0 %v3698_v5  ;;  %v3555_v16 = vld [vmem:[#allocation7 + $0xd0] sm:$0xf0]  ;;  %v294_v17 = vsub.f32 1.0, %v293_v4  ;;  %v3682_v18 = vor.u32 %v4811_v14, %v3681_v12  ;;  %v4809_v20 = vld [vmem:[#allocation7 + $0x1c4] sm:$0xf] }
  0x2f   :  { %v3558_v19 = vor.u32 %v4777_v15, %v3555_v16  ;;  %v3683_v21 = vld [vmem:[#allocation7 + $0x1d0] sm:$0xf0]  ;;  %v3537_v24 = vld [vmem:[#allocation7 + $0xa0] sm:$0xf]  ;;  %v4775_v25 = vld [vmem:[#allocation7 + $0xac] sm:$0xf0] }
  0x30   :  { %v3686_v23 = vor.u32 %v4809_v20, %v3683_v21  ;;  %v3665_v26 = vld [vmem:[#allocation7 + $0x1a0] sm:$0xf]  ;;  %v3538_v29 = vor.u32 %v4775_v25, %v3537_v24  ;;  %v4807_v30 = vld [vmem:[#allocation7 + $0x1ac] sm:$0xf0]  ;;  %v4773_v31 = vld [vmem:[#allocation7 + $0xa4] sm:$0xf] }
  0x31   :  { %258 = vmatpush.bf16.msra.mxu1 %v3418_v32  ;;  %767 = vmatpush.bf16.msra.mxu3 %v3554_v13  ;;  %v295_v32 = vmul.f32 %v5339_v60, %v294_v17  ;;  %v3539_v34 = vld [vmem:[#allocation7 + $0xb0] sm:$0xf0]  ;;  %v4805_v35 = vld [vmem:[#allocation7 + $0x1a4] sm:$0xf]  ;;  %v3521_v41 = vld [vmem:[#allocation7 + $0x80] sm:$0xf] }
  0x32   :  { %271 = vmatpush.bf16.msra.mxu2 %v3422_v33  ;;  %780 = vmatpush.bf16.msrb.mxu0 %v3682_v18  ;;  %v3666_v33 = vor.u32 %v4807_v30, %v3665_v26  ;;  %v3667_v36 = vld [vmem:[#allocation7 + $0x1b0] sm:$0xf0]  ;;  %v4771_v42 = vld [vmem:[#allocation7 + $0x8c] sm:$0xf0]  ;;  %v4769_v48 = vld [vmem:[#allocation7 + $0x84] sm:$0xf] }
  0x33   :  { %v3670_v40 = vor.u32 %v4805_v35, %v3667_v36  ;;  %v3522_v46 = vor.u32 %v4771_v42, %v3521_v41  ;;  %v4803_v47 = vld [vmem:[#allocation7 + $0x18c] sm:$0xf0]  ;;  %v3505_v63 = vld [vmem:[#allocation7 + $0x60] sm:$0xf]  ;;  %v4765_v7 = vld [vmem:[#allocation7 + $0x64] sm:$0xf] }
  0x34   :  { %v4767_v0 = vld [vmem:[#allocation7 + $0x6c] sm:$0xf0]  ;;  %v3633_v1 = vld [vmem:[#allocation7 + $0x160] sm:$0xf]  ;;  %v3507_v11 = vld [vmem:[#allocation7 + $0x70] sm:$0xf0] }
  0x35   :  { %259 = vmatpush.bf16.msra.mxu1 %v3410_v38  ;;  %768 = vmatpush.bf16.msra.mxu3 %v3538_v29  ;;  %v4797_v12 = vld [vmem:[#allocation7 + $0x164] sm:$0xf]  ;;  %v3635_v13 = vld [vmem:[#allocation7 + $0x170] sm:$0xf0]  ;;  %v3510_v18 = vor.u32 %v4765_v7, %v3507_v11  ;;  %v3489_v20 = vld [vmem:[#allocation7 + $0x40] sm:$0xf] }
  0x36   :  { %272 = vmatpush.bf16.msra.mxu2 %v3414_v39  ;;  %v3542_v39 = vor.u32 %v4773_v31, %v3539_v34  ;;  %781 = vmatpush.bf16.msrb.mxu0 %v3666_v33  ;;  %v4763_v21 = vld [vmem:[#allocation7 + $0x4c] sm:$0xf0]  ;;  %v4793_v33 = vld [vmem:[#allocation7 + $0x144] sm:$0xf]  ;;  %v3619_v34 = vld [vmem:[#allocation7 + $0x150] sm:$0xf0] }
  0x37   :  { %v3490_v30 = vor.u32 %v4763_v21, %v3489_v20  ;;  %v3473_v41 = vld [vmem:[#allocation7 + $0x20] sm:$0xf]  ;;  %v4759_v42 = vld [vmem:[#allocation7 + $0x2c] sm:$0xf0]  ;;  %v3459_v7 = vld [vmem:[#allocation7 + $0x10] sm:$0xf0] }
  0x38   :  { %v3579_v20 = vld [vmem:[#allocation7 + $0xf8] sm:$0xf0] }
  0x39   :  { %260 = vmatpush.bf16.msra.mxu1 %v3402_v43  ;;  %v3649_v43 = vld [vmem:[#allocation7 + $0x180] sm:$0xf]  ;;  %769 = vmatpush.bf16.msra.mxu3 %v3522_v46  ;;  %v3474_v46 = vor.u32 %v4759_v42, %v3473_v41  ;;  %v3545_v42 = vld [vmem:[#allocation7 + $0xa8] sm:$0xf] }
  0x3a   :  { %273 = vmatpush.bf16.msra.mxu2 %v3406_v45 }
  0x3d   :  { %261 = vmatpush.bf16.msra.mxu1 %v3394_v49  ;;  %v296_v49 = vadd.f32 %v5339_v60, %v295_v32  ;;  %v3491_v32 = vld [vmem:[#allocation7 + $0x50] sm:$0xf0] }
  0x3e   :  { %274 = vmatpush.bf16.msra.mxu2 %v3398_v51  ;;  %v3650_v51 = vor.u32 %v4803_v47, %v3649_v43  ;;  %v3601_v47 = vld [vmem:[#allocation7 + $0x120] sm:$0xf] }
  0x3f   :  { %v5360_v8 = vsel %vm297_vm1, %v5339_v60, %v296_v49 }
  0x40   :  { %782 = vmatpush.bf16.msrb.mxu0 %v3650_v51  ;;  %v4757_v51 = vld [vmem:[#allocation7 + $0x24] sm:$0xf] }
  0x41   :  { %792 = vmatpush.bf16.msrb.mxu1 %v3574_v6  ;;  %v4799_v6 = vld [vmem:[#allocation7 + $0x16c] sm:$0xf0] }
  0x42   :  { %805 = vmatpush.bf16.msrb.mxu2 %v3702_v9  ;;  %v3506_v9 = vor.u32 %v4767_v0, %v3505_v63  ;;  %v3634_v10 = vor.u32 %v4799_v6, %v3633_v1  ;;  %v3585_v63 = vld [vmem:[#allocation7 + $0x100] sm:$0xf] }
  0x44   :  { %770 = vmatpush.bf16.msra.mxu3 %v3506_v9  ;;  %783 = vmatpush.bf16.msrb.mxu0 %v3634_v10  ;;  %v4785_v9 = vld [vmem:[#allocation7 + $0x104] sm:$0xf]  ;;  %v3587_v10 = vld [vmem:[#allocation7 + $0x110] sm:$0xf0] }
  0x45   :  { %793 = vmatpush.bf16.msrb.mxu1 %v3558_v19  ;;  %v3638_v19 = vor.u32 %v4797_v12, %v3635_v13  ;;  %v3577_v13 = vld [vmem:[#allocation7 + $0xe8] sm:$0xf] }
  0x46   :  { %806 = vmatpush.bf16.msrb.mxu2 %v3686_v23  ;;  %v3617_v23 = vld [vmem:[#allocation7 + $0x140] sm:$0xf] }
  0x48   :  { %771 = vmatpush.bf16.msra.mxu3 %v3490_v30  ;;  %v3689_v30 = vld [vmem:[#allocation7 + $0x1c8] sm:$0xf] }
  0x49   :  { %794 = vmatpush.bf16.msrb.mxu1 %v3542_v39 }
  0x4a   :  { %807 = vmatpush.bf16.msrb.mxu2 %v3670_v40  ;;  %v3622_v40 = vor.u32 %v4793_v33, %v3619_v34  ;;  %v4812_v33 = vld [vmem:[#allocation7 + $0x1d4] sm:$0xf0]  ;;  %v4778_v34 = vld [vmem:[#allocation7 + $0xcc] sm:$0xf] }
  0x4c   :  { %772 = vmatpush.bf16.msra.mxu3 %v3474_v46  ;;  %v4808_v46 = vld [vmem:[#allocation7 + $0x1b4] sm:$0xf0] }
  0xa2   :  { %v149_v53 = vpop.f32.mrf.mxu0 }
  0xa3   :  { %v150_v54 = vadd.f32 %v5088_v52, %v149_v53  ;;  %v3523_v52 = vld [vmem:[#allocation7 + $0x90] sm:$0xf0]  ;;  %v4801_v53 = vld [vmem:[#allocation7 + $0x184] sm:$0xf] }
  0xa4   :  { %v3526_v61 = vor.u32 %v4769_v48, %v3523_v52  ;;  %v4791_v48 = vld [vmem:[#allocation7 + $0x12c] sm:$0xf0]  ;;  %v3475_v52 = vld [vmem:[#allocation7 + $0x30] sm:$0xf0] }
  0xa5   :  { %v153_v55 = vmul.f32 0.2, %v150_v54  ;;  %v3602_v49 = vor.u32 %v4791_v48, %v3601_v47  ;;  %v4774_v47 = vld [vmem:[#allocation7 + $0xac] sm:$0xf]  ;;  %v3547_v48 = vld [vmem:[#allocation7 + $0xb8] sm:$0xf0] }
  0xa6   :  { %795 = vmatpush.bf16.msrb.mxu1 %v3526_v61  ;;  %v3457_v61 = vld [vmem:[#allocation7] sm:$0xf] }
  0xa7   :  { %v154_v56 = vmax.f32 %v150_v54, %v153_v55  ;;  %v3651_v54 = vld [vmem:[#allocation7 + $0x190] sm:$0xf0] }
  0xa8   :  { %v3654_v62 = vor.u32 %v4801_v53, %v3651_v54  ;;  %v4789_v53 = vld [vmem:[#allocation7 + $0x124] sm:$0xf] }
  0xa9   :  { %v155_v57 = vpack.c.bf16 %v154_v56, %v154_v56 }
  0xaa   :  { %v151_v58 = vpop.f32.mrf.mxu0  ;;  %808 = vmatpush.bf16.msrb.mxu2 %v3654_v62  ;;  %796 = vmatpush.bf16.msrb.mxu1 %v3510_v18  ;;  %v4755_v62 = vld [vmem:[#allocation7 + $0xc] sm:$0xf0]  ;;  %v4816_v18 = vld [vmem:[#allocation7 + $0x1f4] sm:$0xf0] }
  0xab   :  { %262 = vmatmul.bf16.vlgmr.msra.gmra.mxu1 %v155_v57  ;;  %275 = vmatmul.bf16.vlgmr.msra.gmra.mxu2 %v155_v57 }
  0xae   :  { %809 = vmatpush.bf16.msrb.mxu2 %v3638_v19  ;;  %v4782_v19 = vld [vmem:[#allocation7 + $0xec] sm:$0xf] }
  0xb2   :  { %810 = vmatpush.bf16.msrb.mxu2 %v3622_v40 }
 0x128   :  { %v5342_v22 = vpop.f32.mrf.mxu1 }
 0x129   :  { %v280_v27 = vrot.slane %v5342_v22, 4  ;;  %v301_v28 = vmul.f32 %v5342_v22, %v5342_v22 }
 0x12b   :  { %v281_v37 = vadd.f32 %v280_v27, %v5342_v22  ;;  %v303_v38 = vrot.slane %v301_v28, 4  ;;  %v4795_v27 = vld [vmem:[#allocation7 + $0x14c] sm:$0xf0] }
 0x12c   :  { %v3618_v31 = vor.u32 %v4795_v27, %v3617_v23 }
 0x12d   :  { %v282_v44 = vrot.slane %v281_v37, 2  ;;  %v304_v45 = vadd.f32 %v303_v38, %v301_v28  ;;  %v4761_v28 = vld [vmem:[#allocation7 + $0x44] sm:$0xf] }
 0x12e   :  { %v5351_v50 = vpop.f32.mrf.mxu2  ;;  %784 = vmatpush.bf16.msrb.mxu0 %v3618_v31  ;;  %v3494_v39 = vor.u32 %v4761_v28, %v3491_v32  ;;  %v3561_v28 = vld [vmem:[#allocation7 + $0xc8] sm:$0xf] }
 0x12f   :  { %v283_v55 = vadd.f32 %v282_v44, %v281_v37  ;;  %v305_v56 = vrot.slane %v304_v45, 2  ;;  %v286_v57 = vrot.slane %v5351_v50, 4  ;;  %v302_v58 = vmul.f32 %v5351_v50, %v5351_v50 }
 0x130   :  { %v265_v59 = vpop.f32.mrf.mxu1  ;;  %797 = vmatpush.bf16.msrb.mxu1 %v3494_v39 }
 0x131   :  { %v284_v2 = vrot.slane %v283_v55, 1  ;;  %v306_v3 = vadd.f32 %v305_v56, %v304_v45  ;;  %v287_v4 = vadd.f32 %v286_v57, %v5351_v50  ;;  %v309_v5 = vrot.slane %v302_v58, 4 }
 0x132   :  { %v3478_v57 = vor.u32 %v4757_v51, %v3475_v52  ;;  %785 = vmatpush.bf16.msrb.mxu0 %v3602_v49  ;;  %v4806_v52 = vld [vmem:[#allocation7 + $0x1ac] sm:$0xf] }
 0x133   :  { %v285_v14 = vadd.f32 %v284_v2, %v283_v55  ;;  %v307_v15 = vrot.slane %v306_v3, 1  ;;  %v288_v16 = vrot.slane %v287_v4, 2  ;;  %v310_v17 = vadd.f32 %v309_v5, %v302_v58  ;;  %v3603_v58 = vld [vmem:[#allocation7 + $0x130] sm:$0xf0]  ;;  %v4753_v5 = vld [vmem:[#allocation7 + $0x4] sm:$0xf] }
 0x134   :  { %v3606_v59 = vor.u32 %v4789_v53, %v3603_v58  ;;  %798 = vmatpush.bf16.msrb.mxu1 %v3478_v57  ;;  %v3462_v12 = vor.u32 %v4753_v5, %v3459_v7  ;;  %v3675_v53 = vld [vmem:[#allocation7 + $0x1b8] sm:$0xf0]  ;;  %v3529_v58 = vld [vmem:[#allocation7 + $0x88] sm:$0xf] }
 0x135   :  { %v5363_v60 = vmul.f32 %v5360_v8, %v285_v14  ;;  %v308_v24 = vadd.f32 %v307_v15, %v306_v3  ;;  %v289_v25 = vadd.f32 %v288_v16, %v287_v4  ;;  %v311_v26 = vrot.slane %v310_v17, 2  ;;  %v4787_v4 = vld [vmem:[#allocation7 + $0x10c] sm:$0xf0]  ;;  %v4784_v14 = vld [vmem:[#allocation7 + $0xf4] sm:$0xf0] }
 0x136   :  { %v278_v29 = vpop.f32.mrf.mxu2  ;;  %v3458_v3 = vor.u32 %v4755_v62, %v3457_v61  ;;  %811 = vmatpush.bf16.msrb.mxu2 %v3606_v59  ;;  %v3586_v6 = vor.u32 %v4787_v4, %v3585_v63  ;;  %v3705_v15 = vld [vmem:[#allocation7 + $0x1e8] sm:$0xf]  ;;  %v3590_v16 = vor.u32 %v4785_v9, %v3587_v10  ;;  %v3678_v57 = vor.u32 %v4806_v52, %v3675_v53  ;;  %v4772_v59 = vld [vmem:[#allocation7 + $0x94] sm:$0xf0]  ;;  %v3531_v5 = vld [vmem:[#allocation7 + $0x98] sm:$0xf0] }
 0x137   :  { %v315_v35 = vmul.f32 %v308_v24, %v5360_v8  ;;  %v317_v36 = vmul.f32 %v5363_v60, %v5363_v60  ;;  %v290_v37 = vrot.slane %v289_v25, 1  ;;  %v312_v38 = vadd.f32 %v311_v26, %v310_v17  ;;  %v3707_v26 = vld [vmem:[#allocation7 + $0x1f8] sm:$0xf0]  ;;  %v4780_v29 = vld [vmem:[#allocation7 + $0xd4] sm:$0xf0] }
 0x138   :  { %773 = vmatpush.bf16.msra.mxu3 %v3458_v3  ;;  %786 = vmatpush.bf16.msrb.mxu0 %v3586_v6  ;;  %v3578_v17 = vor.u32 %v4784_v14, %v3577_v13  ;;  %v3706_v23 = vor.u32 %v4816_v18, %v3705_v15  ;;  %v3582_v24 = vor.u32 %v4782_v19, %v3579_v20  ;;  %v3657_v61 = vld [vmem:[#allocation7 + $0x188] sm:$0xf]  ;;  %v4804_v63 = vld [vmem:[#allocation7 + $0x194] sm:$0xf0]  ;;  %v4802_v6 = vld [vmem:[#allocation7 + $0x18c] sm:$0xf] }
 0x139   :  { %v319_v43 = vsub.f32 %v315_v35, %v317_v36  ;;  %v291_v44 = vadd.f32 %v290_v37, %v289_v25  ;;  %v313_v45 = vrot.slane %v312_v38, 1  ;;  %v4814_v25 = vld [vmem:[#allocation7 + $0x1ec] sm:$0xf]  ;;  %799 = vmatpush.bf16.msrb.mxu1 %v3462_v12  ;;  %v3562_v32 = vor.u32 %v4780_v29, %v3561_v28  ;;  %v3563_v36 = vld [vmem:[#allocation7 + $0xd8] sm:$0xf0] }
 0x13a   :  { %812 = vmatpush.bf16.msrb.mxu2 %v3590_v16  ;;  %v3710_v27 = vor.u32 %v4814_v25, %v3707_v26  ;;  %v3690_v35 = vor.u32 %v4812_v33, %v3689_v30  ;;  %v4810_v37 = vld [vmem:[#allocation7 + $0x1cc] sm:$0xf]  ;;  %v3566_v40 = vor.u32 %v4778_v34, %v3563_v36  ;;  %v3530_v3 = vor.u32 %v4772_v59, %v3529_v58  ;;  %v3659_v7 = vld [vmem:[#allocation7 + $0x198] sm:$0xf0]  ;;  %v3513_v14 = vld [vmem:[#allocation7 + $0x68] sm:$0xf] }
 0x13b   :  { %v321_v54 = vmax.f32 %v319_v43, 0.0  ;;  %v5369_v55 = vmul.f32 %v5360_v8, %v291_v44  ;;  %v314_v56 = vadd.f32 %v313_v45, %v312_v38  ;;  %v3691_v38 = vld [vmem:[#allocation7 + $0x1d8] sm:$0xf0]  ;;  %v4776_v43 = vld [vmem:[#allocation7 + $0xb4] sm:$0xf0]  ;;  %v3658_v4 = vor.u32 %v4804_v63, %v3657_v61 }
 0x13c   :  { %818 = vmatpush.bf16.msrb.mxu3 %v3578_v17  ;;  %831 = vmatpush.bf16.msra.mxu0 %v3706_v23  ;;  %v3694_v41 = vor.u32 %v4810_v37, %v3691_v38  ;;  %v3673_v44 = vld [vmem:[#allocation7 + $0x1a8] sm:$0xf]  ;;  %v3546_v49 = vor.u32 %v4776_v43, %v3545_v42  ;;  %v3662_v12 = vor.u32 %v4802_v6, %v3659_v7  ;;  %v4768_v15 = vld [vmem:[#allocation7 + $0x74] sm:$0xf0]  ;;  %v4766_v19 = vld [vmem:[#allocation7 + $0x6c] sm:$0xf] }
 0x13d   :  { %v5371_v0 = vadd.f32 0.8, %v321_v54  ;;  %v316_v1 = vmul.f32 %v314_v56, %v5360_v8  ;;  %v318_v2 = vmul.f32 %v5369_v55, %v5369_v55  ;;  %844 = vmatpush.bf16.msra.mxu1 %v3582_v24  ;;  %v3674_v51 = vor.u32 %v4808_v46, %v3673_v44  ;;  %v3641_v16 = vld [vmem:[#allocation7 + $0x168] sm:$0xf]  ;;  %v4800_v18 = vld [vmem:[#allocation7 + $0x174] sm:$0xf0] }
 0x13e   :  { %857 = vmatpush.bf16.msra.mxu2 %v3710_v27  ;;  %v3550_v56 = vor.u32 %v4774_v47, %v3547_v48  ;;  %v3514_v17 = vor.u32 %v4768_v15, %v3513_v14  ;;  %v3515_v20 = vld [vmem:[#allocation7 + $0x78] sm:$0xf0]  ;;  %v3642_v23 = vor.u32 %v4800_v18, %v3641_v16  ;;  %v4798_v25 = vld [vmem:[#allocation7 + $0x16c] sm:$0xf]  ;;  %v3497_v28 = vld [vmem:[#allocation7 + $0x48] sm:$0xf] }
 0x13f   :  { %5091 = vrsqrt.f32 %v5371_v0  ;;  %v320_v11 = vsub.f32 %v316_v1, %v318_v2  ;;  %v4770_v1 = vld [vmem:[#allocation7 + $0x8c] sm:$0xf]  ;;  %v3518_v24 = vor.u32 %v4766_v19, %v3515_v20  ;;  %v3643_v26 = vld [vmem:[#allocation7 + $0x178] sm:$0xf0]  ;;  %v4764_v29 = vld [vmem:[#allocation7 + $0x54] sm:$0xf0]  ;;  %vm331_vm6 = vweird.f32 %v5371_v0 }
 0x140   :  { %819 = vmatpush.bf16.msrb.mxu3 %v3562_v32  ;;  %832 = vmatpush.bf16.msra.mxu0 %v3690_v35  ;;  %v3534_v10 = vor.u32 %v4770_v1, %v3531_v5  ;;  %v3646_v27 = vor.u32 %v4798_v25, %v3643_v26  ;;  %v3625_v30 = vld [vmem:[#allocation7 + $0x148] sm:$0xf]  ;;  %v4796_v34 = vld [vmem:[#allocation7 + $0x154] sm:$0xf0]  ;;  %v4762_v35 = vld [vmem:[#allocation7 + $0x4c] sm:$0xf]  ;;  %v3498_v37 = vor.u32 %v4764_v29, %v3497_v28 }
 0x141   :  { %v322_v21 = vmax.f32 %v320_v11, 0.0  ;;  %845 = vmatpush.bf16.msra.mxu1 %v3566_v40  ;;  %v3626_v38 = vor.u32 %v4796_v34, %v3625_v30  ;;  %v4794_v40 = vld [vmem:[#allocation7 + $0x14c] sm:$0xf]  ;;  %v4760_v46 = vld [vmem:[#allocation7 + $0x34] sm:$0xf0] }
 0x142   :  { %858 = vmatpush.bf16.msra.mxu2 %v3694_v41  ;;  %v3627_v41 = vld [vmem:[#allocation7 + $0x158] sm:$0xf0]  ;;  %v3609_v47 = vld [vmem:[#allocation7 + $0x128] sm:$0xf]  ;;  %v156_v48 = vld [vmem:[#allocation10 + $0x1] sm:$0x3] }
 0x143   :  { %v5377_v31 = vadd.f32 0.8, %v322_v21  ;;  %v3630_v44 = vor.u32 %v4794_v40, %v3627_v41  ;;  %v3483_v52 = vld [vmem:[#allocation7 + $0x38] sm:$0xf0]  ;;  %v4754_v5 = vld [vmem:[#allocation7 + $0xc] sm:$0xf] }
 0x144   :  { %820 = vmatpush.bf16.msrb.mxu3 %v3546_v49  ;;  %833 = vmatpush.bf16.msra.mxu0 %v3674_v51  ;;  %v4792_v49 = vld [vmem:[#allocation7 + $0x134] sm:$0xf0]  ;;  %v4758_v51 = vld [vmem:[#allocation7 + $0x2c] sm:$0xf]  ;;  %v3467_v7 = vld [vmem:[#allocation7 + $0x18] sm:$0xf0] }
 0x145   :  { %v5379_v39 = vpop.eup %5091  ;;  %5093 = vrsqrt.f32 %v5377_v31  ;;  %846 = vmatpush.bf16.msra.mxu1 %v3550_v56  ;;  %vm341_vm3 = vweird.f32 %v5377_v31  ;;  %v3611_v56 = vld [vmem:[#allocation7 + $0x138] sm:$0xf0]  ;;  %v3610_v61 = vor.u32 %v4792_v49, %v3609_v47  ;;  %v3486_v1 = vor.u32 %v4758_v51, %v3483_v52  ;;  %v157_v18 = vld [vmem:[#allocation10 + $0x3] sm:$0x3] }
 0x146   :  { %v326_v45 = vmul.f32 %v5379_v39, %v5371_v0  ;;  %859 = vmatpush.bf16.msra.mxu2 %v3678_v57  ;;  %vm332_vm5 = vweird.f32 %v5379_v39  ;;  %v4756_v0 = vld [vmem:[#allocation7 + $0x14] sm:$0xf0]  ;;  %v4449_v40 = vld [vmem:[#allocation9 + $0x5c0] sm:$0xf] }
 0x147   :  { %vm5407_vm8 = vmor %vm331_vm6, %vm332_vm5  ;;  %v5005_v41 = vld [vmem:[#allocation9 + $0x5dc] sm:$0xf0]  ;;  %vm996_vm6 = vcmask 1041408  }
 0x148   :  { %v327_v54 = vmul.f32 %v5379_v39, %v326_v45  ;;  %821 = vmatpush.bf16.msrb.mxu3 %v3530_v3  ;;  %834 = vmatpush.bf16.msra.mxu0 %v3658_v4  ;;  %v3481_v45 = vld [vmem:[#allocation7 + $0x28] sm:$0xf]  ;;  %v4788_v4 = vld [vmem:[#allocation7 + $0x114] sm:$0xf0]  ;;  %v4869_v49 = vld [vmem:[#allocation9 + $0x19c] sm:$0xf0] }
 0x149   :  { %847 = vmatpush.bf16.msra.mxu1 %v3534_v10  ;;  %v3482_v59 = vor.u32 %v4760_v46, %v3481_v45  ;;  %v3593_v3 = vld [vmem:[#allocation7 + $0x108] sm:$0xf]  ;;  %v3595_v10 = vld [vmem:[#allocation7 + $0x118] sm:$0xf0]  ;;  %v5069_v45 = vld [vmem:[#allocation9 + $0x7dc] sm:$0xf0] }
 0x14a   :  { %v328_v62 = vmul.f32 0.5, %v327_v54  ;;  %860 = vmatpush.bf16.msra.mxu2 %v3662_v12  ;;  %v4790_v54 = vld [vmem:[#allocation7 + $0x12c] sm:$0xf]  ;;  %v4161_v51 = vld [vmem:[#allocation9 + $0x380] sm:$0xf] }
 0x14b   :  { %v5385_v2 = vpop.eup %5093  ;;  %v4417_v57 = vld [vmem:[#allocation9 + $0x580] sm:$0xf] }
 0x14c   :  { %v336_v9 = vmul.f32 %v5385_v2, %v5377_v31  ;;  %v329_v11 = vsub.f32 1.5, %v328_v62  ;;  %vm342_vm2 = vweird.f32 %v5385_v2  ;;  %822 = vmatpush.bf16.msrb.mxu3 %v3514_v17  ;;  %835 = vmatpush.bf16.msra.mxu0 %v3642_v23  ;;  %v3499_v31 = vld [vmem:[#allocation7 + $0x58] sm:$0xf0]  ;;  %v3465_v62 = vld [vmem:[#allocation7 + $0x8] sm:$0xf] }
 0x14d   :  { %vm5394_vm4 = vmor %vm341_vm3, %vm342_vm2  ;;  %848 = vmatpush.bf16.msra.mxu1 %v3518_v24  ;;  %v3502_v43 = vor.u32 %v4762_v35, %v3499_v31  ;;  %v3466_v12 = vor.u32 %v4756_v0, %v3465_v62  ;;  %v4941_v31 = vld [vmem:[#allocation9 + $0x3dc] sm:$0xf0] }
 0x14e   :  { %v337_v13 = vmul.f32 %v5385_v2, %v336_v9  ;;  %v330_v36 = vmul.f32 %v5379_v39, %v329_v11  ;;  %861 = vmatpush.bf16.msra.mxu2 %v3646_v27  ;;  %v4786_v9 = vld [vmem:[#allocation7 + $0x10c] sm:$0xf] }
 0x14f   :  { %v3598_v16 = vor.u32 %v4786_v9, %v3595_v10  ;;  %v3873_v9 = vld [vmem:[#allocation9 + $0x140] sm:$0xf] }
 0x150   :  { %v338_v21 = vmul.f32 0.5, %v337_v13  ;;  %823 = vmatpush.bf16.msrb.mxu3 %v3498_v37  ;;  %836 = vmatpush.bf16.msra.mxu0 %v3626_v38  ;;  %v334_v63 = vsel %vm5407_vm8, %v5379_v39, %v330_v36  ;;  %v3594_v13 = vor.u32 %v4788_v4, %v3593_v3  ;;  %v3470_v39 = vor.u32 %v4754_v5, %v3467_v7  ;;  %v4877_v36 = vld [vmem:[#allocation9 + $0x1dc] sm:$0xf0] }
 0x151   :  { %849 = vmatpush.bf16.msra.mxu1 %v3502_v43  ;;  %v4193_v37 = vld [vmem:[#allocation9 + $0x3c0] sm:$0xf]  ;;  %v4450_v43 = vor.u32 %v5005_v41, %v4449_v40 }
 0x152   :  { %v339_v32 = vsub.f32 1.5, %v338_v21  ;;  %862 = vmatpush.bf16.msra.mxu2 %v3630_v44  ;;  %v4705_v44 = vld [vmem:[#allocation9 + $0x7c0] sm:$0xf] }
 0x153   :  { %v4706_v46 = vor.u32 %v5069_v45, %v4705_v44  ;;  %v4861_v10 = vld [vmem:[#allocation9 + $0x15c] sm:$0xf0] }
 0x154   :  { %v340_v42 = vmul.f32 %v5385_v2, %v339_v32  ;;  %824 = vmatpush.bf16.msrb.mxu3 %v3482_v59  ;;  %837 = vmatpush.bf16.msra.mxu0 %v3610_v61  ;;  %v4981_v40 = vld [vmem:[#allocation9 + $0x51c] sm:$0xf0] }
 0x155   :  { %850 = vmatpush.bf16.msra.mxu1 %v3486_v1  ;;  %v5061_v1 = vld [vmem:[#allocation9 + $0x79c] sm:$0xf0] }
 0x156   :  { %v344_v53 = vsel %vm5394_vm4, %v5385_v2, %v340_v42  ;;  %v3614_v2 = vor.u32 %v4790_v54, %v3611_v56  ;;  %v4194_v42 = vor.u32 %v4941_v31, %v4193_v37  ;;  %v4933_v56 = vld [vmem:[#allocation9 + $0x39c] sm:$0xf0]  ;;  %vm994_vm4 = vcmask 1042434  }
 0x157   :  { %v347_v58 = vrot.slane %v344_v53, 7  ;;  %v4162_v62 = vor.u32 %v4933_v56, %v4161_v51  ;;  %v4353_v31 = vld [vmem:[#allocation9 + $0x500] sm:$0xf] }
 0x158   :  { %863 = vmatpush.bf16.msra.mxu2 %v3614_v2  ;;  %825 = vmatpush.bf16.msrb.mxu3 %v3466_v12  ;;  %v4354_v44 = vor.u32 %v4981_v40, %v4353_v31  ;;  %v4609_v45 = vld [vmem:[#allocation9 + $0x700] sm:$0xf] }
 0x159   :  { %v349_v6 = vsel %vm348_vm7, %v334_v63, %v347_v58  ;;  %838 = vmatpush.bf16.msra.mxu0 %v3594_v13  ;;  %851 = vmatpush.bf16.msra.mxu1 %v3470_v39  ;;  %v4997_v58 = vld [vmem:[#allocation9 + $0x59c] sm:$0xf0]  ;;  %v3874_v13 = vor.u32 %v4861_v10, %v3873_v9 }
 0x15a   :  { %v351_v11 = vmul.f32 %v349_v6, %v156_v48  ;;  %v3905_v48 = vld [vmem:[#allocation9 + $0x180] sm:$0xf]  ;;  %v4418_v0 = vor.u32 %v4997_v58, %v4417_v57 }
 0x15b   :  { %v3906_v54 = vor.u32 %v4869_v49, %v3905_v48  ;;  %v4673_v63 = vld [vmem:[#allocation9 + $0x780] sm:$0xf] }
 0x15c   :  { %v353_v14 = vperm.slane %v351_v11, 0  ;;  %v354_v15 = vperm.slane %v351_v11, 1  ;;  %864 = vmatpush.bf16.msra.mxu2 %v3598_v16  ;;  %v4674_v5 = vor.u32 %v5061_v1, %v4673_v63  ;;  %v3809_v51 = vld [vmem:[#allocation9 + $0xc0] sm:$0xf] }
 0x15d   :  { %v4065_v58 = vld [vmem:[#allocation9 + $0x2c0] sm:$0xf] }
 0x15e   :  { %v358_v17 = vmul.f32 %v354_v15, %v5369_v55  ;;  %v357_v19 = vmul.f32 %v353_v14, %v5363_v60  ;;  %v366_v24 = vmul.f32 %v354_v15, %v5351_v50  ;;  %v365_v26 = vmul.f32 %v353_v14, %v5342_v22  ;;  %v3937_v22 = vld [vmem:[#allocation9 + $0x1c0] sm:$0xf] }
 0x15f   :  { %v3938_v38 = vor.u32 %v4877_v36, %v3937_v22  ;;  %v4129_v14 = vld [vmem:[#allocation9 + $0x340] sm:$0xf] }
 0x160   :  { %v361_v20 = vrot.slane %v358_v17, 7  ;;  %v4925_v15 = vld [vmem:[#allocation9 + $0x35c] sm:$0xf0] }
 0x161   :  { %v4130_v17 = vor.u32 %v4925_v15, %v4129_v14  ;;  %v4321_v1 = vld [vmem:[#allocation9 + $0x4c0] sm:$0xf] }
 0x162   :  { %v362_v21 = vsel %vm348_vm7, %v357_v19, %v361_v20  ;;  %v4989_v19 = vld [vmem:[#allocation9 + $0x55c] sm:$0xf0] }
 0x163   :  { %v364_v23 = vsub.f32 %v157_v18, %v362_v21  ;;  %v4385_v18 = vld [vmem:[#allocation9 + $0x540] sm:$0xf] }
 0x164   :  { %v4837_v14 = vld [vmem:[#allocation9 + $0x9c] sm:$0xf0] }
 0x165   :  { %v369_v25 = vperm.slane %v364_v23, 1  ;;  %v368_v27 = vperm.slane %v364_v23, 0  ;;  %v4386_v23 = vor.u32 %v4989_v19, %v4385_v18  ;;  %v4033_v15 = vld [vmem:[#allocation9 + $0x280] sm:$0xf] }
 0x167   :  { %v373_v28 = vadd.f32 %v369_v25, %v366_v24  ;;  %v372_v29 = vadd.f32 %v368_v27, %v365_v26  ;;  %v4641_v24 = vld [vmem:[#allocation9 + $0x740] sm:$0xf] }
 0x168   :  { %v5053_v25 = vld [vmem:[#allocation9 + $0x75c] sm:$0xf0] }
 0x169   :  { %v375_v55 = vmul.f32 0.2, %v373_v28  ;;  %v374_v30 = vmul.f32 0.2, %v372_v29 }
 0x16b   :  { %v376_v32 = vmax.f32 %v372_v29, %v374_v30  ;;  %v377_v33 = vmax.f32 %v373_v28, %v375_v55  ;;  %v4642_v29 = vor.u32 %v5053_v25, %v4641_v24  ;;  %v3841_v55 = vld [vmem:[#allocation9 + $0x100] sm:$0xf] }
 0x16c   :  { %v4853_v30 = vld [vmem:[#allocation9 + $0x11c] sm:$0xf0] }
 0x16d   :  { %v378_v34 = vpack.c.bf16 %v376_v32, %v376_v32  ;;  %v379_v60 = vpack.c.bf16 %v377_v33, %v377_v33 }
 0x16f   :  { %774 = vmatmul.bf16.vlgmr.msra.gmra.mxu3 %v378_v34  ;;  %787 = vmatmul.bf16.vlgmr.msrb.gmra.mxu0 %v379_v60 }
 0x170   :  { %800 = vmatmul.bf16.vlgmr.msrb.gmra.mxu1 %v378_v34  ;;  %813 = vmatmul.bf16.vlgmr.msrb.gmra.mxu2 %v379_v60 }
 0x171   :  { %2592 = vmatpush.bf16.msra.mxu3 %v3938_v38  ;;  %2605 = vmatpush.bf16.msrb.mxu0 %v4194_v42 }
 0x172   :  { %2618 = vmatpush.bf16.msrb.mxu1 %v4450_v43  ;;  %2631 = vmatpush.bf16.msrb.mxu2 %v4706_v46  ;;  %v5045_v46 = vld [vmem:[#allocation9 + $0x71c] sm:$0xf0] }
 0x173   :  { %v4610_v49 = vor.u32 %v5045_v46, %v4609_v45 }
 0x175   :  { %2593 = vmatpush.bf16.msra.mxu3 %v3906_v54  ;;  %2606 = vmatpush.bf16.msrb.mxu0 %v4162_v62 }
 0x176   :  { %2619 = vmatpush.bf16.msrb.mxu1 %v4418_v0  ;;  %2632 = vmatpush.bf16.msrb.mxu2 %v4674_v5 }
 0x179   :  { %2594 = vmatpush.bf16.msra.mxu3 %v3874_v13  ;;  %2607 = vmatpush.bf16.msrb.mxu0 %v4130_v17  ;;  %v3777_v13 = vld [vmem:[#allocation9 + $0x80] sm:$0xf] }
 0x17a   :  { %2620 = vmatpush.bf16.msrb.mxu1 %v4386_v23  ;;  %2633 = vmatpush.bf16.msrb.mxu2 %v4642_v29  ;;  %v3778_v19 = vor.u32 %v4837_v14, %v3777_v13  ;;  %v4965_v23 = vld [vmem:[#allocation9 + $0x49c] sm:$0xf0] }
 0x17b   :  { %v4545_v29 = vld [vmem:[#allocation9 + $0x680] sm:$0xf] }
 0x17e   :  { %2621 = vmatpush.bf16.msrb.mxu1 %v4354_v44  ;;  %2634 = vmatpush.bf16.msrb.mxu2 %v4610_v49  ;;  %v4893_v44 = vld [vmem:[#allocation9 + $0x25c] sm:$0xf0] }
 0x17f   :  { %826 = vmatmul.bf16.vlgmr.msrb.gmra.mxu3 %v378_v34  ;;  %839 = vmatmul.bf16.vlgmr.msra.gmra.mxu0 %v379_v60  ;;  %v4257_v49 = vld [vmem:[#allocation9 + $0x440] sm:$0xf] }
 0x180   :  { %852 = vmatmul.bf16.vlgmr.msra.gmra.mxu1 %v378_v34  ;;  %865 = vmatmul.bf16.vlgmr.msra.gmra.mxu2 %v379_v60  ;;  %v3842_v60 = vor.u32 %v4853_v30, %v3841_v55  ;;  %v5029_v55 = vld [vmem:[#allocation9 + $0x69c] sm:$0xf0] }
 0x182   :  { %2595 = vmatpush.bf16.msra.mxu3 %v3842_v60 }
 0x1ec   :  { %v788_v50 = vpop.f32.mrf.mxu0 }
 0x1ed   :  { %v801_v35 = vpop.f32.mrf.mxu1 }
 0x1f2   :  { %v775_v47 = vpop.f32.mrf.mxu3 }
 0x1f3   :  { %v5420_v52 = vadd.f32 %v788_v50, %v775_v47  ;;  %v814_v53 = vpop.f32.mrf.mxu2  ;;  %v4097_v50 = vld [vmem:[#allocation9 + $0x300] sm:$0xf] }
 0x1f4   :  { %v5422_v59 = vadd.f32 %v814_v53, %v801_v35  ;;  %v790_v61 = vpop.f32.mrf.mxu0  ;;  %v4917_v35 = vld [vmem:[#allocation9 + $0x31c] sm:$0xf0] }
 0x1f5   :  { %v870_v2 = vrot.slane %v5420_v52, 4  ;;  %v898_v3 = vmul.f32 %v5420_v52, %v5420_v52  ;;  %v803_v4 = vpop.f32.mrf.mxu1  ;;  %v4098_v38 = vor.u32 %v4917_v35, %v4097_v50  ;;  %v4845_v53 = vld [vmem:[#allocation9 + $0xdc] sm:$0xf0] }
 0x1f6   :  { %v876_v6 = vrot.slane %v5422_v59, 4  ;;  %v899_v7 = vmul.f32 %v5422_v59, %v5422_v59  ;;  %v3810_v57 = vor.u32 %v4845_v53, %v3809_v51  ;;  %v4909_v61 = vld [vmem:[#allocation9 + $0x2dc] sm:$0xf0] }
 0x1f7   :  { %v871_v11 = vadd.f32 %v870_v2, %v5420_v52  ;;  %v902_v12 = vrot.slane %v898_v3, 4  ;;  %2608 = vmatpush.bf16.msrb.mxu0 %v4098_v38  ;;  %v4066_v63 = vor.u32 %v4909_v61, %v4065_v58  ;;  %v4973_v2 = vld [vmem:[#allocation9 + $0x4dc] sm:$0xf0] }
 0x1f8   :  { %v877_v39 = vadd.f32 %v876_v6, %v5422_v59  ;;  %v908_v16 = vrot.slane %v899_v7, 4  ;;  %2596 = vmatpush.bf16.msra.mxu3 %v3810_v57  ;;  %v4322_v5 = vor.u32 %v4973_v2, %v4321_v1  ;;  %v4577_v6 = vld [vmem:[#allocation9 + $0x6c0] sm:$0xf] }
 0x1f9   :  { %v872_v20 = vrot.slane %v871_v11, 2  ;;  %v903_v21 = vadd.f32 %v902_v12, %v898_v3  ;;  %v4829_v38 = vld [vmem:[#allocation9 + $0x5c] sm:$0xf0] }
 0x1fa   :  { %v878_v26 = vrot.slane %v877_v39, 2  ;;  %v909_v27 = vadd.f32 %v908_v16, %v899_v7  ;;  %v777_v28 = vpop.f32.mrf.mxu3  ;;  %v5037_v7 = vld [vmem:[#allocation9 + $0x6dc] sm:$0xf0]  ;;  %2622 = vmatpush.bf16.msrb.mxu1 %v4322_v5 }
 0x1fb   :  { %v873_v32 = vadd.f32 %v872_v20, %v871_v11  ;;  %v904_v33 = vrot.slane %v903_v21, 2  ;;  %v816_v34 = vpop.f32.mrf.mxu2  ;;  %2609 = vmatpush.bf16.msrb.mxu0 %v4066_v63  ;;  %v4578_v12 = vor.u32 %v5037_v7, %v4577_v6  ;;  %v4901_v20 = vld [vmem:[#allocation9 + $0x29c] sm:$0xf0] }
 0x1fc   :  { %v879_v22 = vadd.f32 %v878_v26, %v877_v39  ;;  %v910_v36 = vrot.slane %v909_v27, 2  ;;  %v840_v37 = vpop.f32.mrf.mxu0  ;;  %v4034_v28 = vor.u32 %v4901_v20, %v4033_v15  ;;  %2597 = vmatpush.bf16.msra.mxu3 %v3778_v19  ;;  %v4957_v51 = vld [vmem:[#allocation9 + $0x45c] sm:$0xf0] }
 0x1fd   :  { %v874_v41 = vrot.slane %v873_v32, 1  ;;  %v905_v42 = vadd.f32 %v904_v33, %v903_v21  ;;  %v853_v43 = vpop.f32.mrf.mxu1  ;;  %v4289_v21 = vld [vmem:[#allocation9 + $0x480] sm:$0xf]  ;;  %2635 = vmatpush.bf16.msrb.mxu2 %v4578_v12 }
 0x1fe   :  { %v880_v47 = vrot.slane %v879_v22, 1  ;;  %v911_v48 = vadd.f32 %v910_v36, %v909_v27  ;;  %v4290_v60 = vor.u32 %v4965_v23, %v4289_v21  ;;  %v4546_v36 = vor.u32 %v5029_v55, %v4545_v29  ;;  %v3713_v5 = vld [vmem:[#allocation9] sm:$0xf]  ;;  %v4873_v55 = vld [vmem:[#allocation9 + $0x1c4] sm:$0xf] }
 0x1ff   :  { %v875_v54 = vadd.f32 %v874_v41, %v873_v32  ;;  %v906_v56 = vrot.slane %v905_v42, 1  ;;  %2610 = vmatpush.bf16.msrb.mxu0 %v4034_v28  ;;  %v4949_v21 = vld [vmem:[#allocation9 + $0x41c] sm:$0xf0] }
 0x200   :  { %v881_v62 = vadd.f32 %v880_v47, %v879_v22  ;;  %v912_v0 = vrot.slane %v911_v48, 1  ;;  %2623 = vmatpush.bf16.msrb.mxu1 %v4290_v60  ;;  %v4481_v23 = vld [vmem:[#allocation9 + $0x600] sm:$0xf] }
 0x201   :  { %v5433_v3 = vmul.f32 %v875_v54, %v5360_v8  ;;  %v907_v4 = vadd.f32 %v906_v56, %v905_v42  ;;  %2636 = vmatpush.bf16.msrb.mxu2 %v4546_v36  ;;  %v4258_v56 = vor.u32 %v4957_v51, %v4257_v49  ;;  %v4929_v49 = vld [vmem:[#allocation9 + $0x384] sm:$0xf] }
 0x202   :  { %v5436_v9 = vmul.f32 %v881_v62, %v5360_v8  ;;  %v913_v10 = vadd.f32 %v912_v0, %v911_v48  ;;  %v827_v11 = vpop.f32.mrf.mxu3  ;;  %v4513_v0 = vld [vmem:[#allocation9 + $0x640] sm:$0xf]  ;;  %v4163_v51 = vld [vmem:[#allocation9 + $0x3a0] sm:$0xf0] }
 0x203   :  { %v926_v39 = vmul.f32 %v907_v4, %v5360_v8  ;;  %v930_v16 = vmul.f32 %v5433_v3, %v5433_v3  ;;  %v5441_v17 = vadd.f32 %v840_v37, %v827_v11  ;;  %v866_v18 = vpop.f32.mrf.mxu2  ;;  %v3745_v37 = vld [vmem:[#allocation9 + $0x40] sm:$0xf] }
 0x204   :  { %v927_v24 = vmul.f32 %v913_v10, %v5360_v8  ;;  %v931_v25 = vmul.f32 %v5436_v9, %v5436_v9  ;;  %v5446_v26 = vadd.f32 %v866_v18, %v853_v43  ;;  %v842_v27 = vpop.f32.mrf.mxu0  ;;  %v3746_v42 = vor.u32 %v4829_v38, %v3745_v37  ;;  %v4001_v43 = vld [vmem:[#allocation9 + $0x240] sm:$0xf]  ;;  %2624 = vmatpush.bf16.msrb.mxu1 %v4258_v56 }
 0x205   :  { %v934_v30 = vsub.f32 %v926_v39, %v930_v16  ;;  %v882_v32 = vrot.slane %v5441_v17, 4  ;;  %v900_v33 = vmul.f32 %v5441_v17, %v5441_v17  ;;  %v855_v34 = vpop.f32.mrf.mxu1  ;;  %v4002_v48 = vor.u32 %v4893_v44, %v4001_v43  ;;  %v5021_v4 = vld [vmem:[#allocation9 + $0x65c] sm:$0xf0]  ;;  %v4707_v44 = vld [vmem:[#allocation9 + $0x7e0] sm:$0xf0] }
 0x206   :  { %v935_v50 = vsub.f32 %v927_v24, %v931_v25  ;;  %v888_v35 = vrot.slane %v5446_v26, 4  ;;  %v901_v22 = vmul.f32 %v5446_v26, %v5446_v26  ;;  %2598 = vmatpush.bf16.msra.mxu3 %v3746_v42  ;;  %v4821_v10 = vld [vmem:[#allocation9 + $0x1c] sm:$0xf0]  ;;  %v4514_v14 = vor.u32 %v5021_v4, %v4513_v0  ;;  %v5057_v0 = vld [vmem:[#allocation9 + $0x784] sm:$0xf] }
 0x207   :  { %v938_v31 = vmax.f32 %v934_v30, 0.0  ;;  %v883_v40 = vadd.f32 %v882_v32, %v5441_v17  ;;  %v914_v41 = vrot.slane %v900_v33, 4  ;;  %2611 = vmatpush.bf16.msrb.mxu0 %v4002_v48  ;;  %v3969_v11 = vld [vmem:[#allocation9 + $0x200] sm:$0xf]  ;;  %v3714_v15 = vor.u32 %v4821_v10, %v3713_v5  ;;  %v3939_v30 = vld [vmem:[#allocation9 + $0x1e0] sm:$0xf0] }
 0x208   :  { %v939_v45 = vmax.f32 %v935_v50, 0.0  ;;  %v889_v46 = vadd.f32 %v888_v35, %v5446_v26  ;;  %v920_v47 = vrot.slane %v901_v22, 4  ;;  %v4885_v39 = vld [vmem:[#allocation9 + $0x21c] sm:$0xf0]  ;;  %2637 = vmatpush.bf16.msrb.mxu2 %v4514_v14  ;;  %v3942_v34 = vor.u32 %v4873_v55, %v3939_v30  ;;  %v4937_v35 = vld [vmem:[#allocation9 + $0x3c4] sm:$0xf] }
 0x209   :  { %v884_v53 = vrot.slane %v883_v40, 2  ;;  %v915_v54 = vadd.f32 %v914_v41, %v900_v33  ;;  %v5456_v57 = vadd.f32 0.8, %v938_v31  ;;  %v4225_v16 = vld [vmem:[#allocation9 + $0x400] sm:$0xf]  ;;  %v3970_v20 = vor.u32 %v4885_v39, %v3969_v11 }
 0x20a   :  { %v5458_v58 = vadd.f32 0.8, %v939_v45  ;;  %v921_v61 = vadd.f32 %v920_v47, %v901_v22  ;;  %v829_v62 = vpop.f32.mrf.mxu3  ;;  %v890_v6 = vrot.slane %v889_v46, 2  ;;  %v5013_v24 = vld [vmem:[#allocation9 + $0x61c] sm:$0xf0]  ;;  %2599 = vmatpush.bf16.msra.mxu3 %v3714_v15  ;;  %v4226_v28 = vor.u32 %v4949_v21, %v4225_v16 }
 0x20b   :  { %v885_v63 = vadd.f32 %v884_v53, %v883_v40  ;;  %v916_v1 = vrot.slane %v915_v54, 2  ;;  %v868_v2 = vpop.f32.mrf.mxu2  ;;  %v4482_v29 = vor.u32 %v5013_v24, %v4481_v23  ;;  %2612 = vmatpush.bf16.msrb.mxu0 %v3970_v20  ;;  %v4195_v22 = vld [vmem:[#allocation9 + $0x3e0] sm:$0xf0]  ;;  %v4166_v11 = vor.u32 %v4929_v49, %v4163_v51 }
 0x20c   :  { %5095 = vrsqrt.f32 %v5458_v58  ;;  %v922_v7 = vrot.slane %v921_v61, 2  ;;  %v891_v18 = vadd.f32 %v890_v6, %v889_v46  ;;  %2625 = vmatpush.bf16.msrb.mxu1 %v4226_v28  ;;  %v5001_v31 = vld [vmem:[#allocation9 + $0x5c4] sm:$0xf]  ;;  %v4198_v56 = vor.u32 %v4937_v35, %v4195_v22 }
 0x20d   :  { %v886_v12 = vrot.slane %v885_v63, 1  ;;  %v917_v13 = vadd.f32 %v916_v1, %v915_v54  ;;  %5097 = vrsqrt.f32 %v5456_v57  ;;  %v4451_v40 = vld [vmem:[#allocation9 + $0x5e0] sm:$0xf0]  ;;  %2638 = vmatpush.bf16.msrb.mxu2 %v4482_v29  ;;  %vm962_vm10 = vweird.f32 %v5458_v58 }
 0x20e   :  { %v923_v19 = vadd.f32 %v922_v7, %v921_v61  ;;  %v892_v32 = vrot.slane %v891_v18, 1  ;;  %2644 = vmatpush.bf16.msrb.mxu3 %v3942_v34  ;;  %v5065_v41 = vld [vmem:[#allocation9 + $0x7c4] sm:$0xf]  ;;  %v4454_v61 = vor.u32 %v5001_v31, %v4451_v40  ;;  %vm952_vm2 = vweird.f32 %v5456_v57 }
 0x20f   :  { %v887_v25 = vadd.f32 %v886_v12, %v885_v63  ;;  %v918_v27 = vrot.slane %v917_v13, 1  ;;  %v4865_v45 = vld [vmem:[#allocation9 + $0x184] sm:$0xf]  ;;  %v4710_v4 = vor.u32 %v5065_v41, %v4707_v44  ;;  %2657 = vmatpush.bf16.msra.mxu0 %v4198_v56 }
 0x210   :  { %v924_v33 = vrot.slane %v923_v19, 1  ;;  %v893_v37 = vadd.f32 %v892_v32, %v891_v18  ;;  %v3907_v46 = vld [vmem:[#allocation9 + $0x1a0] sm:$0xf0]  ;;  %2670 = vmatpush.bf16.msra.mxu1 %v4454_v61 }
 0x211   :  { %v5462_v60 = vmul.f32 %v887_v25, %v5360_v8  ;;  %v919_v50 = vadd.f32 %v918_v27, %v917_v13  ;;  %v4993_v53 = vld [vmem:[#allocation9 + $0x584] sm:$0xf]  ;;  %v3910_v5 = vor.u32 %v4865_v45, %v3907_v46  ;;  %2683 = vmatpush.bf16.msra.mxu2 %v4710_v4 }
 0x212   :  { %v5464_v36 = vpop.eup %5095  ;;  %v925_v38 = vadd.f32 %v924_v33, %v923_v19  ;;  %v5471_v47 = vmul.f32 %v893_v37, %v5360_v8  ;;  %v4419_v62 = vld [vmem:[#allocation9 + $0x5a0] sm:$0xf0] }
 0x213   :  { %v928_v42 = vmul.f32 %v919_v50, %v5360_v8  ;;  %v932_v43 = vmul.f32 %v5462_v60, %v5462_v60  ;;  %v4675_v63 = vld [vmem:[#allocation9 + $0x7a0] sm:$0xf0]  ;;  %v957_v1 = vmul.f32 %v5464_v36, %v5458_v58  ;;  %v4422_v12 = vor.u32 %v4993_v53, %v4419_v62  ;;  %v5478_v14 = vpop.eup %5097  ;;  %2645 = vmatpush.bf16.msrb.mxu3 %v3910_v5 }
 0x214   :  { %v929_v48 = vmul.f32 %v925_v38, %v5360_v8  ;;  %v933_v2 = vmul.f32 %v5471_v47, %v5471_v47  ;;  %v4857_v6 = vld [vmem:[#allocation9 + $0x144] sm:$0xf]  ;;  %v4678_v39 = vor.u32 %v5057_v0, %v4675_v63  ;;  %v947_v29 = vmul.f32 %v5478_v14, %v5456_v57  ;;  %2658 = vmatpush.bf16.msra.mxu0 %v4166_v11 }
 0x215   :  { %v936_v54 = vsub.f32 %v928_v42, %v932_v43  ;;  %v3875_v7 = vld [vmem:[#allocation9 + $0x160] sm:$0xf0]  ;;  %v958_v24 = vmul.f32 %v5464_v36, %v957_v1  ;;  %2671 = vmatpush.bf16.msra.mxu1 %v4422_v12  ;;  %vm963_vm9 = vweird.f32 %v5464_v36  ;;  %vm953_vm0 = vweird.f32 %v5478_v14 }
 0x216   :  { %v4921_v13 = vld [vmem:[#allocation9 + $0x344] sm:$0xf]  ;;  %v937_v15 = vsub.f32 %v929_v48, %v933_v2  ;;  %v3878_v16 = vor.u32 %v4857_v6, %v3875_v7  ;;  %2684 = vmatpush.bf16.msra.mxu2 %v4678_v39  ;;  %v948_v44 = vmul.f32 %v5478_v14, %v947_v29  ;;  %vm5511_vm12 = vmor %vm962_vm10, %vm963_vm9 }
 0x217   :  { %v940_v10 = vmax.f32 %v936_v54, 0.0  ;;  %v4131_v18 = vld [vmem:[#allocation9 + $0x360] sm:$0xf0]  ;;  %v959_v42 = vmul.f32 0.5, %v958_v24  ;;  %vm954_vm5 = vmor %vm952_vm2, %vm953_vm0 }
 0x218   :  { %v4985_v19 = vld [vmem:[#allocation9 + $0x544] sm:$0xf]  ;;  %v941_v25 = vmax.f32 %v937_v15, 0.0  ;;  %v4134_v55 = vor.u32 %v4921_v13, %v4131_v18  ;;  %2646 = vmatpush.bf16.msrb.mxu3 %v3878_v16  ;;  %v5494_v5 = vmul.f32 0.5, %v948_v44 }
 0x219   :  { %v4387_v20 = vld [vmem:[#allocation9 + $0x560] sm:$0xf0]  ;;  %v5480_v21 = vadd.f32 0.8, %v940_v10  ;;  %v960_v2 = vsub.f32 1.5, %v959_v42 }
 0x21a   :  { %v5049_v23 = vld [vmem:[#allocation9 + $0x744] sm:$0xf]  ;;  %v4390_v30 = vor.u32 %v4985_v19, %v4387_v20  ;;  %v5486_v50 = vadd.f32 0.8, %v941_v25  ;;  %2659 = vmatpush.bf16.msra.mxu0 %v4134_v55 }
 0x21b   :  { %v4643_v27 = vld [vmem:[#allocation9 + $0x760] sm:$0xf0]  ;;  %5099 = vrsqrt.f32 %v5480_v21  ;;  %vm972_vm13 = vweird.f32 %v5480_v21 }
 0x21c   :  { %v4849_v28 = vld [vmem:[#allocation9 + $0x104] sm:$0xf]  ;;  %v4646_v35 = vor.u32 %v5049_v23, %v4643_v27  ;;  %5101 = vrsqrt.f32 %v5486_v50  ;;  %2672 = vmatpush.bf16.msra.mxu1 %v4390_v30  ;;  %v961_v27 = vmul.f32 %v5464_v36, %v960_v2  ;;  %vm982_vm1 = vweird.f32 %v5486_v50 }
 0x21d   :  { %v3843_v32 = vld [vmem:[#allocation9 + $0x120] sm:$0xf0] }
 0x21e   :  { %v4913_v33 = vld [vmem:[#allocation9 + $0x304] sm:$0xf]  ;;  %v3846_v22 = vor.u32 %v4849_v28, %v3843_v32  ;;  %2685 = vmatpush.bf16.msra.mxu2 %v4646_v35 }
 0x21f   :  { %v4099_v34 = vld [vmem:[#allocation9 + $0x320] sm:$0xf0] }
 0x220   :  { %v4977_v37 = vld [vmem:[#allocation9 + $0x504] sm:$0xf]  ;;  %v4102_v45 = vor.u32 %v4913_v33, %v4099_v34  ;;  %2647 = vmatpush.bf16.msrb.mxu3 %v3846_v22 }
 0x221   :  { %v4355_v38 = vld [vmem:[#allocation9 + $0x520] sm:$0xf0]  ;;  %v5490_v62 = vpop.eup %5099 }
 0x222   :  { %v5041_v31 = vld [vmem:[#allocation9 + $0x704] sm:$0xf]  ;;  %v4358_v46 = vor.u32 %v4977_v37, %v4355_v38  ;;  %v967_v4 = vmul.f32 %v5490_v62, %v5480_v21  ;;  %2660 = vmatpush.bf16.msra.mxu0 %v4102_v45  ;;  %v5496_v12 = vpop.eup %5101  ;;  %vm973_vm11 = vweird.f32 %v5490_v62 }
 0x223   :  { %v4611_v40 = vld [vmem:[#allocation9 + $0x720] sm:$0xf0]  ;;  %v977_v20 = vmul.f32 %v5496_v12, %v5486_v50  ;;  %vm5522_vm14 = vmor %vm972_vm13, %vm973_vm11  ;;  %vm983_vm15 = vweird.f32 %v5496_v12 }
 0x224   :  { %v4841_v41 = vld [vmem:[#allocation9 + $0xc4] sm:$0xf]  ;;  %v4614_v51 = vor.u32 %v5041_v31, %v4611_v40  ;;  %2673 = vmatpush.bf16.msra.mxu1 %v4358_v46  ;;  %v968_v13 = vmul.f32 %v5490_v62, %v967_v4  ;;  %vm984_vm3 = vmor %vm982_vm1, %vm983_vm15 }
 0x225   :  { %v3811_v43 = vld [vmem:[#allocation9 + $0xe0] sm:$0xf0]  ;;  %v978_v55 = vmul.f32 %v5496_v12, %v977_v20 }
 0x226   :  { %v4905_v48 = vld [vmem:[#allocation9 + $0x2c4] sm:$0xf]  ;;  %v3814_v53 = vor.u32 %v4841_v41, %v3811_v43  ;;  %2686 = vmatpush.bf16.msra.mxu2 %v4614_v51  ;;  %v969_v28 = vmul.f32 0.5, %v968_v13  ;;  %v950_v41 = vsub.f32 1.5, %v5494_v5 }
 0x227   :  { %v4067_v49 = vld [vmem:[#allocation9 + $0x2e0] sm:$0xf0]  ;;  %v979_v43 = vmul.f32 0.5, %v978_v55 }
 0x228   :  { %v4969_v54 = vld [vmem:[#allocation9 + $0x4c4] sm:$0xf]  ;;  %v4070_v6 = vor.u32 %v4905_v48, %v4067_v49  ;;  %2648 = vmatpush.bf16.msrb.mxu3 %v3814_v53  ;;  %v970_v22 = vsub.f32 1.5, %v969_v28  ;;  %v965_v48 = vsel %vm5511_vm12, %v5464_v36, %v961_v27 }
 0x229   :  { %v4323_v56 = vld [vmem:[#allocation9 + $0x4e0] sm:$0xf0]  ;;  %v980_v58 = vsub.f32 1.5, %v979_v43 }
 0x22a   :  { %v5033_v61 = vld [vmem:[#allocation9 + $0x6c4] sm:$0xf]  ;;  %v4326_v7 = vor.u32 %v4969_v54, %v4323_v56  ;;  %2661 = vmatpush.bf16.msra.mxu0 %v4070_v6  ;;  %v971_v46 = vmul.f32 %v5490_v62, %v970_v22 }
 0x22b   :  { %v4579_v0 = vld [vmem:[#allocation9 + $0x6e0] sm:$0xf0]  ;;  %v981_v2 = vmul.f32 %v5496_v12, %v980_v58 }
 0x22c   :  { %v4833_v63 = vld [vmem:[#allocation9 + $0x84] sm:$0xf]  ;;  %v4582_v15 = vor.u32 %v5033_v61, %v4579_v0  ;;  %2674 = vmatpush.bf16.msra.mxu1 %v4326_v7  ;;  %v975_v21 = vsel %vm5522_vm14, %v5490_v62, %v971_v46  ;;  %v990_v62 = vrot.slane %v965_v48, 7  ;;  %v4878_v46 = vld [vmem:[#allocation9 + $0x1e4] sm:$0xf0] }
 0x22d   :  { %v3779_v1 = vld [vmem:[#allocation9 + $0xa0] sm:$0xf0]  ;;  %v991_v6 = vrot.slane %v975_v21, 6  ;;  %v985_v7 = vsel %vm984_vm3, %v5496_v12, %v981_v2  ;;  %v4201_v48 = vld [vmem:[#allocation9 + $0x3c8] sm:$0xf] }
 0x22e   :  { %v4897_v10 = vld [vmem:[#allocation9 + $0x284] sm:$0xf]  ;;  %v3782_v39 = vor.u32 %v4833_v63, %v3779_v1  ;;  %2687 = vmatpush.bf16.msra.mxu2 %v4582_v15  ;;  %v951_v1 = vmul.f32 %v5478_v14, %v950_v41  ;;  %v992_v50 = vrot.slane %v985_v7, 5  ;;  %v5006_v21 = vld [vmem:[#allocation9 + $0x5e4] sm:$0xf0] }
 0x22f   :  { %v4035_v11 = vld [vmem:[#allocation9 + $0x2a0] sm:$0xf0] }
 0x230   :  { %v4961_v16 = vld [vmem:[#allocation9 + $0x484] sm:$0xf]  ;;  %v4038_v30 = vor.u32 %v4897_v10, %v4035_v11  ;;  %2649 = vmatpush.bf16.msrb.mxu3 %v3782_v39  ;;  %v955_v15 = vsel %vm954_vm5, %v5478_v14, %v951_v1  ;;  %v995_v12 = vsel %vm994_vm4, %v991_v6, %v992_v50  ;;  %v4934_v50 = vld [vmem:[#allocation9 + $0x3a4] sm:$0xf0] }
 0x231   :  { %v4291_v18 = vld [vmem:[#allocation9 + $0x4a0] sm:$0xf0]  ;;  %v993_v39 = vsel %vm348_vm7, %v955_v15, %v990_v62  ;;  %v4870_v62 = vld [vmem:[#allocation9 + $0x1a4] sm:$0xf0] }
 0x232   :  { %v5025_v19 = vld [vmem:[#allocation9 + $0x684] sm:$0xf]  ;;  %v4294_v32 = vor.u32 %v4961_v16, %v4291_v18  ;;  %2662 = vmatpush.bf16.msra.mxu0 %v4038_v30  ;;  %v997_v16 = vsel %vm996_vm6, %v993_v39, %v995_v12  ;;  %v4681_v15 = vld [vmem:[#allocation9 + $0x788] sm:$0xf] }
 0x233   :  { %v4547_v23 = vld [vmem:[#allocation9 + $0x6a0] sm:$0xf0]  ;;  %v5062_v39 = vld [vmem:[#allocation9 + $0x7a4] sm:$0xf0] }
 0x234   :  { %v4825_v24 = vld [vmem:[#allocation9 + $0x44] sm:$0xf]  ;;  %v4550_v37 = vor.u32 %v5025_v19, %v4547_v23  ;;  %2675 = vmatpush.bf16.msra.mxu1 %v4294_v32  ;;  %v381_v32 = vld [vmem:[#allocation10 + $0x9] sm:$0xf] }
 0x235   :  { %v3747_v25 = vld [vmem:[#allocation9 + $0x60] sm:$0xf0] }
 0x236   :  { %v4889_v29 = vld [vmem:[#allocation9 + $0x244] sm:$0xf]  ;;  %v3750_v38 = vor.u32 %v4825_v24, %v3747_v25  ;;  %2688 = vmatpush.bf16.msra.mxu2 %v4550_v37 }
 0x237   :  { %v4003_v33 = vld [vmem:[#allocation9 + $0x260] sm:$0xf0] }
 0x238   :  { %v4953_v34 = vld [vmem:[#allocation9 + $0x444] sm:$0xf]  ;;  %v4006_v51 = vor.u32 %v4889_v29, %v4003_v33  ;;  %2650 = vmatpush.bf16.msrb.mxu3 %v3750_v38 }
 0x239   :  { %v4259_v35 = vld [vmem:[#allocation9 + $0x460] sm:$0xf0] }
 0x23a   :  { %v5017_v31 = vld [vmem:[#allocation9 + $0x644] sm:$0xf]  ;;  %v4262_v53 = vor.u32 %v4953_v34, %v4259_v35  ;;  %2663 = vmatpush.bf16.msra.mxu0 %v4006_v51 }
 0x23b   :  { %v4515_v40 = vld [vmem:[#allocation9 + $0x660] sm:$0xf0] }
 0x23c   :  { %v4817_v44 = vld [vmem:[#allocation9 + $0x4] sm:$0xf]  ;;  %v4518_v36 = vor.u32 %v5017_v31, %v4515_v40  ;;  %2676 = vmatpush.bf16.msra.mxu1 %v4262_v53  ;;  %v4457_v53 = vld [vmem:[#allocation9 + $0x5c8] sm:$0xf] }
 0x23d   :  { %v3715_v45 = vld [vmem:[#allocation9 + $0x20] sm:$0xf0]  ;;  %v4458_v7 = vor.u32 %v5006_v21, %v4457_v53  ;;  %v4838_v53 = vld [vmem:[#allocation9 + $0xa4] sm:$0xf0] }
 0x23e   :  { %v4881_v54 = vld [vmem:[#allocation9 + $0x204] sm:$0xf]  ;;  %v3718_v56 = vor.u32 %v4817_v44, %v3715_v45  ;;  %2689 = vmatpush.bf16.msra.mxu2 %v4518_v36  ;;  %v3945_v45 = vld [vmem:[#allocation9 + $0x1c8] sm:$0xf] }
 0x23f   :  { %v3971_v61 = vld [vmem:[#allocation9 + $0x220] sm:$0xf0]  ;;  %v4713_v36 = vld [vmem:[#allocation9 + $0x7c8] sm:$0xf] }
 0x240   :  { %v4945_v0 = vld [vmem:[#allocation9 + $0x404] sm:$0xf]  ;;  %v3974_v10 = vor.u32 %v4881_v54, %v3971_v61  ;;  %2651 = vmatpush.bf16.msrb.mxu3 %v3718_v56  ;;  %v5070_v56 = vld [vmem:[#allocation9 + $0x7e4] sm:$0xf0] }
 0x241   :  { %v4227_v63 = vld [vmem:[#allocation9 + $0x420] sm:$0xf0]  ;;  %v4902_v21 = vld [vmem:[#allocation9 + $0x2a4] sm:$0xf0] }
 0x242   :  { %v5009_v4 = vld [vmem:[#allocation9 + $0x604] sm:$0xf]  ;;  %v4230_v11 = vor.u32 %v4945_v0, %v4227_v63  ;;  %2664 = vmatpush.bf16.msra.mxu0 %v3974_v10  ;;  %v3946_v0 = vor.u32 %v4878_v46, %v3945_v45  ;;  %v4714_v10 = vor.u32 %v5070_v56, %v4713_v36  ;;  %v4910_v45 = vld [vmem:[#allocation9 + $0x2e4] sm:$0xf0] }
 0x243   :  { %v4483_v5 = vld [vmem:[#allocation9 + $0x620] sm:$0xf0]  ;;  %v4329_v46 = vld [vmem:[#allocation9 + $0x4c8] sm:$0xf] }
 0x244   :  { %v4486_v57 = vor.u32 %v5009_v4, %v4483_v5  ;;  %v380_v13 = vld [vmem:[#allocation10 + $0x5] sm:$0xf]  ;;  %2677 = vmatpush.bf16.msra.mxu1 %v4230_v11 }
 0x245   :  { %v999_v18 = vmul.f32 %v997_v16, %v380_v13  ;;  %v3913_v5 = vld [vmem:[#allocation9 + $0x188] sm:$0xf] }
 0x246   :  { %2690 = vmatpush.bf16.msra.mxu2 %v4486_v57  ;;  %v4169_v11 = vld [vmem:[#allocation9 + $0x388] sm:$0xf]  ;;  %v3914_v12 = vor.u32 %v4870_v62, %v3913_v5 }
 0x247   :  { %v1001_v19 = vperm.slane %v999_v18, 0  ;;  %v1002_v20 = vperm.slane %v999_v18, 1  ;;  %v1003_v23 = vperm.slane %v999_v18, 2  ;;  %v1004_v24 = vperm.slane %v999_v18, 3  ;;  %v4425_v57 = vld [vmem:[#allocation9 + $0x588] sm:$0xf] }
 0x248   :  { %v4998_v13 = vld [vmem:[#allocation9 + $0x5a4] sm:$0xf0]  ;;  %v4170_v16 = vor.u32 %v4934_v50, %v4169_v11 }
 0x249   :  { %v1010_v25 = vmul.f32 %v1002_v20, %v5436_v9  ;;  %v1011_v27 = vmul.f32 %v1003_v23, %v5462_v60  ;;  %v1012_v14 = vmul.f32 %v1004_v24, %v5471_v47  ;;  %v1009_v28 = vmul.f32 %v1001_v19, %v5433_v3  ;;  %v3881_v18 = vld [vmem:[#allocation9 + $0x148] sm:$0xf] }
 0x24a   :  { %v1025_v37 = vmul.f32 %v1001_v19, %v5420_v52  ;;  %v1026_v9 = vmul.f32 %v1002_v20, %v5422_v59  ;;  %v1027_v60 = vmul.f32 %v1003_v23, %v5441_v17  ;;  %v1028_v47 = vmul.f32 %v1004_v24, %v5446_v26  ;;  %v4942_v59 = vld [vmem:[#allocation9 + $0x3e4] sm:$0xf0] }
 0x24b   :  { %v1017_v29 = vrot.slane %v1010_v25, 7  ;;  %v1018_v55 = vrot.slane %v1011_v27, 6  ;;  %v1019_v30 = vrot.slane %v1012_v14, 5  ;;  %v4202_v4 = vor.u32 %v4942_v59, %v4201_v48  ;;  %v4862_v19 = vld [vmem:[#allocation9 + $0x164] sm:$0xf0] }
 0x24c   :  { %v4426_v20 = vor.u32 %v4998_v13, %v4425_v57  ;;  %v4682_v23 = vor.u32 %v5062_v39, %v4681_v15  ;;  %v4137_v24 = vld [vmem:[#allocation9 + $0x348] sm:$0xf] }
 0x24d   :  { %v1020_v33 = vsel %vm348_vm7, %v1009_v28, %v1017_v29  ;;  %v1021_v34 = vsel %vm994_vm4, %v1018_v55, %v1019_v30  ;;  %v4926_v25 = vld [vmem:[#allocation9 + $0x364] sm:$0xf0]  ;;  %v3882_v55 = vor.u32 %v4862_v19, %v3881_v18 }
 0x24e   :  { %v1022_v35 = vsel %vm996_vm6, %v1020_v33, %v1021_v34  ;;  %v4393_v27 = vld [vmem:[#allocation9 + $0x548] sm:$0xf]  ;;  %v4138_v30 = vor.u32 %v4926_v25, %v4137_v24 }
 0x24f   :  { %v1024_v22 = vsub.f32 %v381_v32, %v1022_v35  ;;  %v4990_v14 = vld [vmem:[#allocation9 + $0x564] sm:$0xf0] }
 0x250   :  { %v4649_v28 = vld [vmem:[#allocation9 + $0x748] sm:$0xf]  ;;  %v4394_v34 = vor.u32 %v4990_v14, %v4393_v27 }
 0x251   :  { %v1030_v3 = vperm.slane %v1024_v22, 0  ;;  %v1031_v38 = vperm.slane %v1024_v22, 1  ;;  %v1032_v31 = vperm.slane %v1024_v22, 2  ;;  %v1033_v40 = vperm.slane %v1024_v22, 3  ;;  %v5054_v29 = vld [vmem:[#allocation9 + $0x764] sm:$0xf0] }
 0x252   :  { %v3849_v32 = vld [vmem:[#allocation9 + $0x108] sm:$0xf]  ;;  %v4650_v35 = vor.u32 %v5054_v29, %v4649_v28 }
 0x253   :  { %v1038_v41 = vadd.f32 %v1030_v3, %v1025_v37  ;;  %v1039_v42 = vadd.f32 %v1031_v38, %v1026_v9  ;;  %v1040_v43 = vadd.f32 %v1032_v31, %v1027_v60  ;;  %v1041_v44 = vadd.f32 %v1033_v40, %v1028_v47  ;;  %v4854_v33 = vld [vmem:[#allocation9 + $0x124] sm:$0xf0] }
 0x254   :  { %v4105_v22 = vld [vmem:[#allocation9 + $0x308] sm:$0xf]  ;;  %v3850_v38 = vor.u32 %v4854_v33, %v3849_v32  ;;  %v3947_v32 = vld [vmem:[#allocation9 + $0x1e8] sm:$0xf0] }
 0x255   :  { %v1042_v49 = vmul.f32 0.2, %v1038_v41  ;;  %v1043_v58 = vmul.f32 0.2, %v1039_v42  ;;  %v1044_v52 = vmul.f32 0.2, %v1040_v43 }
 0x256   :  { %v1045_v51 = vmul.f32 0.2, %v1041_v44  ;;  %v4918_v37 = vld [vmem:[#allocation9 + $0x324] sm:$0xf0]  ;;  %v4938_v33 = vld [vmem:[#allocation9 + $0x3cc] sm:$0xf] }
 0x257   :  { %v1048_v17 = vmax.f32 %v1040_v43, %v1044_v52  ;;  %v1046_v54 = vmax.f32 %v1038_v41, %v1042_v49  ;;  %v1047_v26 = vmax.f32 %v1039_v42, %v1043_v58  ;;  %v4361_v9 = vld [vmem:[#allocation9 + $0x508] sm:$0xf]  ;;  %v4106_v31 = vor.u32 %v4918_v37, %v4105_v22 }
 0x258   :  { %v1049_v61 = vmax.f32 %v1041_v44, %v1045_v51  ;;  %v4982_v60 = vld [vmem:[#allocation9 + $0x524] sm:$0xf0] }
 0x259   :  { %v5555_v63 = vpack.c.bf16 %v1048_v17, %v1048_v17  ;;  %v5557_v1 = vpack.c.bf16 %v1046_v54, %v1046_v54  ;;  %v5559_v2 = vpack.c.bf16 %v1047_v26, %v1047_v26  ;;  %v4617_v47 = vld [vmem:[#allocation9 + $0x708] sm:$0xf]  ;;  %v4362_v42 = vor.u32 %v4982_v60, %v4361_v9  ;;  %v4459_v9 = vld [vmem:[#allocation9 + $0x5e8] sm:$0xf0] }
 0x25a   :  { %v5561_v6 = vpack.c.bf16 %v1049_v61, %v1049_v61  ;;  %v5046_v3 = vld [vmem:[#allocation9 + $0x724] sm:$0xf0]  ;;  %v5066_v60 = vld [vmem:[#allocation9 + $0x7cc] sm:$0xf] }
 0x25b   :  { %2600 = vmatmul.bf16.vlgmr.msra.gmra.mxu3 %v5557_v1  ;;  %2613 = vmatmul.bf16.vlgmr.msrb.gmra.mxu0 %v5559_v2  ;;  %v3817_v40 = vld [vmem:[#allocation9 + $0xc8] sm:$0xf]  ;;  %v4618_v43 = vor.u32 %v5046_v3, %v4617_v47  ;;  %v4715_v47 = vld [vmem:[#allocation9 + $0x7e8] sm:$0xf0] }
 0x25c   :  { %2626 = vmatmul.bf16.vlgmr.msrb.gmra.mxu1 %v5555_v63  ;;  %2639 = vmatmul.bf16.vlgmr.msrb.gmra.mxu2 %v5561_v6  ;;  %v4846_v41 = vld [vmem:[#allocation9 + $0xe4] sm:$0xf0] }
 0x25d   :  { %2696 = vmatpush.bf16.msra.mxu3 %v3946_v0  ;;  %2709 = vmatpush.bf16.msrb.mxu0 %v4202_v4  ;;  %v4073_v44 = vld [vmem:[#allocation9 + $0x2c8] sm:$0xf]  ;;  %v3818_v52 = vor.u32 %v4846_v41, %v3817_v40  ;;  %v4866_v41 = vld [vmem:[#allocation9 + $0x18c] sm:$0xf] }
 0x25e   :  { %2722 = vmatpush.bf16.msrb.mxu1 %v4458_v7  ;;  %2735 = vmatpush.bf16.msrb.mxu2 %v4714_v10  ;;  %v4974_v48 = vld [vmem:[#allocation9 + $0x4e4] sm:$0xf0]  ;;  %v4074_v51 = vor.u32 %v4910_v45, %v4073_v44  ;;  %v4718_v44 = vor.u32 %v5066_v60, %v4715_v47  ;;  %v4930_v45 = vld [vmem:[#allocation9 + $0x38c] sm:$0xf] }
 0x25f   :  { %v4585_v49 = vld [vmem:[#allocation9 + $0x6c8] sm:$0xf]  ;;  %v4330_v17 = vor.u32 %v4974_v48, %v4329_v46  ;;  %v4171_v46 = vld [vmem:[#allocation9 + $0x3a8] sm:$0xf0] }
 0x260   :  { %v5038_v58 = vld [vmem:[#allocation9 + $0x6e4] sm:$0xf0]  ;;  %v4994_v48 = vld [vmem:[#allocation9 + $0x58c] sm:$0xf] }
 0x261   :  { %2697 = vmatpush.bf16.msra.mxu3 %v3914_v12  ;;  %2710 = vmatpush.bf16.msrb.mxu0 %v4170_v16  ;;  %v3785_v59 = vld [vmem:[#allocation9 + $0x88] sm:$0xf]  ;;  %v4586_v54 = vor.u32 %v5038_v58, %v4585_v49  ;;  %v4427_v49 = vld [vmem:[#allocation9 + $0x5a8] sm:$0xf0] }
 0x262   :  { %2723 = vmatpush.bf16.msrb.mxu1 %v4426_v20  ;;  %2736 = vmatpush.bf16.msrb.mxu2 %v4682_v23  ;;  %v4041_v26 = vld [vmem:[#allocation9 + $0x288] sm:$0xf]  ;;  %v3786_v4 = vor.u32 %v4838_v53, %v3785_v59  ;;  %v5058_v58 = vld [vmem:[#allocation9 + $0x78c] sm:$0xf]  ;;  %v4174_v59 = vor.u32 %v4930_v45, %v4171_v46 }
 0x263   :  { %v4297_v36 = vld [vmem:[#allocation9 + $0x488] sm:$0xf]  ;;  %v4042_v5 = vor.u32 %v4902_v21, %v4041_v26  ;;  %v4858_v53 = vld [vmem:[#allocation9 + $0x14c] sm:$0xf] }
 0x264   :  { %v4966_v56 = vld [vmem:[#allocation9 + $0x4a4] sm:$0xf0]  ;;  %v4922_v21 = vld [vmem:[#allocation9 + $0x34c] sm:$0xf] }
 0x265   :  { %2698 = vmatpush.bf16.msra.mxu3 %v3882_v55  ;;  %2711 = vmatpush.bf16.msrb.mxu0 %v4138_v30  ;;  %v4553_v61 = vld [vmem:[#allocation9 + $0x688] sm:$0xf]  ;;  %v4298_v10 = vor.u32 %v4966_v56, %v4297_v36  ;;  %v4874_v30 = vld [vmem:[#allocation9 + $0x1cc] sm:$0xf] }
 0x266   :  { %2724 = vmatpush.bf16.msrb.mxu1 %v4394_v34  ;;  %2737 = vmatpush.bf16.msrb.mxu2 %v4650_v35  ;;  %v5030_v0 = vld [vmem:[#allocation9 + $0x6a4] sm:$0xf0]  ;;  %v4203_v34 = vld [vmem:[#allocation9 + $0x3e8] sm:$0xf0] }
 0x267   :  { %v3753_v62 = vld [vmem:[#allocation9 + $0x48] sm:$0xf]  ;;  %v4554_v11 = vor.u32 %v5030_v0, %v4553_v61  ;;  %v5002_v35 = vld [vmem:[#allocation9 + $0x5cc] sm:$0xf]  ;;  %v4206_v40 = vor.u32 %v4938_v33, %v4203_v34 }
 0x268   :  { %v4830_v7 = vld [vmem:[#allocation9 + $0x64] sm:$0xf0]  ;;  %v4139_v36 = vld [vmem:[#allocation9 + $0x368] sm:$0xf0] }
 0x269   :  { %2699 = vmatpush.bf16.msra.mxu3 %v3850_v38  ;;  %2712 = vmatpush.bf16.msrb.mxu0 %v4106_v31  ;;  %v4009_v50 = vld [vmem:[#allocation9 + $0x248] sm:$0xf]  ;;  %v3754_v18 = vor.u32 %v4830_v7, %v3753_v62  ;;  %v3950_v31 = vor.u32 %v4874_v30, %v3947_v32  ;;  %v4986_v56 = vld [vmem:[#allocation9 + $0x54c] sm:$0xf]  ;;  %v4142_v62 = vor.u32 %v4922_v21, %v4139_v36 }
 0x26a   :  { %2725 = vmatpush.bf16.msrb.mxu1 %v4362_v42  ;;  %2738 = vmatpush.bf16.msrb.mxu2 %v4618_v43  ;;  %v4894_v57 = vld [vmem:[#allocation9 + $0x264] sm:$0xf0]  ;;  %v3915_v42 = vld [vmem:[#allocation9 + $0x1a8] sm:$0xf0]  ;;  %v4462_v43 = vor.u32 %v5002_v35, %v4459_v9 }
 0x26b   :  { %2652 = vmatmul.bf16.vlgmr.msrb.gmra.mxu3 %v5557_v1  ;;  %2665 = vmatmul.bf16.vlgmr.msra.gmra.mxu0 %v5559_v2  ;;  %v4265_v13 = vld [vmem:[#allocation9 + $0x448] sm:$0xf]  ;;  %v4010_v19 = vor.u32 %v4894_v57, %v4009_v50  ;;  %v4395_v61 = vld [vmem:[#allocation9 + $0x568] sm:$0xf0] }
 0x26c   :  { %2678 = vmatmul.bf16.vlgmr.msra.gmra.mxu1 %v5555_v63  ;;  %2691 = vmatmul.bf16.vlgmr.msra.gmra.mxu2 %v5561_v6  ;;  %v4958_v15 = vld [vmem:[#allocation9 + $0x464] sm:$0xf0]  ;;  %v5050_v0 = vld [vmem:[#allocation9 + $0x74c] sm:$0xf] }
 0x26d   :  { %2700 = vmatpush.bf16.msra.mxu3 %v3818_v52  ;;  %2713 = vmatpush.bf16.msrb.mxu0 %v4074_v51  ;;  %v4521_v39 = vld [vmem:[#allocation9 + $0x648] sm:$0xf]  ;;  %v4266_v25 = vor.u32 %v4958_v15, %v4265_v13  ;;  %v4683_v52 = vld [vmem:[#allocation9 + $0x7a8] sm:$0xf0]  ;;  %v3918_v51 = vor.u32 %v4866_v41, %v3915_v42 }
 0x26e   :  { %2726 = vmatpush.bf16.msrb.mxu1 %v4330_v17  ;;  %2739 = vmatpush.bf16.msrb.mxu2 %v4586_v54  ;;  %v5022_v12 = vld [vmem:[#allocation9 + $0x664] sm:$0xf0]  ;;  %v3883_v17 = vld [vmem:[#allocation9 + $0x168] sm:$0xf0]  ;;  %v4430_v54 = vor.u32 %v4994_v48, %v4427_v49  ;;  %v4686_v26 = vor.u32 %v5058_v58, %v4683_v52 }
 0x26f   :  { %v3721_v16 = vld [vmem:[#allocation9 + $0x8] sm:$0xf]  ;;  %v4522_v27 = vor.u32 %v5022_v12, %v4521_v39  ;;  %v4850_v7 = vld [vmem:[#allocation9 + $0x10c] sm:$0xf] }
 0x270   :  { %v4822_v20 = vld [vmem:[#allocation9 + $0x24] sm:$0xf0]  ;;  %v4914_v57 = vld [vmem:[#allocation9 + $0x30c] sm:$0xf] }
 0x271   :  { %2701 = vmatpush.bf16.msra.mxu3 %v3786_v4  ;;  %2714 = vmatpush.bf16.msrb.mxu0 %v4042_v5  ;;  %v3977_v23 = vld [vmem:[#allocation9 + $0x208] sm:$0xf]  ;;  %v3722_v22 = vor.u32 %v4822_v20, %v3721_v16  ;;  %v4651_v4 = vld [vmem:[#allocation9 + $0x768] sm:$0xf0]  ;;  %v3886_v5 = vor.u32 %v4858_v53, %v3883_v17 }
 0x272   :  { %v4886_v24 = vld [vmem:[#allocation9 + $0x224] sm:$0xf0]  ;;  %2727 = vmatpush.bf16.msrb.mxu1 %v4298_v10  ;;  %2740 = vmatpush.bf16.msrb.mxu2 %v4554_v11  ;;  %v3851_v10 = vld [vmem:[#allocation9 + $0x128] sm:$0xf0]  ;;  %v4398_v11 = vor.u32 %v4986_v56, %v4395_v61  ;;  %v4654_v50 = vor.u32 %v5050_v0, %v4651_v4 }
 0x273   :  { %v4233_v14 = vld [vmem:[#allocation9 + $0x408] sm:$0xf]  ;;  %v3978_v37 = vor.u32 %v4886_v24, %v3977_v23  ;;  %v4107_v13 = vld [vmem:[#allocation9 + $0x328] sm:$0xf0] }
 0x274   :  { %v4950_v28 = vld [vmem:[#allocation9 + $0x424] sm:$0xf0]  ;;  %v4978_v15 = vld [vmem:[#allocation9 + $0x50c] sm:$0xf] }
 0x275   :  { %v4489_v29 = vld [vmem:[#allocation9 + $0x608] sm:$0xf]  ;;  %2702 = vmatpush.bf16.msra.mxu3 %v3754_v18  ;;  %2715 = vmatpush.bf16.msrb.mxu0 %v4010_v19  ;;  %v4234_v3 = vor.u32 %v4950_v28, %v4233_v14  ;;  %v4363_v39 = vld [vmem:[#allocation9 + $0x528] sm:$0xf0]  ;;  %v3854_v18 = vor.u32 %v4850_v7, %v3851_v10  ;;  %v4110_v19 = vor.u32 %v4914_v57, %v4107_v13  ;;  %v4879_v7 = vld [vmem:[#allocation9 + $0x1ec] sm:$0xf0] }
 0x276   :  { %v5014_v55 = vld [vmem:[#allocation9 + $0x624] sm:$0xf0]  ;;  %2728 = vmatpush.bf16.msrb.mxu1 %v4266_v25  ;;  %2741 = vmatpush.bf16.msrb.mxu2 %v4522_v27  ;;  %v5042_v12 = vld [vmem:[#allocation9 + $0x70c] sm:$0xf]  ;;  %v4366_v24 = vor.u32 %v4978_v15, %v4363_v39  ;;  %v4209_v10 = vld [vmem:[#allocation9 + $0x3d0] sm:$0xf] }
 0x277   :  { %v4490_v38 = vor.u32 %v5014_v55, %v4489_v29  ;;  %v4619_v16 = vld [vmem:[#allocation9 + $0x728] sm:$0xf0]  ;;  %v5007_v15 = vld [vmem:[#allocation9 + $0x5ec] sm:$0xf0] }
 0x278   :  { %v4842_v20 = vld [vmem:[#allocation9 + $0xcc] sm:$0xf]  ;;  %v4622_v25 = vor.u32 %v5042_v12, %v4619_v16  ;;  %v4721_v39 = vld [vmem:[#allocation9 + $0x7d0] sm:$0xf] }
 0x279   :  { %2703 = vmatpush.bf16.msra.mxu3 %v3722_v22  ;;  %2716 = vmatpush.bf16.msrb.mxu0 %v3978_v37  ;;  %v3819_v23 = vld [vmem:[#allocation9 + $0xe8] sm:$0xf0]  ;;  %v5071_v12 = vld [vmem:[#allocation9 + $0x7ec] sm:$0xf0] }
 0x27a   :  { %2729 = vmatpush.bf16.msrb.mxu1 %v4234_v3  ;;  %2742 = vmatpush.bf16.msrb.mxu2 %v4490_v38  ;;  %v4906_v27 = vld [vmem:[#allocation9 + $0x2cc] sm:$0xf]  ;;  %v3822_v32 = vor.u32 %v4842_v20, %v3819_v23  ;;  %v3921_v23 = vld [vmem:[#allocation9 + $0x190] sm:$0xf] }
 0x27b   :  { %v4075_v14 = vld [vmem:[#allocation9 + $0x2e8] sm:$0xf0] }
 0x27c   :  { %2704 = vmatmul.bf16.vlgmr.msra.gmra.mxu3 %v5557_v1  ;;  %2717 = vmatmul.bf16.vlgmr.msrb.gmra.mxu0 %v5559_v2  ;;  %v4970_v28 = vld [vmem:[#allocation9 + $0x4cc] sm:$0xf]  ;;  %v4078_v33 = vor.u32 %v4906_v27, %v4075_v14  ;;  %v4722_v27 = vor.u32 %v5071_v12, %v4721_v39  ;;  %v4177_v14 = vld [vmem:[#allocation9 + $0x390] sm:$0xf] }
 0x27d   :  { %2748 = vmatpush.bf16.msrb.mxu3 %v3950_v31  ;;  %2761 = vmatpush.bf16.msra.mxu0 %v4206_v40  ;;  %v4331_v29 = vld [vmem:[#allocation9 + $0x4e8] sm:$0xf0]  ;;  %v4903_v39 = vld [vmem:[#allocation9 + $0x2ac] sm:$0xf0] }
 0x27e   :  { %2774 = vmatpush.bf16.msra.mxu1 %v4462_v43  ;;  %2787 = vmatpush.bf16.msra.mxu2 %v4718_v44  ;;  %v5034_v55 = vld [vmem:[#allocation9 + $0x6cc] sm:$0xf]  ;;  %v4334_v22 = vor.u32 %v4970_v28, %v4331_v29  ;;  %v4935_v28 = vld [vmem:[#allocation9 + $0x3ac] sm:$0xf0] }
 0x27f   :  { %2730 = vmatmul.bf16.vlgmr.msrb.gmra.mxu1 %v5555_v63  ;;  %2743 = vmatmul.bf16.vlgmr.msrb.gmra.mxu2 %v5561_v6  ;;  %v4587_v30 = vld [vmem:[#allocation9 + $0x6e8] sm:$0xf0]  ;;  %v4433_v29 = vld [vmem:[#allocation9 + $0x590] sm:$0xf] }
 0x280   :  { %v4834_v34 = vld [vmem:[#allocation9 + $0x8c] sm:$0xf]  ;;  %v4590_v37 = vor.u32 %v5034_v55, %v4587_v30  ;;  %v4999_v55 = vld [vmem:[#allocation9 + $0x5ac] sm:$0xf0] }
 0x281   :  { %2749 = vmatpush.bf16.msrb.mxu3 %v3918_v51  ;;  %2762 = vmatpush.bf16.msra.mxu0 %v4174_v59  ;;  %v3787_v35 = vld [vmem:[#allocation9 + $0xa8] sm:$0xf0]  ;;  %v4689_v30 = vld [vmem:[#allocation9 + $0x790] sm:$0xf] }
 0x282   :  { %2775 = vmatpush.bf16.msra.mxu1 %v4430_v54  ;;  %2788 = vmatpush.bf16.msra.mxu2 %v4686_v26  ;;  %v4898_v9 = vld [vmem:[#allocation9 + $0x28c] sm:$0xf]  ;;  %v3790_v40 = vor.u32 %v4834_v34, %v3787_v35  ;;  %v4178_v34 = vor.u32 %v4935_v28, %v4177_v14  ;;  %v3889_v35 = vld [vmem:[#allocation9 + $0x150] sm:$0xf] }
 0x283   :  { %v4043_v60 = vld [vmem:[#allocation9 + $0x2a8] sm:$0xf0]  ;;  %v4305_v12 = vld [vmem:[#allocation9 + $0x490] sm:$0xf] }
 0x284   :  { %v4962_v47 = vld [vmem:[#allocation9 + $0x48c] sm:$0xf]  ;;  %v4046_v41 = vor.u32 %v4898_v9, %v4043_v60  ;;  %v4145_v60 = vld [vmem:[#allocation9 + $0x350] sm:$0xf] }
 0x285   :  { %2750 = vmatpush.bf16.msrb.mxu3 %v3886_v5  ;;  %2763 = vmatpush.bf16.msra.mxu0 %v4142_v62  ;;  %v4299_v3 = vld [vmem:[#allocation9 + $0x4a8] sm:$0xf0]  ;;  %v3953_v62 = vld [vmem:[#allocation9 + $0x1d0] sm:$0xf] }
 0x286   :  { %2776 = vmatpush.bf16.msra.mxu1 %v4398_v11  ;;  %2789 = vmatpush.bf16.msra.mxu2 %v4654_v50  ;;  %v5026_v38 = vld [vmem:[#allocation9 + $0x68c] sm:$0xf]  ;;  %v4302_v44 = vor.u32 %v4962_v47, %v4299_v3  ;;  %v4943_v11 = vld [vmem:[#allocation9 + $0x3ec] sm:$0xf0] }
 0x287   :  { %v4555_v31 = vld [vmem:[#allocation9 + $0x6a8] sm:$0xf0]  ;;  %v4465_v50 = vld [vmem:[#allocation9 + $0x5d0] sm:$0xf]  ;;  %v4210_v20 = vor.u32 %v4943_v11, %v4209_v10 }
 0x288   :  { %v4826_v42 = vld [vmem:[#allocation9 + $0x4c] sm:$0xf]  ;;  %v4558_v45 = vor.u32 %v5026_v38, %v4555_v31  ;;  %v4927_v47 = vld [vmem:[#allocation9 + $0x36c] sm:$0xf0] }
 0x289   :  { %2751 = vmatpush.bf16.msrb.mxu3 %v3854_v18  ;;  %2764 = vmatpush.bf16.msra.mxu0 %v4110_v19  ;;  %v3755_v43 = vld [vmem:[#allocation9 + $0x68] sm:$0xf0]  ;;  %v3954_v19 = vor.u32 %v4879_v7, %v3953_v62  ;;  %v4401_v3 = vld [vmem:[#allocation9 + $0x550] sm:$0xf] }
 0x28a   :  { %2777 = vmatpush.bf16.msra.mxu1 %v4366_v24  ;;  %2790 = vmatpush.bf16.msra.mxu2 %v4622_v25  ;;  %v4890_v46 = vld [vmem:[#allocation9 + $0x24c] sm:$0xf]  ;;  %v3758_v53 = vor.u32 %v4826_v42, %v3755_v43  ;;  %v4871_v24 = vld [vmem:[#allocation9 + $0x1ac] sm:$0xf0]  ;;  %v4466_v25 = vor.u32 %v5007_v15, %v4465_v50  ;;  %v4146_v42 = vor.u32 %v4927_v47, %v4145_v60 }
 0x28b   :  { %v4011_v48 = vld [vmem:[#allocation9 + $0x268] sm:$0xf0]  ;;  %v4991_v38 = vld [vmem:[#allocation9 + $0x56c] sm:$0xf0] }
 0x28c   :  { %v4954_v49 = vld [vmem:[#allocation9 + $0x44c] sm:$0xf]  ;;  %v4014_v17 = vor.u32 %v4890_v46, %v4011_v48  ;;  %v4657_v31 = vld [vmem:[#allocation9 + $0x750] sm:$0xf] }
 0x28d   :  { %2752 = vmatpush.bf16.msrb.mxu3 %v3822_v32  ;;  %2765 = vmatpush.bf16.msra.mxu0 %v4078_v33  ;;  %v4267_v58 = vld [vmem:[#allocation9 + $0x468] sm:$0xf0]  ;;  %v5063_v32 = vld [vmem:[#allocation9 + $0x7ac] sm:$0xf0]  ;;  %v3922_v33 = vor.u32 %v4871_v24, %v3921_v23 }
 0x28e   :  { %2778 = vmatpush.bf16.msra.mxu1 %v4334_v22  ;;  %2791 = vmatpush.bf16.msra.mxu2 %v4590_v37  ;;  %v5018_v52 = vld [vmem:[#allocation9 + $0x64c] sm:$0xf]  ;;  %v4270_v36 = vor.u32 %v4954_v49, %v4267_v58  ;;  %v4863_v22 = vld [vmem:[#allocation9 + $0x16c] sm:$0xf0]  ;;  %v4434_v37 = vor.u32 %v4999_v55, %v4433_v29  ;;  %v4690_v9 = vor.u32 %v5063_v32, %v4689_v30 }
 0x28f   :  { %v4523_v51 = vld [vmem:[#allocation9 + $0x668] sm:$0xf0]  ;;  %v3857_v43 = vld [vmem:[#allocation9 + $0x110] sm:$0xf] }
 0x290   :  { %v4818_v59 = vld [vmem:[#allocation9 + $0xc] sm:$0xf]  ;;  %v4526_v56 = vor.u32 %v5018_v52, %v4523_v51  ;;  %v4113_v48 = vld [vmem:[#allocation9 + $0x310] sm:$0xf] }
 0x291   :  { %2753 = vmatpush.bf16.msrb.mxu3 %v3790_v40  ;;  %2766 = vmatpush.bf16.msra.mxu0 %v4046_v41  ;;  %v3723_v54 = vld [vmem:[#allocation9 + $0x28] sm:$0xf0]  ;;  %v5055_v40 = vld [vmem:[#allocation9 + $0x76c] sm:$0xf0]  ;;  %v3890_v41 = vor.u32 %v4863_v22, %v3889_v35 }
 0x292   :  { %v4882_v26 = vld [vmem:[#allocation9 + $0x20c] sm:$0xf]  ;;  %2779 = vmatpush.bf16.msra.mxu1 %v4302_v44  ;;  %2792 = vmatpush.bf16.msra.mxu2 %v4558_v45  ;;  %v3726_v57 = vor.u32 %v4818_v59, %v3723_v54  ;;  %v4855_v44 = vld [vmem:[#allocation9 + $0x12c] sm:$0xf0]  ;;  %v4402_v45 = vor.u32 %v4991_v38, %v4401_v3  ;;  %v4658_v46 = vor.u32 %v5055_v40, %v4657_v31 }
 0x293   :  { %v3979_v21 = vld [vmem:[#allocation9 + $0x228] sm:$0xf0]  ;;  %v4919_v49 = vld [vmem:[#allocation9 + $0x32c] sm:$0xf0] }
 0x294   :  { %v4946_v61 = vld [vmem:[#allocation9 + $0x40c] sm:$0xf]  ;;  %v3982_v13 = vor.u32 %v4882_v26, %v3979_v21  ;;  %v4369_v58 = vld [vmem:[#allocation9 + $0x510] sm:$0xf] }
 0x295   :  { %v4235_v0 = vld [vmem:[#allocation9 + $0x428] sm:$0xf0]  ;;  %2754 = vmatpush.bf16.msrb.mxu3 %v3758_v53  ;;  %2767 = vmatpush.bf16.msra.mxu0 %v4014_v17  ;;  %v4983_v52 = vld [vmem:[#allocation9 + $0x52c] sm:$0xf0]  ;;  %v3858_v53 = vor.u32 %v4855_v44, %v3857_v43  ;;  %v4114_v17 = vor.u32 %v4919_v49, %v4113_v48  ;;  %v3955_v43 = vld [vmem:[#allocation9 + $0x1f0] sm:$0xf0] }
 0x296   :  { %v5010_v4 = vld [vmem:[#allocation9 + $0x60c] sm:$0xf]  ;;  %2780 = vmatpush.bf16.msra.mxu1 %v4270_v36  ;;  %2793 = vmatpush.bf16.msra.mxu2 %v4526_v56  ;;  %v4238_v16 = vor.u32 %v4946_v61, %v4235_v0  ;;  %v4625_v51 = vld [vmem:[#allocation9 + $0x710] sm:$0xf]  ;;  %v4370_v21 = vor.u32 %v4983_v52, %v4369_v58  ;;  %v4939_v44 = vld [vmem:[#allocation9 + $0x3d4] sm:$0xf] }
 0x297   :  { %v4491_v5 = vld [vmem:[#allocation9 + $0x628] sm:$0xf0]  ;;  %v5047_v59 = vld [vmem:[#allocation9 + $0x72c] sm:$0xf0]  ;;  %v4467_v58 = vld [vmem:[#allocation9 + $0x5f0] sm:$0xf0] }
 0x298   :  { %v4494_v18 = vor.u32 %v5010_v4, %v4491_v5  ;;  %v3825_v54 = vld [vmem:[#allocation9 + $0xd0] sm:$0xf]  ;;  %v4626_v36 = vor.u32 %v5047_v59, %v4625_v51  ;;  %v5067_v52 = vld [vmem:[#allocation9 + $0x7d4] sm:$0xf] }
 0x299   :  { %2755 = vmatpush.bf16.msrb.mxu3 %v3726_v57  ;;  %2768 = vmatpush.bf16.msra.mxu0 %v3982_v13  ;;  %v4847_v26 = vld [vmem:[#allocation9 + $0xec] sm:$0xf0]  ;;  %v4723_v51 = vld [vmem:[#allocation9 + $0x7f0] sm:$0xf0] }
 0x29a   :  { %2781 = vmatpush.bf16.msra.mxu1 %v4238_v16  ;;  %2794 = vmatpush.bf16.msra.mxu2 %v4494_v18  ;;  %v4081_v56 = vld [vmem:[#allocation9 + $0x2d0] sm:$0xf]  ;;  %v3826_v7 = vor.u32 %v4847_v26, %v3825_v54  ;;  %v4867_v26 = vld [vmem:[#allocation9 + $0x194] sm:$0xf] }
 0x29b   :  { %v4911_v61 = vld [vmem:[#allocation9 + $0x2ec] sm:$0xf0] }
 0x29c   :  { %2756 = vmatmul.bf16.vlgmr.msrb.gmra.mxu3 %v5557_v1  ;;  %2769 = vmatmul.bf16.vlgmr.msra.gmra.mxu0 %v5559_v2  ;;  %v4337_v0 = vld [vmem:[#allocation9 + $0x4d0] sm:$0xf]  ;;  %v4082_v10 = vor.u32 %v4911_v61, %v4081_v56  ;;  %v4726_v56 = vor.u32 %v5067_v52, %v4723_v51  ;;  %v4931_v61 = vld [vmem:[#allocation9 + $0x394] sm:$0xf] }
 0x29d   :  { %2800 = vmatpush.bf16.msra.mxu3 %v3954_v19  ;;  %2813 = vmatpush.bf16.msrb.mxu0 %v4210_v20  ;;  %v4975_v4 = vld [vmem:[#allocation9 + $0x4ec] sm:$0xf0]  ;;  %v4051_v52 = vld [vmem:[#allocation9 + $0x2b0] sm:$0xf0] }
 0x29e   :  { %2826 = vmatpush.bf16.msrb.mxu1 %v4466_v25  ;;  %2839 = vmatpush.bf16.msrb.mxu2 %v4722_v27  ;;  %v4593_v5 = vld [vmem:[#allocation9 + $0x6d0] sm:$0xf]  ;;  %v4338_v57 = vor.u32 %v4975_v4, %v4337_v0  ;;  %v4179_v0 = vld [vmem:[#allocation9 + $0x3b0] sm:$0xf0] }
 0x29f   :  { %2782 = vmatmul.bf16.vlgmr.msra.gmra.mxu1 %v5555_v63  ;;  %2795 = vmatmul.bf16.vlgmr.msra.gmra.mxu2 %v5561_v6  ;;  %v5039_v62 = vld [vmem:[#allocation9 + $0x6ec] sm:$0xf0]  ;;  %v4995_v4 = vld [vmem:[#allocation9 + $0x594] sm:$0xf] }
 0x2a0   :  { %v3793_v11 = vld [vmem:[#allocation9 + $0x90] sm:$0xf]  ;;  %v4594_v13 = vor.u32 %v5039_v62, %v4593_v5  ;;  %v4435_v5 = vld [vmem:[#allocation9 + $0x5b0] sm:$0xf0] }
 0x2a1   :  { %2801 = vmatpush.bf16.msra.mxu3 %v3922_v33  ;;  %2814 = vmatpush.bf16.msrb.mxu0 %v4178_v34  ;;  %v4839_v50 = vld [vmem:[#allocation9 + $0xac] sm:$0xf0]  ;;  %v5059_v62 = vld [vmem:[#allocation9 + $0x794] sm:$0xf] }
 0x2a2   :  { %2827 = vmatpush.bf16.msrb.mxu1 %v4434_v37  ;;  %2840 = vmatpush.bf16.msrb.mxu2 %v4690_v9  ;;  %v4049_v15 = vld [vmem:[#allocation9 + $0x290] sm:$0xf]  ;;  %v3794_v20 = vor.u32 %v4839_v50, %v3793_v11  ;;  %v4182_v11 = vor.u32 %v4931_v61, %v4179_v0  ;;  %v4859_v50 = vld [vmem:[#allocation9 + $0x154] sm:$0xf] }
 0x2a3   :  { %v4967_v16 = vld [vmem:[#allocation9 + $0x4ac] sm:$0xf0]  ;;  %v4050_v23 = vor.u32 %v4903_v39, %v4049_v15  ;;  %v4923_v39 = vld [vmem:[#allocation9 + $0x354] sm:$0xf] }
 0x2a4   :  { %v4561_v18 = vld [vmem:[#allocation9 + $0x690] sm:$0xf]  ;;  %v4306_v27 = vor.u32 %v4967_v16, %v4305_v12  ;;  %v4147_v12 = vld [vmem:[#allocation9 + $0x370] sm:$0xf0] }
 0x2a5   :  { %2802 = vmatpush.bf16.msra.mxu3 %v3890_v41  ;;  %2815 = vmatpush.bf16.msrb.mxu0 %v4146_v42  ;;  %v5031_v19 = vld [vmem:[#allocation9 + $0x6ac] sm:$0xf0]  ;;  %v4875_v42 = vld [vmem:[#allocation9 + $0x1d4] sm:$0xf] }
 0x2a6   :  { %2828 = vmatpush.bf16.msrb.mxu1 %v4402_v45  ;;  %2841 = vmatpush.bf16.msrb.mxu2 %v4658_v46  ;;  %v3761_v24 = vld [vmem:[#allocation9 + $0x50] sm:$0xf]  ;;  %v4562_v14 = vor.u32 %v5031_v19, %v4561_v18  ;;  %v4211_v45 = vld [vmem:[#allocation9 + $0x3f0] sm:$0xf0] }
 0x2a7   :  { %v4831_v25 = vld [vmem:[#allocation9 + $0x6c] sm:$0xf0]  ;;  %v5003_v46 = vld [vmem:[#allocation9 + $0x5d4] sm:$0xf]  ;;  %v4214_v54 = vor.u32 %v4939_v44, %v4211_v45 }
 0x2a8   :  { %v4017_v28 = vld [vmem:[#allocation9 + $0x250] sm:$0xf]  ;;  %v3762_v35 = vor.u32 %v4831_v25, %v3761_v24  ;;  %v4987_v16 = vld [vmem:[#allocation9 + $0x554] sm:$0xf]  ;;  %v4150_v24 = vor.u32 %v4923_v39, %v4147_v12 }
 0x2a9   :  { %2803 = vmatpush.bf16.msra.mxu3 %v3858_v53  ;;  %2816 = vmatpush.bf16.msrb.mxu0 %v4114_v17  ;;  %v4895_v29 = vld [vmem:[#allocation9 + $0x26c] sm:$0xf0]  ;;  %v3958_v17 = vor.u32 %v4875_v42, %v3955_v43  ;;  %v4403_v18 = vld [vmem:[#allocation9 + $0x570] sm:$0xf0] }
 0x2aa   :  { %2829 = vmatpush.bf16.msrb.mxu1 %v4370_v21  ;;  %2842 = vmatpush.bf16.msrb.mxu2 %v4626_v36  ;;  %v4273_v55 = vld [vmem:[#allocation9 + $0x450] sm:$0xf]  ;;  %v4018_v22 = vor.u32 %v4895_v29, %v4017_v28  ;;  %v3923_v21 = vld [vmem:[#allocation9 + $0x1b0] sm:$0xf0]  ;;  %v4470_v36 = vor.u32 %v5003_v46, %v4467_v58 }
 0x2ab   :  { %v4959_v30 = vld [vmem:[#allocation9 + $0x46c] sm:$0xf0]  ;;  %v5051_v19 = vld [vmem:[#allocation9 + $0x754] sm:$0xf] }
 0x2ac   :  { %v4529_v32 = vld [vmem:[#allocation9 + $0x650] sm:$0xf]  ;;  %v4274_v47 = vor.u32 %v4959_v30, %v4273_v55  ;;  %v4851_v25 = vld [vmem:[#allocation9 + $0x114] sm:$0xf] }
 0x2ad   :  { %2804 = vmatpush.bf16.msra.mxu3 %v3826_v7  ;;  %2817 = vmatpush.bf16.msrb.mxu0 %v4082_v10  ;;  %v5023_v33 = vld [vmem:[#allocation9 + $0x66c] sm:$0xf0]  ;;  %v4691_v7 = vld [vmem:[#allocation9 + $0x7b0] sm:$0xf0]  ;;  %v3926_v10 = vor.u32 %v4867_v26, %v3923_v21 }
 0x2ae   :  { %2830 = vmatpush.bf16.msrb.mxu1 %v4338_v57  ;;  %2843 = vmatpush.bf16.msrb.mxu2 %v4594_v13  ;;  %v3729_v34 = vld [vmem:[#allocation9 + $0x10] sm:$0xf]  ;;  %v4530_v3 = vor.u32 %v5023_v33, %v4529_v32  ;;  %v3891_v57 = vld [vmem:[#allocation9 + $0x170] sm:$0xf0]  ;;  %v4438_v13 = vor.u32 %v4995_v4, %v4435_v5  ;;  %v4694_v15 = vor.u32 %v5059_v62, %v4691_v7 }
 0x2af   :  { %v4823_v37 = vld [vmem:[#allocation9 + $0x2c] sm:$0xf0]  ;;  %v4915_v29 = vld [vmem:[#allocation9 + $0x314] sm:$0xf] }
 0x2b0   :  { %v3985_v9 = vld [vmem:[#allocation9 + $0x210] sm:$0xf]  ;;  %v3730_v48 = vor.u32 %v4823_v37, %v3729_v34  ;;  %v4115_v55 = vld [vmem:[#allocation9 + $0x330] sm:$0xf0] }
 0x2b1   :  { %2805 = vmatpush.bf16.msra.mxu3 %v3794_v20  ;;  %2818 = vmatpush.bf16.msrb.mxu0 %v4050_v23  ;;  %v4887_v60 = vld [vmem:[#allocation9 + $0x22c] sm:$0xf0]  ;;  %v4659_v20 = vld [vmem:[#allocation9 + $0x770] sm:$0xf0]  ;;  %v3894_v23 = vor.u32 %v4859_v50, %v3891_v57 }
 0x2b2   :  { %2831 = vmatpush.bf16.msrb.mxu1 %v4306_v27  ;;  %2844 = vmatpush.bf16.msrb.mxu2 %v4562_v14  ;;  %v4241_v38 = vld [vmem:[#allocation9 + $0x410] sm:$0xf]  ;;  %v3986_v49 = vor.u32 %v4887_v60, %v3985_v9  ;;  %v3859_v27 = vld [vmem:[#allocation9 + $0x130] sm:$0xf0]  ;;  %v4406_v14 = vor.u32 %v4987_v16, %v4403_v18  ;;  %v4662_v28 = vor.u32 %v5051_v19, %v4659_v20 }
 0x2b3   :  { %v4951_v31 = vld [vmem:[#allocation9 + $0x42c] sm:$0xf0]  ;;  %v4979_v30 = vld [vmem:[#allocation9 + $0x514] sm:$0xf] }
 0x2b4   :  { %v4497_v40 = vld [vmem:[#allocation9 + $0x610] sm:$0xf]  ;;  %v4242_v59 = vor.u32 %v4951_v31, %v4241_v38  ;;  %v4371_v32 = vld [vmem:[#allocation9 + $0x530] sm:$0xf0] }
 0x2b5   :  { %v5015_v41 = vld [vmem:[#allocation9 + $0x62c] sm:$0xf0]  ;;  %2806 = vmatpush.bf16.msra.mxu3 %v3762_v35  ;;  %2819 = vmatpush.bf16.msrb.mxu0 %v4018_v22  ;;  %v5043_v33 = vld [vmem:[#allocation9 + $0x714] sm:$0xf]  ;;  %v3862_v35 = vor.u32 %v4851_v25, %v3859_v27  ;;  %v4118_v22 = vor.u32 %v4915_v29, %v4115_v55  ;;  %v4374_v60 = vor.u32 %v4979_v30, %v4371_v32  ;;  %v4880_v25 = vld [vmem:[#allocation9 + $0x1f4] sm:$0xf0] }
 0x2b6   :  { %2832 = vmatpush.bf16.msrb.mxu1 %v4274_v47  ;;  %2845 = vmatpush.bf16.msrb.mxu2 %v4530_v3  ;;  %v4498_v53 = vor.u32 %v5015_v41, %v4497_v40  ;;  %v4627_v34 = vld [vmem:[#allocation9 + $0x730] sm:$0xf0]  ;;  %v4217_v27 = vld [vmem:[#allocation9 + $0x3d8] sm:$0xf] }
 0x2b7   :  { %v4843_v37 = vld [vmem:[#allocation9 + $0xd4] sm:$0xf]  ;;  %v4630_v47 = vor.u32 %v5043_v33, %v4627_v34  ;;  %v5008_v30 = vld [vmem:[#allocation9 + $0x5f4] sm:$0xf0] }
 0x2b8   :  { %v3827_v9 = vld [vmem:[#allocation9 + $0xf0] sm:$0xf0]  ;;  %v4729_v32 = vld [vmem:[#allocation9 + $0x7d8] sm:$0xf] }
 0x2b9   :  { %2807 = vmatpush.bf16.msra.mxu3 %v3730_v48  ;;  %2820 = vmatpush.bf16.msrb.mxu0 %v3986_v49  ;;  %v4907_v3 = vld [vmem:[#allocation9 + $0x2d4] sm:$0xf]  ;;  %v3830_v43 = vor.u32 %v4843_v37, %v3827_v9  ;;  %v5072_v33 = vld [vmem:[#allocation9 + $0x7f4] sm:$0xf0] }
 0x2ba   :  { %2833 = vmatpush.bf16.msrb.mxu1 %v4242_v59  ;;  %2846 = vmatpush.bf16.msrb.mxu2 %v4498_v53  ;;  %v4083_v38 = vld [vmem:[#allocation9 + $0x2f0] sm:$0xf0]  ;;  %v3929_v9 = vld [vmem:[#allocation9 + $0x198] sm:$0xf] }
 0x2bb   :  { %v4971_v31 = vld [vmem:[#allocation9 + $0x4d4] sm:$0xf]  ;;  %v4086_v44 = vor.u32 %v4907_v3, %v4083_v38  ;;  %v4730_v3 = vor.u32 %v5072_v33, %v4729_v32  ;;  %v4185_v38 = vld [vmem:[#allocation9 + $0x398] sm:$0xf] }
 0x2bc   :  { %2808 = vmatmul.bf16.vlgmr.msra.gmra.mxu3 %v5557_v1  ;;  %2821 = vmatmul.bf16.vlgmr.msrb.gmra.mxu0 %v5559_v2  ;;  %v4339_v40 = vld [vmem:[#allocation9 + $0x4f0] sm:$0xf0] }
 0x2bd   :  { %2852 = vmatpush.bf16.msrb.mxu3 %v3958_v17  ;;  %2865 = vmatpush.bf16.msra.mxu0 %v4214_v54  ;;  %v5035_v41 = vld [vmem:[#allocation9 + $0x6d4] sm:$0xf]  ;;  %v4342_v48 = vor.u32 %v4971_v31, %v4339_v40  ;;  %v4936_v31 = vld [vmem:[#allocation9 + $0x3b4] sm:$0xf0] }
 0x2be   :  { %2878 = vmatpush.bf16.msra.mxu1 %v4470_v36  ;;  %2891 = vmatpush.bf16.msra.mxu2 %v4726_v56  ;;  %v4595_v42 = vld [vmem:[#allocation9 + $0x6f0] sm:$0xf0]  ;;  %v4441_v40 = vld [vmem:[#allocation9 + $0x598] sm:$0xf] }
 0x2bf   :  { %2834 = vmatmul.bf16.vlgmr.msrb.gmra.mxu1 %v5555_v63  ;;  %2847 = vmatmul.bf16.vlgmr.msrb.gmra.mxu2 %v5561_v6  ;;  %v4835_v45 = vld [vmem:[#allocation9 + $0x94] sm:$0xf]  ;;  %v4598_v49 = vor.u32 %v5035_v41, %v4595_v42  ;;  %v5000_v41 = vld [vmem:[#allocation9 + $0x5b4] sm:$0xf0] }
 0x2c0   :  { %v3795_v46 = vld [vmem:[#allocation9 + $0xb0] sm:$0xf0]  ;;  %v4697_v42 = vld [vmem:[#allocation9 + $0x798] sm:$0xf] }
 0x2c1   :  { %2853 = vmatpush.bf16.msrb.mxu3 %v3926_v10  ;;  %2866 = vmatpush.bf16.msra.mxu0 %v4182_v11  ;;  %v4899_v58 = vld [vmem:[#allocation9 + $0x294] sm:$0xf]  ;;  %v3798_v54 = vor.u32 %v4835_v45, %v3795_v46  ;;  %v4186_v45 = vor.u32 %v4936_v31, %v4185_v38  ;;  %v3897_v46 = vld [vmem:[#allocation9 + $0x158] sm:$0xf] }
 0x2c2   :  { %2879 = vmatpush.bf16.msra.mxu1 %v4438_v13  ;;  %2892 = vmatpush.bf16.msra.mxu2 %v4694_v15  ;;  %v4963_v51 = vld [vmem:[#allocation9 + $0x494] sm:$0xf]  ;;  %v4054_v26 = vor.u32 %v4899_v58, %v4051_v52  ;;  %v4153_v52 = vld [vmem:[#allocation9 + $0x358] sm:$0xf] }
 0x2c3   :  { %v4307_v59 = vld [vmem:[#allocation9 + $0x4b0] sm:$0xf0]  ;;  %v4968_v31 = vld [vmem:[#allocation9 + $0x4b4] sm:$0xf0] }
 0x2c4   :  { %v5027_v53 = vld [vmem:[#allocation9 + $0x694] sm:$0xf]  ;;  %v4310_v56 = vor.u32 %v4963_v51, %v4307_v59  ;;  %v4928_v51 = vld [vmem:[#allocation9 + $0x374] sm:$0xf0] }
 0x2c5   :  { %2854 = vmatpush.bf16.msrb.mxu3 %v3894_v23  ;;  %2867 = vmatpush.bf16.msra.mxu0 %v4150_v24  ;;  %v4563_v17 = vld [vmem:[#allocation9 + $0x6b0] sm:$0xf0]  ;;  %v3961_v24 = vld [vmem:[#allocation9 + $0x1d8] sm:$0xf] }
 0x2c6   :  { %2880 = vmatpush.bf16.msra.mxu1 %v4406_v14  ;;  %2893 = vmatpush.bf16.msra.mxu2 %v4662_v28  ;;  %v4827_v21 = vld [vmem:[#allocation9 + $0x54] sm:$0xf]  ;;  %v4566_v61 = vor.u32 %v5027_v53, %v4563_v17  ;;  %v4944_v14 = vld [vmem:[#allocation9 + $0x3f4] sm:$0xf0] }
 0x2c7   :  { %v3763_v36 = vld [vmem:[#allocation9 + $0x70] sm:$0xf0]  ;;  %v4473_v28 = vld [vmem:[#allocation9 + $0x5d8] sm:$0xf]  ;;  %v4218_v37 = vor.u32 %v4944_v14, %v4217_v27 }
 0x2c8   :  { %v4891_v0 = vld [vmem:[#allocation9 + $0x254] sm:$0xf]  ;;  %v3766_v50 = vor.u32 %v4827_v21, %v3763_v36  ;;  %v4409_v59 = vld [vmem:[#allocation9 + $0x558] sm:$0xf]  ;;  %v4154_v36 = vor.u32 %v4928_v51, %v4153_v52 }
 0x2c9   :  { %2855 = vmatpush.bf16.msrb.mxu3 %v3862_v35  ;;  %2868 = vmatpush.bf16.msra.mxu0 %v4118_v22  ;;  %v4019_v4 = vld [vmem:[#allocation9 + $0x270] sm:$0xf0]  ;;  %v3962_v22 = vor.u32 %v4880_v25, %v3961_v24  ;;  %v4992_v53 = vld [vmem:[#allocation9 + $0x574] sm:$0xf0] }
 0x2ca   :  { %2881 = vmatpush.bf16.msra.mxu1 %v4374_v60  ;;  %2894 = vmatpush.bf16.msra.mxu2 %v4630_v47  ;;  %v4955_v5 = vld [vmem:[#allocation9 + $0x454] sm:$0xf]  ;;  %v4022_v57 = vor.u32 %v4891_v0, %v4019_v4  ;;  %v4872_v60 = vld [vmem:[#allocation9 + $0x1b4] sm:$0xf0]  ;;  %v4474_v47 = vor.u32 %v5008_v30, %v4473_v28  ;;  %v4410_v4 = vor.u32 %v4992_v53, %v4409_v59 }
 0x2cb   :  { %v4275_v62 = vld [vmem:[#allocation9 + $0x470] sm:$0xf0]  ;;  %v4665_v17 = vld [vmem:[#allocation9 + $0x758] sm:$0xf] }
 0x2cc   :  { %v5019_v7 = vld [vmem:[#allocation9 + $0x654] sm:$0xf]  ;;  %v4278_v12 = vor.u32 %v4955_v5, %v4275_v62  ;;  %v4856_v0 = vld [vmem:[#allocation9 + $0x134] sm:$0xf0] }
 0x2cd   :  { %2856 = vmatpush.bf16.msrb.mxu3 %v3830_v43  ;;  %2869 = vmatpush.bf16.msra.mxu0 %v4086_v44  ;;  %v4531_v10 = vld [vmem:[#allocation9 + $0x670] sm:$0xf0]  ;;  %v5064_v43 = vld [vmem:[#allocation9 + $0x7b4] sm:$0xf0]  ;;  %v3930_v44 = vor.u32 %v4872_v60, %v3929_v9 }
 0x2ce   :  { %2882 = vmatpush.bf16.msra.mxu1 %v4342_v48  ;;  %2895 = vmatpush.bf16.msra.mxu2 %v4598_v49  ;;  %v4819_v11 = vld [vmem:[#allocation9 + $0x14] sm:$0xf]  ;;  %v4534_v16 = vor.u32 %v5019_v7, %v4531_v10  ;;  %v4864_v48 = vld [vmem:[#allocation9 + $0x174] sm:$0xf0]  ;;  %v4442_v49 = vor.u32 %v5000_v41, %v4441_v40  ;;  %v4698_v58 = vor.u32 %v5064_v43, %v4697_v42 }
 0x2cf   :  { %v3731_v13 = vld [vmem:[#allocation9 + $0x30] sm:$0xf0]  ;;  %v3898_v21 = vor.u32 %v4864_v48, %v3897_v46  ;;  %v4121_v62 = vld [vmem:[#allocation9 + $0x318] sm:$0xf] }
 0x2d0   :  { %v4883_v15 = vld [vmem:[#allocation9 + $0x214] sm:$0xf]  ;;  %v3734_v29 = vor.u32 %v4819_v11, %v3731_v13  ;;  %v4920_v7 = vld [vmem:[#allocation9 + $0x334] sm:$0xf0] }
 0x2d1   :  { %2857 = vmatpush.bf16.msrb.mxu3 %v3798_v54  ;;  %2870 = vmatpush.bf16.msra.mxu0 %v4054_v26  ;;  %v3987_v39 = vld [vmem:[#allocation9 + $0x230] sm:$0xf0]  ;;  %v5056_v54 = vld [vmem:[#allocation9 + $0x774] sm:$0xf0] }
 0x2d2   :  { %2883 = vmatpush.bf16.msra.mxu1 %v4310_v56  ;;  %2896 = vmatpush.bf16.msra.mxu2 %v4566_v61  ;;  %v4947_v18 = vld [vmem:[#allocation9 + $0x414] sm:$0xf]  ;;  %v3990_v55 = vor.u32 %v4883_v15, %v3987_v39  ;;  %v3865_v61 = vld [vmem:[#allocation9 + $0x118] sm:$0xf]  ;;  %v4666_v5 = vor.u32 %v5056_v54, %v4665_v17  ;;  %v4122_v15 = vor.u32 %v4920_v7, %v4121_v62 }
 0x2d3   :  { %v4243_v19 = vld [vmem:[#allocation9 + $0x430] sm:$0xf0]  ;;  %v4377_v10 = vld [vmem:[#allocation9 + $0x518] sm:$0xf]  ;;  %v3866_v13 = vor.u32 %v4856_v0, %v3865_v61 }
 0x2d4   :  { %v5011_v20 = vld [vmem:[#allocation9 + $0x614] sm:$0xf]  ;;  %v4246_v34 = vor.u32 %v4947_v18, %v4243_v19  ;;  %v4984_v11 = vld [vmem:[#allocation9 + $0x534] sm:$0xf0] }
 0x2d5   :  { %v4499_v23 = vld [vmem:[#allocation9 + $0x630] sm:$0xf0]  ;;  %2858 = vmatpush.bf16.msrb.mxu3 %v3766_v50  ;;  %2871 = vmatpush.bf16.msra.mxu0 %v4022_v57  ;;  %v4633_v50 = vld [vmem:[#allocation9 + $0x718] sm:$0xf] }
 0x2d6   :  { %2884 = vmatpush.bf16.msra.mxu1 %v4278_v12  ;;  %2897 = vmatpush.bf16.msra.mxu2 %v4534_v16  ;;  %v4502_v35 = vor.u32 %v5011_v20, %v4499_v23  ;;  %v5048_v57 = vld [vmem:[#allocation9 + $0x734] sm:$0xf0]  ;;  %v4378_v16 = vor.u32 %v4984_v11, %v4377_v10 }
 0x2d7   :  { %v3833_v39 = vld [vmem:[#allocation9 + $0xd8] sm:$0xf]  ;;  %v4634_v18 = vor.u32 %v5048_v57, %v4633_v50 }
 0x2d8   :  { %v2614_v26 = vpop.f32.mrf.mxu0  ;;  %v4848_v12 = vld [vmem:[#allocation9 + $0xf4] sm:$0xf0] }
 0x2d9   :  { %2859 = vmatpush.bf16.msrb.mxu3 %v3734_v29  ;;  %2872 = vmatpush.bf16.msra.mxu0 %v3990_v55  ;;  %v2627_v56 = vpop.f32.mrf.mxu1  ;;  %v4089_v20 = vld [vmem:[#allocation9 + $0x2d8] sm:$0xf]  ;;  %v3834_v32 = vor.u32 %v4848_v12, %v3833_v39 }
 0x2da   :  { %2885 = vmatpush.bf16.msra.mxu1 %v4246_v34  ;;  %2898 = vmatpush.bf16.msra.mxu2 %v4502_v35  ;;  %v4912_v23 = vld [vmem:[#allocation9 + $0x2f4] sm:$0xf0] }
 0x2db   :  { %v4345_v24 = vld [vmem:[#allocation9 + $0x4d8] sm:$0xf]  ;;  %v4090_v33 = vor.u32 %v4912_v23, %v4089_v20 }
 0x2dc   :  { %2860 = vmatmul.bf16.vlgmr.msrb.gmra.mxu3 %v5557_v1  ;;  %2873 = vmatmul.bf16.vlgmr.msra.gmra.mxu0 %v5559_v2  ;;  %v4976_v14 = vld [vmem:[#allocation9 + $0x4f4] sm:$0xf0] }
 0x2dd   :  { %2904 = vmatpush.bf16.msra.mxu3 %v3962_v22  ;;  %2917 = vmatpush.bf16.msrb.mxu0 %v4218_v37  ;;  %v4601_v28 = vld [vmem:[#allocation9 + $0x6d8] sm:$0xf]  ;;  %v4346_v37 = vor.u32 %v4976_v14, %v4345_v24  ;;  %v3963_v24 = vld [vmem:[#allocation9 + $0x1f8] sm:$0xf0] }
 0x2de   :  { %2930 = vmatpush.bf16.msrb.mxu1 %v4474_v47  ;;  %2943 = vmatpush.bf16.msrb.mxu2 %v4730_v3  ;;  %v2601_v19 = vpop.f32.mrf.mxu3  ;;  %v5040_v29 = vld [vmem:[#allocation9 + $0x6f4] sm:$0xf0]  ;;  %v5004_v14 = vld [vmem:[#allocation9 + $0x5dc] sm:$0xf] }
 0x2df   :  { %2886 = vmatmul.bf16.vlgmr.msra.gmra.mxu1 %v5555_v63  ;;  %2899 = vmatmul.bf16.vlgmr.msra.gmra.mxu2 %v5561_v6  ;;  %v2615_v25 = vadd.f32 %v2614_v26, %v2601_v19  ;;  %v2640_v27 = vpop.f32.mrf.mxu2  ;;  %v3801_v35 = vld [vmem:[#allocation9 + $0x98] sm:$0xf]  ;;  %v4602_v9 = vor.u32 %v5040_v29, %v4601_v28  ;;  %v4876_v19 = vld [vmem:[#allocation9 + $0x1dc] sm:$0xf] }
 0x2e0   :  { %v2616_v55 = vpop.f32.mrf.mxu0  ;;  %v4840_v22 = vld [vmem:[#allocation9 + $0xb4] sm:$0xf0]  ;;  %v4475_v28 = vld [vmem:[#allocation9 + $0x5f8] sm:$0xf0] }
 0x2e1   :  { %2905 = vmatpush.bf16.msra.mxu3 %v3930_v44  ;;  %2918 = vmatpush.bf16.msrb.mxu0 %v4186_v45  ;;  %v2628_v30 = vadd.f32 %v2627_v56, %v2615_v25  ;;  %v2629_v34 = vpop.f32.mrf.mxu1  ;;  %v4057_v60 = vld [vmem:[#allocation9 + $0x298] sm:$0xf]  ;;  %v3802_v45 = vor.u32 %v4840_v22, %v3801_v35  ;;  %v4940_v25 = vld [vmem:[#allocation9 + $0x3dc] sm:$0xf] }
 0x2e2   :  { %2931 = vmatpush.bf16.msrb.mxu1 %v4442_v49  ;;  %2944 = vmatpush.bf16.msrb.mxu2 %v4698_v58  ;;  %v4904_v47 = vld [vmem:[#allocation9 + $0x2b4] sm:$0xf0]  ;;  %v4731_v34 = vld [vmem:[#allocation9 + $0x7f8] sm:$0xf0] }
 0x2e3   :  { %v4313_v3 = vld [vmem:[#allocation9 + $0x498] sm:$0xf]  ;;  %v5587_v38 = vadd.f32 %v2640_v27, %v2628_v30  ;;  %v4058_v46 = vor.u32 %v4904_v47, %v4057_v60  ;;  %v4219_v27 = vld [vmem:[#allocation9 + $0x3f8] sm:$0xf0] }
 0x2e4   :  { %v4569_v40 = vld [vmem:[#allocation9 + $0x698] sm:$0xf]  ;;  %v4314_v58 = vor.u32 %v4968_v31, %v4313_v3  ;;  %v4868_v60 = vld [vmem:[#allocation9 + $0x19c] sm:$0xf] }
 0x2e5   :  { %2906 = vmatpush.bf16.msra.mxu3 %v3898_v21  ;;  %2919 = vmatpush.bf16.msrb.mxu0 %v4154_v36  ;;  %v5032_v41 = vld [vmem:[#allocation9 + $0x6b4] sm:$0xf0]  ;;  %v3008_v43 = vrot.slane %v5587_v38, 4  ;;  %v3064_v44 = vmul.f32 %v5587_v38, %v5587_v38  ;;  %v3931_v47 = vld [vmem:[#allocation9 + $0x1b8] sm:$0xf0] }
 0x2e6   :  { %2932 = vmatpush.bf16.msrb.mxu1 %v4410_v4  ;;  %2945 = vmatpush.bf16.msrb.mxu2 %v4666_v5  ;;  %v3769_v42 = vld [vmem:[#allocation9 + $0x58] sm:$0xf]  ;;  %v4570_v52 = vor.u32 %v5032_v41, %v4569_v40  ;;  %v2603_v51 = vpop.f32.mrf.mxu3  ;;  %v4222_v40 = vor.u32 %v4940_v25, %v4219_v27  ;;  %v3867_v27 = vld [vmem:[#allocation9 + $0x138] sm:$0xf0] }
 0x2e7   :  { %v4832_v48 = vld [vmem:[#allocation9 + $0x74] sm:$0xf0]  ;;  %v3009_v54 = vadd.f32 %v3008_v43, %v5587_v38  ;;  %v3072_v26 = vrot.slane %v3064_v44, 4  ;;  %v2642_v21 = vpop.f32.mrf.mxu2  ;;  %v4932_v43 = vld [vmem:[#allocation9 + $0x39c] sm:$0xf] }
 0x2e8   :  { %v4025_v49 = vld [vmem:[#allocation9 + $0x258] sm:$0xf]  ;;  %v2666_v61 = vpop.f32.mrf.mxu0  ;;  %v3770_v11 = vor.u32 %v4832_v48, %v3769_v42 }
 0x2e9   :  { %2907 = vmatpush.bf16.msra.mxu3 %v3866_v13  ;;  %2920 = vmatpush.bf16.msrb.mxu0 %v4122_v15  ;;  %v4896_v59 = vld [vmem:[#allocation9 + $0x274] sm:$0xf0]  ;;  %v3010_v7 = vrot.slane %v3009_v54, 2  ;;  %v3073_v10 = vadd.f32 %v3072_v26, %v3064_v44  ;;  %v2679_v57 = vpop.f32.mrf.mxu1  ;;  %v4187_v44 = vld [vmem:[#allocation9 + $0x3b8] sm:$0xf0]  ;;  %v3934_v26 = vor.u32 %v4868_v60, %v3931_v47 }
 0x2ea   :  { %2933 = vmatpush.bf16.msrb.mxu1 %v4378_v16  ;;  %2946 = vmatpush.bf16.msrb.mxu2 %v4634_v18  ;;  %v4281_v53 = vld [vmem:[#allocation9 + $0x458] sm:$0xf]  ;;  %v4026_v50 = vor.u32 %v4896_v59, %v4025_v49  ;;  %v4996_v49 = vld [vmem:[#allocation9 + $0x59c] sm:$0xf]  ;;  %v4190_v21 = vor.u32 %v4932_v43, %v4187_v44 }
 0x2eb   :  { %v4960_v17 = vld [vmem:[#allocation9 + $0x474] sm:$0xf0]  ;;  %v3011_v20 = vadd.f32 %v3010_v7, %v3009_v54  ;;  %v3074_v23 = vrot.slane %v3073_v10, 2  ;;  %v4699_v54 = vld [vmem:[#allocation9 + $0x7b8] sm:$0xf0] }
 0x2ec   :  { %v4537_v36 = vld [vmem:[#allocation9 + $0x658] sm:$0xf]  ;;  %v4282_v39 = vor.u32 %v4960_v17, %v4281_v53  ;;  %v4443_v53 = vld [vmem:[#allocation9 + $0x5b8] sm:$0xf0] }
 0x2ed   :  { %2908 = vmatpush.bf16.msra.mxu3 %v3834_v32  ;;  %2921 = vmatpush.bf16.msrb.mxu0 %v4090_v33  ;;  %v5024_v56 = vld [vmem:[#allocation9 + $0x674] sm:$0xf0]  ;;  %v3012_v29 = vrot.slane %v3011_v20, 1  ;;  %v3075_v55 = vadd.f32 %v3074_v23, %v3073_v10  ;;  %v5068_v33 = vld [vmem:[#allocation9 + $0x7dc] sm:$0xf] }
 0x2ee   :  { %2934 = vmatpush.bf16.msrb.mxu1 %v4346_v37  ;;  %2947 = vmatpush.bf16.msrb.mxu2 %v4602_v9  ;;  %v3737_v0 = vld [vmem:[#allocation9 + $0x18] sm:$0xf]  ;;  %v4538_v12 = vor.u32 %v5024_v56, %v4537_v36  ;;  %v3966_v37 = vor.u32 %v4876_v19, %v3963_v24  ;;  %v2653_v9 = vpop.f32.mrf.mxu3  ;;  %v5060_v17 = vld [vmem:[#allocation9 + $0x79c] sm:$0xf] }
 0x2ef   :  { %v4824_v4 = vld [vmem:[#allocation9 + $0x34] sm:$0xf0]  ;;  %v3013_v3 = vadd.f32 %v3012_v29, %v3011_v20  ;;  %v3076_v31 = vrot.slane %v3075_v55, 1  ;;  %v2667_v41 = vadd.f32 %v2666_v61, %v2653_v9  ;;  %v2692_v42 = vpop.f32.mrf.mxu2  ;;  %v4702_v7 = vor.u32 %v5060_v17, %v4699_v54  ;;  %v4155_v10 = vld [vmem:[#allocation9 + $0x378] sm:$0xf0] }
 0x2f0   :  { %v3993_v5 = vld [vmem:[#allocation9 + $0x218] sm:$0xf]  ;;  %v3738_v30 = vor.u32 %v4824_v4, %v3737_v0  ;;  %v2668_v48 = vpop.f32.mrf.mxu0  ;;  %v4860_v0 = vld [vmem:[#allocation9 + $0x15c] sm:$0xf] }
 0x2f1   :  { %v4888_v62 = vld [vmem:[#allocation9 + $0x234] sm:$0xf0]  ;;  %2909 = vmatpush.bf16.msra.mxu3 %v3802_v45  ;;  %2922 = vmatpush.bf16.msrb.mxu0 %v4058_v46  ;;  %v4478_v45 = vor.u32 %v5004_v14, %v4475_v28  ;;  %v4734_v46 = vor.u32 %v5068_v33, %v4731_v34  ;;  %v2680_v51 = vadd.f32 %v2679_v57, %v2667_v41  ;;  %v2681_v59 = vpop.f32.mrf.mxu1  ;;  %v3899_v4 = vld [vmem:[#allocation9 + $0x178] sm:$0xf0] }
 0x2f2   :  { %v4249_v13 = vld [vmem:[#allocation9 + $0x418] sm:$0xf]  ;;  %2935 = vmatpush.bf16.msrb.mxu1 %v4314_v58  ;;  %2948 = vmatpush.bf16.msrb.mxu2 %v4570_v52  ;;  %v3994_v32 = vor.u32 %v4888_v62, %v3993_v5  ;;  %v5594_v58 = vmul.f32 %v3013_v3, %v5360_v8  ;;  %v3077_v52 = vadd.f32 %v3076_v31, %v3075_v55  ;;  %v4924_v5 = vld [vmem:[#allocation9 + $0x35c] sm:$0xf] }
 0x2f3   :  { %v4952_v15 = vld [vmem:[#allocation9 + $0x434] sm:$0xf0]  ;;  %v5599_v61 = vadd.f32 %v2692_v42, %v2680_v51  ;;  %v4446_v62 = vor.u32 %v4996_v49, %v4443_v53  ;;  %v3902_v23 = vor.u32 %v4860_v0, %v3899_v4  ;;  %v4158_v24 = vor.u32 %v4924_v5, %v4155_v10  ;;  %v4916_v14 = vld [vmem:[#allocation9 + $0x31c] sm:$0xf] }
 0x2f4   :  { %v4505_v16 = vld [vmem:[#allocation9 + $0x618] sm:$0xf]  ;;  %v4250_v35 = vor.u32 %v4952_v15, %v4249_v13  ;;  %v3120_v36 = vmul.f32 %v3077_v52, %v5360_v8  ;;  %v3128_v56 = vmul.f32 %v5594_v58, %v5594_v58  ;;  %v4123_v55 = vld [vmem:[#allocation9 + $0x338] sm:$0xf0] }
 0x2f5   :  { %v5016_v18 = vld [vmem:[#allocation9 + $0x634] sm:$0xf0]  ;;  %2910 = vmatpush.bf16.msra.mxu3 %v3770_v11  ;;  %2923 = vmatpush.bf16.msrb.mxu0 %v4026_v50  ;;  %v4988_v11 = vld [vmem:[#allocation9 + $0x55c] sm:$0xf]  ;;  %v3014_v13 = vrot.slane %v5599_v61, 4  ;;  %v3065_v15 = vmul.f32 %v5599_v61, %v5599_v61  ;;  %v4126_v42 = vor.u32 %v4916_v14, %v4123_v55 }
 0x2f6   :  { %2936 = vmatpush.bf16.msrb.mxu1 %v4282_v39  ;;  %2949 = vmatpush.bf16.msrb.mxu2 %v4538_v12  ;;  %v4506_v22 = vor.u32 %v5016_v18, %v4505_v16  ;;  %v4411_v50 = vld [vmem:[#allocation9 + $0x578] sm:$0xf0]  ;;  %v3136_v57 = vsub.f32 %v3120_v36, %v3128_v56  ;;  %v2655_v16 = vpop.f32.mrf.mxu3 }
 0x2f7   :  { %v5052_v39 = vld [vmem:[#allocation9 + $0x75c] sm:$0xf]  ;;  %v3015_v19 = vadd.f32 %v3014_v13, %v5599_v61  ;;  %v3078_v20 = vrot.slane %v3065_v15, 4  ;;  %v2694_v25 = vpop.f32.mrf.mxu2  ;;  %v4414_v28 = vor.u32 %v4988_v11, %v4411_v50 }
 0x2f8   :  { %v4667_v12 = vld [vmem:[#allocation9 + $0x778] sm:$0xf0]  ;;  %v3144_v33 = vmax.f32 %v3136_v57, 0.0 }
 0x2f9   :  { %2911 = vmatpush.bf16.msra.mxu3 %v3738_v30  ;;  %2924 = vmatpush.bf16.msrb.mxu0 %v3994_v32  ;;  %v4852_v18 = vld [vmem:[#allocation9 + $0x11c] sm:$0xf]  ;;  %v4670_v29 = vor.u32 %v5052_v39, %v4667_v12  ;;  %v3016_v34 = vrot.slane %v3015_v19, 2  ;;  %v2718_v9 = vpop.f32.mrf.mxu0 }
 0x2fa   :  { %2937 = vmatpush.bf16.msrb.mxu1 %v4250_v35  ;;  %2950 = vmatpush.bf16.msrb.mxu2 %v4506_v22  ;;  %v4980_v30 = vld [vmem:[#allocation9 + $0x51c] sm:$0xf]  ;;  %v3079_v35 = vadd.f32 %v3078_v20, %v3065_v15  ;;  %v3870_v41 = vor.u32 %v4852_v18, %v3867_v27  ;;  %v5609_v51 = vadd.f32 0.8, %v3144_v33 }
 0x2fb   :  { %v4379_v32 = vld [vmem:[#allocation9 + $0x538] sm:$0xf0]  ;;  %v3017_v3 = vadd.f32 %v3016_v34, %v3015_v19 }
 0x2fc   :  { %2912 = vmatmul.bf16.vlgmr.msra.gmra.mxu3 %v5557_v1  ;;  %2925 = vmatmul.bf16.vlgmr.msrb.gmra.mxu0 %v5559_v2  ;;  %v5044_v22 = vld [vmem:[#allocation9 + $0x71c] sm:$0xf]  ;;  %v3080_v31 = vrot.slane %v3079_v35, 2  ;;  %5103 = vrsqrt.f32 %v5609_v51  ;;  %vm3166_vm12 = vweird.f32 %v5609_v51 }
 0x2fd   :  { %2956 = vmatpush.bf16.msrb.mxu3 %v3966_v37  ;;  %2969 = vmatpush.bf16.msra.mxu0 %v4222_v40  ;;  %v4635_v37 = vld [vmem:[#allocation9 + $0x738] sm:$0xf0]  ;;  %v2731_v40 = vpop.f32.mrf.mxu1  ;;  %v3018_v59 = vrot.slane %v3017_v3, 1 }
 0x2fe   :  { %2982 = vmatpush.bf16.msra.mxu1 %v4478_v45  ;;  %2995 = vmatpush.bf16.msra.mxu2 %v4734_v46  ;;  %v4844_v60 = vld [vmem:[#allocation9 + $0xdc] sm:$0xf]  ;;  %v4382_v45 = vor.u32 %v4980_v30, %v4379_v32  ;;  %v4638_v46 = vor.u32 %v5044_v22, %v4635_v37  ;;  %v3081_v53 = vadd.f32 %v3080_v31, %v3079_v35 }
 0x2ff   :  { %2938 = vmatmul.bf16.vlgmr.msrb.gmra.mxu1 %v5555_v63  ;;  %2951 = vmatmul.bf16.vlgmr.msrb.gmra.mxu2 %v5561_v6  ;;  %v3835_v47 = vld [vmem:[#allocation9 + $0xf8] sm:$0xf0]  ;;  %v2705_v10 = vpop.f32.mrf.mxu3 }
 0x300   :  { %v4908_v43 = vld [vmem:[#allocation9 + $0x2dc] sm:$0xf]  ;;  %v3082_v36 = vrot.slane %v3081_v53, 1  ;;  %v3838_v56 = vor.u32 %v4844_v60, %v3835_v47  ;;  %v2719_v13 = vadd.f32 %v2718_v9, %v2705_v10 }
 0x301   :  { %2957 = vmatpush.bf16.msrb.mxu3 %v3934_v26  ;;  %2970 = vmatpush.bf16.msra.mxu0 %v4190_v21  ;;  %v4091_v44 = vld [vmem:[#allocation9 + $0x2f8] sm:$0xf0]  ;;  %v3019_v21 = vadd.f32 %v3018_v59, %v3017_v3  ;;  %v2720_v18 = vpop.f32.mrf.mxu0 }
 0x302   :  { %2983 = vmatpush.bf16.msra.mxu1 %v4446_v62  ;;  %2996 = vmatpush.bf16.msra.mxu2 %v4702_v7  ;;  %v4972_v48 = vld [vmem:[#allocation9 + $0x4dc] sm:$0xf]  ;;  %v4094_v0 = vor.u32 %v4908_v43, %v4091_v44  ;;  %v3083_v57 = vadd.f32 %v3082_v36, %v3081_v53  ;;  %v2744_v15 = vpop.f32.mrf.mxu2  ;;  %v2732_v25 = vadd.f32 %v2731_v40, %v2719_v13  ;;  %v5620_v31 = vpop.eup %5103 }
 0x303   :  { %v4347_v49 = vld [vmem:[#allocation9 + $0x4f8] sm:$0xf0]  ;;  %v5613_v50 = vmul.f32 %v3019_v21, %v5360_v8  ;;  %vm3167_vm9 = vweird.f32 %v5620_v31 }
 0x304   :  { %v5036_v52 = vld [vmem:[#allocation9 + $0x6dc] sm:$0xf]  ;;  %v4350_v62 = vor.u32 %v4972_v48, %v4347_v49  ;;  %v5618_v35 = vadd.f32 %v2744_v15, %v2732_v25  ;;  %vm3168_vm13 = vmor %vm3166_vm12, %vm3167_vm9 }
 0x305   :  { %2958 = vmatpush.bf16.msrb.mxu3 %v3902_v23  ;;  %2971 = vmatpush.bf16.msra.mxu0 %v4158_v24  ;;  %v4603_v17 = vld [vmem:[#allocation9 + $0x6f8] sm:$0xf0]  ;;  %v3121_v23 = vmul.f32 %v3083_v57, %v5360_v8  ;;  %v3129_v24 = vmul.f32 %v5613_v50, %v5613_v50  ;;  %v2733_v27 = vpop.f32.mrf.mxu1 }
 0x306   :  { %2984 = vmatpush.bf16.msra.mxu1 %v4414_v28  ;;  %2997 = vmatpush.bf16.msra.mxu2 %v4670_v29  ;;  %v4836_v54 = vld [vmem:[#allocation9 + $0x9c] sm:$0xf]  ;;  %v4606_v7 = vor.u32 %v5036_v52, %v4603_v17 }
 0x307   :  { %v3803_v26 = vld [vmem:[#allocation9 + $0xb8] sm:$0xf0]  ;;  %v3137_v34 = vsub.f32 %v3121_v23, %v3129_v24  ;;  %v2707_v49 = vpop.f32.mrf.mxu3 }
 0x308   :  { %v4900_v4 = vld [vmem:[#allocation9 + $0x29c] sm:$0xf]  ;;  %v3806_v19 = vor.u32 %v4836_v54, %v3803_v26 }
 0x309   :  { %2959 = vmatpush.bf16.msrb.mxu3 %v3870_v41  ;;  %2972 = vmatpush.bf16.msra.mxu0 %v4126_v42  ;;  %v4059_v5 = vld [vmem:[#allocation9 + $0x2b8] sm:$0xf0]  ;;  %v3145_v40 = vmax.f32 %v3137_v34, 0.0  ;;  %v3020_v41 = vrot.slane %v5618_v35, 4  ;;  %v3066_v42 = vmul.f32 %v5618_v35, %v5618_v35 }
 0x30a   :  { %2985 = vmatpush.bf16.msra.mxu1 %v4382_v45  ;;  %2998 = vmatpush.bf16.msra.mxu2 %v4638_v46  ;;  %v4964_v11 = vld [vmem:[#allocation9 + $0x49c] sm:$0xf]  ;;  %v4062_v20 = vor.u32 %v4900_v4, %v4059_v5  ;;  %v2746_v21 = vpop.f32.mrf.mxu2 }
 0x30b   :  { %v4315_v39 = vld [vmem:[#allocation9 + $0x4b8] sm:$0xf0]  ;;  %v3153_v17 = vadd.f32 0.8, %v3145_v40  ;;  %v3021_v54 = vadd.f32 %v3020_v41, %v5618_v35  ;;  %v3084_v26 = vrot.slane %v3066_v42, 4 }
 0x30c   :  { %v5028_v12 = vld [vmem:[#allocation9 + $0x69c] sm:$0xf]  ;;  %v4318_v29 = vor.u32 %v4964_v11, %v4315_v39 }
 0x30d   :  { %v4571_v16 = vld [vmem:[#allocation9 + $0x6b8] sm:$0xf0]  ;;  %2960 = vmatpush.bf16.msrb.mxu3 %v3838_v56  ;;  %2973 = vmatpush.bf16.msra.mxu0 %v4094_v0  ;;  %v3161_v56 = vmul.f32 %v5620_v31, %v5609_v51  ;;  %5105 = vrsqrt.f32 %v3153_v17  ;;  %v3022_v4 = vrot.slane %v3021_v54, 2  ;;  %v3085_v5 = vadd.f32 %v3084_v26, %v3066_v42 }
 0x30e   :  { %v4828_v14 = vld [vmem:[#allocation9 + $0x5c] sm:$0xf]  ;;  %2986 = vmatpush.bf16.msra.mxu1 %v4350_v62  ;;  %2999 = vmatpush.bf16.msra.mxu2 %v4606_v7  ;;  %v4574_v55 = vor.u32 %v5028_v12, %v4571_v16  ;;  %vm3176_vm10 = vweird.f32 %v3153_v17 }
 0x30f   :  { %v3771_v28 = vld [vmem:[#allocation9 + $0x78] sm:$0xf0]  ;;  %v3023_v11 = vadd.f32 %v3022_v4, %v3021_v54  ;;  %v3086_v57 = vrot.slane %v3085_v5, 2  ;;  %v3162_v13 = vmul.f32 %v5620_v31, %v3161_v56 }
 0x310   :  { %v4892_v30 = vld [vmem:[#allocation9 + $0x25c] sm:$0xf]  ;;  %v3774_v60 = vor.u32 %v4828_v14, %v3771_v28 }
 0x311   :  { %v4027_v32 = vld [vmem:[#allocation9 + $0x278] sm:$0xf0]  ;;  %2961 = vmatpush.bf16.msrb.mxu3 %v3806_v19  ;;  %2974 = vmatpush.bf16.msra.mxu0 %v4062_v20  ;;  %v3024_v39 = vrot.slane %v3023_v11, 1  ;;  %v3087_v12 = vadd.f32 %v3086_v57, %v3085_v5  ;;  %v3163_v16 = vmul.f32 0.5, %v3162_v13 }
 0x312   :  { %v4956_v33 = vld [vmem:[#allocation9 + $0x45c] sm:$0xf]  ;;  %v4030_v43 = vor.u32 %v4892_v30, %v4027_v32  ;;  %2987 = vmatpush.bf16.msra.mxu1 %v4318_v29  ;;  %3000 = vmatpush.bf16.msra.mxu2 %v4574_v55 }
 0x313   :  { %v4283_v22 = vld [vmem:[#allocation9 + $0x478] sm:$0xf0]  ;;  %v5106_v15 = vpop.eup %5105  ;;  %v3025_v20 = vadd.f32 %v3024_v39, %v3023_v11  ;;  %v3088_v23 = vrot.slane %v3087_v12, 1  ;;  %v3164_v24 = vsub.f32 1.5, %v3163_v16 }
 0x314   :  { %v5020_v37 = vld [vmem:[#allocation9 + $0x65c] sm:$0xf]  ;;  %v4286_v46 = vor.u32 %v4956_v33, %v4283_v22  ;;  %v3171_v18 = vmul.f32 %v5106_v15, %v3153_v17  ;;  %vm3177_vm8 = vweird.f32 %v5106_v15 }
 0x315   :  { %v4539_v9 = vld [vmem:[#allocation9 + $0x678] sm:$0xf0]  ;;  %2962 = vmatpush.bf16.msrb.mxu3 %v3774_v60  ;;  %2975 = vmatpush.bf16.msra.mxu0 %v4030_v43  ;;  %v5634_v28 = vmul.f32 %v3025_v20, %v5360_v8  ;;  %v3089_v29 = vadd.f32 %v3088_v23, %v3087_v12  ;;  %vm3178_vm11 = vmor %vm3176_vm10, %vm3177_vm8 }
 0x316   :  { %v4820_v47 = vld [vmem:[#allocation9 + $0x1c] sm:$0xf]  ;;  %v4542_v48 = vor.u32 %v5020_v37, %v4539_v9  ;;  %2988 = vmatpush.bf16.msra.mxu1 %v4286_v46  ;;  %v3172_v19 = vmul.f32 %v5106_v15, %v3171_v18 }
 0x317   :  { %v3739_v3 = vld [vmem:[#allocation9 + $0x38] sm:$0xf0]  ;;  %v3122_v30 = vmul.f32 %v3089_v29, %v5360_v8  ;;  %v3130_v32 = vmul.f32 %v5634_v28, %v5634_v28 }
 0x318   :  { %v4884_v44 = vld [vmem:[#allocation9 + $0x21c] sm:$0xf]  ;;  %v3742_v0 = vor.u32 %v4820_v47, %v3739_v3  ;;  %3001 = vmatpush.bf16.msra.mxu2 %v4542_v48  ;;  %v3173_v25 = vmul.f32 0.5, %v3172_v19 }
 0x319   :  { %v3995_v45 = vld [vmem:[#allocation9 + $0x238] sm:$0xf0]  ;;  %v2770_v14 = vpop.f32.mrf.mxu0  ;;  %v3138_v47 = vsub.f32 %v3122_v30, %v3130_v32 }
 0x31a   :  { %v4948_v52 = vld [vmem:[#allocation9 + $0x41c] sm:$0xf]  ;;  %v3998_v62 = vor.u32 %v4884_v44, %v3995_v45  ;;  %2963 = vmatpush.bf16.msrb.mxu3 %v3742_v0  ;;  %v3174_v27 = vsub.f32 1.5, %v3173_v25 }
 0x31b   :  { %v4251_v59 = vld [vmem:[#allocation9 + $0x438] sm:$0xf0]  ;;  %v3146_v41 = vmax.f32 %v3138_v47, 0.0 }
 0x31c   :  { %v5012_v53 = vld [vmem:[#allocation9 + $0x61c] sm:$0xf]  ;;  %v4254_v7 = vor.u32 %v4948_v52, %v4251_v59  ;;  %2976 = vmatpush.bf16.msra.mxu0 %v3998_v62  ;;  %v2783_v55 = vpop.f32.mrf.mxu1 }
 0x31d   :  { %v4507_v36 = vld [vmem:[#allocation9 + $0x638] sm:$0xf0]  ;;  %2964 = vmatmul.bf16.vlgmr.msrb.gmra.mxu3 %v5557_v1  ;;  %v3165_v1 = vmul.f32 %v5620_v31, %v3164_v24  ;;  %v3154_v48 = vadd.f32 0.8, %v3146_v41 }
 0x31e   :  { %v4510_v10 = vor.u32 %v5012_v53, %v4507_v36  ;;  %2989 = vmatpush.bf16.msra.mxu1 %v4254_v7 }
 0x31f   :  { %2977 = vmatmul.bf16.vlgmr.msra.gmra.mxu0 %v5559_v2  ;;  %v3169_v33 = vsel %vm3168_vm13, %v5620_v31, %v3165_v1  ;;  %v2757_v34 = vpop.f32.mrf.mxu3  ;;  %5107 = vrsqrt.f32 %v3154_v48  ;;  %vm3186_vm15 = vweird.f32 %v3154_v48  ;;  %vm3258_vm13 = vcmask 1044484  }
 0x320   :  { %3002 = vmatpush.bf16.msra.mxu2 %v4510_v10  ;;  %v2771_v22 = vadd.f32 %v2770_v14, %v2757_v34 }
 0x321   :  { %2990 = vmatmul.bf16.vlgmr.msra.gmra.mxu1 %v5555_v63  ;;  %v3175_v63 = vmul.f32 %v5106_v15, %v3174_v27  ;;  %v2772_v60 = vpop.f32.mrf.mxu0 }
 0x322   :  { %v2796_v37 = vpop.f32.mrf.mxu2  ;;  %v2784_v3 = vadd.f32 %v2783_v55, %v2771_v22 }
 0x323   :  { %3003 = vmatmul.bf16.vlgmr.msra.gmra.mxu2 %v5561_v6  ;;  %v3179_v2 = vsel %vm3178_vm11, %v5106_v15, %v3175_v63 }
 0x324   :  { %v3248_v6 = vrot.slane %v3179_v2, 7  ;;  %v2785_v51 = vpop.f32.mrf.mxu1  ;;  %v5646_v40 = vadd.f32 %v2796_v37, %v2784_v3 }
 0x325   :  { %v5108_v0 = vpop.eup %5107 }
 0x326   :  { %v5644_v9 = vsel %vm348_vm7, %v3169_v33, %v3248_v6  ;;  %v3026_v42 = vrot.slane %v5646_v40, 4  ;;  %v3067_v43 = vmul.f32 %v5646_v40, %v5646_v40  ;;  %v3181_v7 = vmul.f32 %v5108_v0, %v3154_v48 }
 0x327   :  { %v2759_v44 = vpop.f32.mrf.mxu3  ;;  %vm3187_vm14 = vweird.f32 %v5108_v0 }
 0x328   :  { %v3027_v31 = vadd.f32 %v3026_v42, %v5646_v40  ;;  %v3090_v45 = vrot.slane %v3067_v43, 4  ;;  %v3182_v15 = vmul.f32 %v5108_v0, %v3181_v7  ;;  %vm3188_vm1 = vmor %vm3186_vm15, %vm3187_vm14 }
 0x32a   :  { %v2798_v46 = vpop.f32.mrf.mxu2  ;;  %v3028_v49 = vrot.slane %v3027_v31, 2  ;;  %v3091_v52 = vadd.f32 %v3090_v45, %v3067_v43  ;;  %v3183_v18 = vmul.f32 0.5, %v3182_v15 }
 0x32c   :  { %v3029_v59 = vadd.f32 %v3028_v49, %v3027_v31  ;;  %v3092_v53 = vrot.slane %v3091_v52, 2  ;;  %v3184_v27 = vsub.f32 1.5, %v3183_v18 }
 0x32e   :  { %v3030_v17 = vrot.slane %v3029_v59, 1  ;;  %v3093_v54 = vadd.f32 %v3092_v53, %v3091_v52  ;;  %v3185_v32 = vmul.f32 %v5108_v0, %v3184_v27 }
 0x330   :  { %v3031_v26 = vadd.f32 %v3030_v17, %v3029_v59  ;;  %v3094_v21 = vrot.slane %v3093_v54, 1  ;;  %v3189_v3 = vsel %vm3188_vm1, %v5108_v0, %v3185_v32 }
 0x331   :  { %v3249_v42 = vrot.slane %v3189_v3, 6 }
 0x332   :  { %v5653_v36 = vmul.f32 %v3031_v26, %v5360_v8  ;;  %v3095_v56 = vadd.f32 %v3094_v21, %v3093_v54 }
 0x334   :  { %v3123_v4 = vmul.f32 %v3095_v56, %v5360_v8  ;;  %v3131_v5 = vmul.f32 %v5653_v36, %v5653_v36 }
 0x336   :  { %v3139_v62 = vsub.f32 %v3123_v4, %v3131_v5 }
 0x338   :  { %v3147_v11 = vmax.f32 %v3139_v62, 0.0 }
 0x339   :  { %v2822_v10 = vpop.f32.mrf.mxu0 }
 0x33a   :  { %v3155_v13 = vadd.f32 0.8, %v3147_v11 }
 0x33c   :  { %v2835_v57 = vpop.f32.mrf.mxu1  ;;  %5109 = vrsqrt.f32 %v3155_v13  ;;  %vm3196_vm2 = vweird.f32 %v3155_v13 }
 0x33f   :  { %v2809_v39 = vpop.f32.mrf.mxu3 }
 0x340   :  { %v2823_v12 = vadd.f32 %v2822_v10, %v2809_v39 }
 0x341   :  { %v2824_v19 = vpop.f32.mrf.mxu0 }
 0x342   :  { %v2848_v16 = vpop.f32.mrf.mxu2  ;;  %v2836_v20 = vadd.f32 %v2835_v57, %v2823_v12  ;;  %v5110_v24 = vpop.eup %5109 }
 0x343   :  { %v3191_v14 = vmul.f32 %v5110_v24, %v3155_v13  ;;  %vm3197_vm0 = vweird.f32 %v5110_v24 }
 0x344   :  { %v2837_v23 = vpop.f32.mrf.mxu1  ;;  %v5658_v25 = vadd.f32 %v2848_v16, %v2836_v20  ;;  %vm3198_vm3 = vmor %vm3196_vm2, %vm3197_vm0 }
 0x345   :  { %v3192_v1 = vmul.f32 %v5110_v24, %v3191_v14 }
 0x346   :  { %v3032_v29 = vrot.slane %v5658_v25, 4  ;;  %v3068_v55 = vmul.f32 %v5658_v25, %v5658_v25 }
 0x347   :  { %v2811_v63 = vpop.f32.mrf.mxu3  ;;  %v3193_v33 = vmul.f32 0.5, %v3192_v1 }
 0x348   :  { %v3033_v2 = vadd.f32 %v3032_v29, %v5658_v25  ;;  %v3096_v6 = vrot.slane %v3068_v55, 4 }
 0x349   :  { %v3194_v37 = vsub.f32 1.5, %v3193_v33 }
 0x34a   :  { %v2850_v30 = vpop.f32.mrf.mxu2  ;;  %v3034_v34 = vrot.slane %v3033_v2, 2  ;;  %v3097_v22 = vadd.f32 %v3096_v6, %v3068_v55 }
 0x34b   :  { %v3195_v51 = vmul.f32 %v5110_v24, %v3194_v37 }
 0x34c   :  { %v3035_v60 = vadd.f32 %v3034_v34, %v3033_v2  ;;  %v3098_v47 = vrot.slane %v3097_v22, 2 }
 0x34d   :  { %v3199_v41 = vsel %vm3198_vm3, %v5110_v24, %v3195_v51 }
 0x34e   :  { %v3250_v43 = vrot.slane %v3199_v41, 5  ;;  %v3036_v44 = vrot.slane %v3035_v60, 1  ;;  %v3099_v31 = vadd.f32 %v3098_v47, %v3097_v22 }
 0x350   :  { %v3256_v45 = vsel %vm994_vm4, %v3249_v42, %v3250_v43  ;;  %v3037_v48 = vadd.f32 %v3036_v44, %v3035_v60  ;;  %v3100_v49 = vrot.slane %v3099_v31, 1 }
 0x351   :  { %v5667_v46 = vsel %vm996_vm6, %v5644_v9, %v3256_v45 }
 0x352   :  { %v5670_v59 = vmul.f32 %v3037_v48, %v5360_v8  ;;  %v3101_v53 = vadd.f32 %v3100_v49, %v3099_v31 }
 0x354   :  { %v3124_v54 = vmul.f32 %v3101_v53, %v5360_v8  ;;  %v3132_v26 = vmul.f32 %v5670_v59, %v5670_v59 }
 0x356   :  { %v3140_v5 = vsub.f32 %v3124_v54, %v3132_v26 }
 0x358   :  { %v3148_v10 = vmax.f32 %v3140_v5, 0.0 }
 0x359   :  { %v2874_v52 = vpop.f32.mrf.mxu0 }
 0x35a   :  { %v3156_v16 = vadd.f32 0.8, %v3148_v10 }
 0x35c   :  { %v2887_v17 = vpop.f32.mrf.mxu1  ;;  %5111 = vrsqrt.f32 %v3156_v16  ;;  %vm3206_vm8 = vweird.f32 %v3156_v16 }
 0x35f   :  { %v2861_v21 = vpop.f32.mrf.mxu3 }
 0x360   :  { %v2875_v56 = vadd.f32 %v2874_v52, %v2861_v21 }
 0x361   :  { %v2876_v4 = vpop.f32.mrf.mxu0 }
 0x362   :  { %v2900_v0 = vpop.f32.mrf.mxu2  ;;  %v2888_v9 = vadd.f32 %v2887_v17, %v2875_v56  ;;  %v5112_v63 = vpop.eup %5111 }
 0x363   :  { %v3201_v32 = vmul.f32 %v5112_v63, %v3156_v16  ;;  %vm3207_vm5 = vweird.f32 %v5112_v63 }
 0x364   :  { %v2889_v62 = vpop.f32.mrf.mxu1  ;;  %v5675_v7 = vadd.f32 %v2900_v0, %v2888_v9  ;;  %vm3208_vm10 = vmor %vm3206_vm8, %vm3207_vm5  ;;  %vm3260_vm5 = vcmask 1046534   ;;  %vm3262_vm8 = vcmask 1045508  }
 0x365   :  { %v3202_v60 = vmul.f32 %v5112_v63, %v3201_v32 }
 0x366   :  { %v3038_v11 = vrot.slane %v5675_v7, 4  ;;  %v3069_v57 = vmul.f32 %v5675_v7, %v5675_v7 }
 0x367   :  { %v2863_v13 = vpop.f32.mrf.mxu3  ;;  %v3203_v41 = vmul.f32 0.5, %v3202_v60 }
 0x368   :  { %v3039_v15 = vadd.f32 %v3038_v11, %v5675_v7  ;;  %v3102_v39 = vrot.slane %v3069_v57, 4 }
 0x369   :  { %v3204_v48 = vsub.f32 1.5, %v3203_v41 }
 0x36a   :  { %v2902_v12 = vpop.f32.mrf.mxu2  ;;  %v3040_v18 = vrot.slane %v3039_v15, 2  ;;  %v3103_v19 = vadd.f32 %v3102_v39, %v3069_v57 }
 0x36b   :  { %v3205_v0 = vmul.f32 %v5112_v63, %v3204_v48 }
 0x36c   :  { %v3041_v20 = vadd.f32 %v3040_v18, %v3039_v15  ;;  %v3104_v23 = vrot.slane %v3103_v19, 2 }
 0x36d   :  { %v3209_v57 = vsel %vm3208_vm10, %v5112_v63, %v3205_v0 }
 0x36e   :  { %v3042_v24 = vrot.slane %v3041_v20, 1  ;;  %v3105_v27 = vadd.f32 %v3104_v23, %v3103_v19  ;;  %v3251_v18 = vrot.slane %v3209_v57, 4 }
 0x370   :  { %v3043_v14 = vadd.f32 %v3042_v24, %v3041_v20  ;;  %v3106_v29 = vrot.slane %v3105_v27, 1 }
 0x372   :  { %v5682_v55 = vmul.f32 %v3043_v14, %v5360_v8  ;;  %v3107_v1 = vadd.f32 %v3106_v29, %v3105_v27 }
 0x374   :  { %v3125_v2 = vmul.f32 %v3107_v1, %v5360_v8  ;;  %v3133_v6 = vmul.f32 %v5682_v55, %v5682_v55 }
 0x376   :  { %v3141_v30 = vsub.f32 %v3125_v2, %v3133_v6 }
 0x378   :  { %v3149_v34 = vmax.f32 %v3141_v30, 0.0 }
 0x379   :  { %v2926_v33 = vpop.f32.mrf.mxu0 }
 0x37a   :  { %v3157_v37 = vadd.f32 0.8, %v3149_v34 }
 0x37c   :  { %v2939_v22 = vpop.f32.mrf.mxu1  ;;  %5113 = vrsqrt.f32 %v3157_v37  ;;  %vm3216_vm11 = vweird.f32 %v3157_v37 }
 0x37f   :  { %v2913_v47 = vpop.f32.mrf.mxu3 }
 0x380   :  { %v2927_v3 = vadd.f32 %v2926_v33, %v2913_v47 }
 0x381   :  { %v2928_v42 = vpop.f32.mrf.mxu0 }
 0x382   :  { %v2952_v51 = vpop.f32.mrf.mxu2  ;;  %v2940_v43 = vadd.f32 %v2939_v22, %v2927_v3  ;;  %v5114_v31 = vpop.eup %5113 }
 0x383   :  { %v3211_v49 = vmul.f32 %v5114_v31, %v3157_v37  ;;  %vm3217_vm9 = vweird.f32 %v5114_v31 }
 0x384   :  { %v2941_v44 = vpop.f32.mrf.mxu1  ;;  %v5687_v45 = vadd.f32 %v2952_v51, %v2940_v43  ;;  %vm3218_vm12 = vmor %vm3216_vm11, %vm3217_vm9  ;;  %vm3264_vm9 = vcmask 1043456  }
 0x385   :  { %v3212_v17 = vmul.f32 %v5114_v31, %v3211_v49 }
 0x386   :  { %v3044_v52 = vrot.slane %v5687_v45, 4  ;;  %v3070_v53 = vmul.f32 %v5687_v45, %v5687_v45 }
 0x387   :  { %v2915_v54 = vpop.f32.mrf.mxu3  ;;  %v3213_v4 = vmul.f32 0.5, %v3212_v17 }
 0x388   :  { %v3045_v26 = vadd.f32 %v3044_v52, %v5687_v45  ;;  %v3108_v21 = vrot.slane %v3070_v53, 4 }
 0x389   :  { %v3214_v62 = vsub.f32 1.5, %v3213_v4 }
 0x38a   :  { %v2954_v56 = vpop.f32.mrf.mxu2  ;;  %v3046_v5 = vrot.slane %v3045_v26, 2  ;;  %v3109_v9 = vadd.f32 %v3108_v21, %v3070_v53 }
 0x38b   :  { %v3215_v13 = vmul.f32 %v5114_v31, %v3214_v62 }
 0x38c   :  { %v3047_v10 = vadd.f32 %v3046_v5, %v3045_v26  ;;  %v3110_v11 = vrot.slane %v3109_v9, 2 }
 0x38d   :  { %v3219_v15 = vsel %vm3218_vm12, %v5114_v31, %v3215_v13 }
 0x38e   :  { %v3048_v39 = vrot.slane %v3047_v10, 1  ;;  %v3111_v12 = vadd.f32 %v3110_v11, %v3109_v9  ;;  %v3252_v19 = vrot.slane %v3219_v15, 3 }
 0x390   :  { %v5694_v20 = vsel %vm3258_vm13, %v3251_v18, %v3252_v19  ;;  %v3049_v23 = vadd.f32 %v3048_v39, %v3047_v10  ;;  %v3112_v16 = vrot.slane %v3111_v12, 1 }
 0x392   :  { %v5697_v27 = vmul.f32 %v3049_v23, %v5360_v8  ;;  %v3113_v14 = vadd.f32 %v3112_v16, %v3111_v12 }
 0x394   :  { %v3126_v1 = vmul.f32 %v3113_v14, %v5360_v8  ;;  %v3134_v63 = vmul.f32 %v5697_v27, %v5697_v27 }
 0x396   :  { %v3142_v33 = vsub.f32 %v3126_v1, %v3134_v63  ;;  %v1054_v63 = vld [vmem:[#allocation10 + $0xd] sm:$0xff] }
 0x398   :  { %v3150_v60 = vmax.f32 %v3142_v33, 0.0 }
 0x39a   :  { %v3158_v44 = vadd.f32 0.8, %v3150_v60 }
 0x39c   :  { %v2978_v24 = vpop.f32.mrf.mxu0  ;;  %5115 = vrsqrt.f32 %v3158_v44  ;;  %vm3226_vm15 = vweird.f32 %v3158_v44 }
 0x39e   :  { %v2991_v29 = vpop.f32.mrf.mxu1 }
 0x3a0   :  { %v2965_v2 = vpop.f32.mrf.mxu3 }
 0x3a1   :  { %v2979_v6 = vadd.f32 %v2978_v24, %v2965_v2 }
 0x3a2   :  { %v5116_v0 = vpop.eup %5115 }
 0x3a3   :  { %v2992_v34 = vadd.f32 %v2991_v29, %v2979_v6  ;;  %v3221_v62 = vmul.f32 %v5116_v0, %v3158_v44  ;;  %vm3227_vm14 = vweird.f32 %v5116_v0 }
 0x3a4   :  { %v2980_v32 = vpop.f32.mrf.mxu0  ;;  %vm3228_vm1 = vmor %vm3226_vm15, %vm3227_vm14 }
 0x3a5   :  { %v3222_v57 = vmul.f32 %v5116_v0, %v3221_v62 }
 0x3a6   :  { %v3004_v30 = vpop.f32.mrf.mxu2  ;;  %v2993_v22 = vpop.f32.mrf.mxu1 }
 0x3a7   :  { %v5702_v37 = vadd.f32 %v3004_v30, %v2992_v34  ;;  %v3223_v13 = vmul.f32 0.5, %v3222_v57 }
 0x3a8   :  { %v2967_v51 = vpop.f32.mrf.mxu3 }
 0x3a9   :  { %v3050_v47 = vrot.slane %v5702_v37, 4  ;;  %v3071_v3 = vmul.f32 %v5702_v37, %v5702_v37  ;;  %v3224_v39 = vsub.f32 1.5, %v3223_v13 }
 0x3ab   :  { %v3051_v41 = vadd.f32 %v3050_v47, %v5702_v37  ;;  %v3114_v42 = vrot.slane %v3071_v3, 4  ;;  %v3225_v19 = vmul.f32 %v5116_v0, %v3224_v39 }
 0x3ad   :  { %v3052_v31 = vrot.slane %v3051_v41, 2  ;;  %v3115_v48 = vadd.f32 %v3114_v42, %v3071_v3 }
 0x3ae   :  { %v3006_v43 = vpop.f32.mrf.mxu2 }
 0x3af   :  { %v3053_v49 = vadd.f32 %v3052_v31, %v3051_v41  ;;  %v3116_v52 = vrot.slane %v3115_v48, 2 }
 0x3b1   :  { %v3054_v53 = vrot.slane %v3053_v49, 1  ;;  %v3117_v17 = vadd.f32 %v3116_v52, %v3115_v48 }
 0x3b3   :  { %v3055_v54 = vadd.f32 %v3054_v53, %v3053_v49  ;;  %v3118_v26 = vrot.slane %v3117_v17, 1 }
 0x3b5   :  { %v3063_v21 = vmul.f32 %v3055_v54, %v5360_v8  ;;  %v3119_v56 = vadd.f32 %v3118_v26, %v3117_v17 }
 0x3b7   :  { %v3127_v4 = vmul.f32 %v3119_v56, %v5360_v8  ;;  %v3135_v5 = vmul.f32 %v3063_v21, %v3063_v21  ;;  %v3229_v8 = vsel %vm3228_vm1, %v5116_v0, %v3225_v19  ;;  %v1055_v0 = vld [vmem:[#allocation10 + $0x15] sm:$0xff] }
 0x3b8   :  { %v3253_v29 = vrot.slane %v3229_v8, 2 }
 0x3b9   :  { %v3143_v9 = vsub.f32 %v3127_v4, %v3135_v5 }
 0x3bb   :  { %v3151_v10 = vmax.f32 %v3143_v9, 0.0 }
 0x3bd   :  { %v3159_v11 = vadd.f32 0.8, %v3151_v10 }
 0x3bf   :  { %5117 = vrsqrt.f32 %v3159_v11  ;;  %vm3236_vm2 = vweird.f32 %v3159_v11 }
 0x3c5   :  { %v5118_v15 = vpop.eup %5117 }
 0x3c6   :  { %v3231_v12 = vmul.f32 %v5118_v15, %v3159_v11  ;;  %vm3237_vm0 = vweird.f32 %v5118_v15 }
 0x3c7   :  { %vm3238_vm3 = vmor %vm3236_vm2, %vm3237_vm0 }
 0x3c8   :  { %v3232_v18 = vmul.f32 %v5118_v15, %v3231_v12 }
 0x3ca   :  { %v3233_v23 = vmul.f32 0.5, %v3232_v18 }
 0x3cc   :  { %v3234_v16 = vsub.f32 1.5, %v3233_v23 }
 0x3ce   :  { %v3235_v24 = vmul.f32 %v5118_v15, %v3234_v16 }
 0x3d0   :  { %v3239_v14 = vsel %vm3238_vm3, %v5118_v15, %v3235_v24 }
 0x3d1   :  { %v3254_v1 = vrot.slane %v3239_v14, 1 }
 0x3d3   :  { %v3261_v2 = vsel %vm3260_vm5, %v3253_v29, %v3254_v1 }
 0x3d4   :  { %v3263_v6 = vsel %vm3262_vm8, %v5694_v20, %v3261_v2 }
 0x3d5   :  { %v3265_v30 = vsel %vm3264_vm9, %v5667_v46, %v3263_v6 }
 0x3d6   :  { %v3267_v32 = vmul.f32 %v3265_v30, %v1054_v63 }
 0x3d8   :  { %v3269_v33 = vperm.slane %v3267_v32, 0  ;;  %v3270_v34 = vperm.slane %v3267_v32, 1  ;;  %v3271_v22 = vperm.slane %v3267_v32, 2  ;;  %v3272_v60 = vperm.slane %v3267_v32, 3 }
 0x3d9   :  { %v3273_v47 = vperm.slane %v3267_v32, 4  ;;  %v3274_v3 = vperm.slane %v3267_v32, 5  ;;  %v3275_v51 = vperm.slane %v3267_v32, 6  ;;  %v3276_v41 = vperm.slane %v3267_v32, 7 }
 0x3da   :  { %v3285_v42 = vmul.f32 %v3269_v33, %v5594_v58  ;;  %v3286_v43 = vmul.f32 %v3270_v34, %v5613_v50  ;;  %v3287_v44 = vmul.f32 %v3271_v22, %v5634_v28  ;;  %v3288_v20 = vmul.f32 %v3272_v60, %v5653_v36 }
 0x3db   :  { %v3289_v31 = vmul.f32 %v3273_v47, %v5670_v59  ;;  %v3290_v46 = vmul.f32 %v3274_v3, %v5682_v55  ;;  %v3291_v48 = vmul.f32 %v3275_v51, %v5697_v27  ;;  %v3292_v49 = vmul.f32 %v3276_v41, %v3063_v21 }
 0x3dc   :  { %v3301_v52 = vrot.slane %v3286_v43, 7  ;;  %v3302_v53 = vrot.slane %v3287_v44, 6  ;;  %v3303_v17 = vrot.slane %v3288_v20, 5  ;;  %v3317_v54 = vmul.f32 %v3269_v33, %v5587_v38 }
 0x3dd   :  { %v3304_v26 = vrot.slane %v3289_v31, 4  ;;  %v3305_v58 = vrot.slane %v3290_v46, 3  ;;  %v3306_v56 = vrot.slane %v3291_v48, 2  ;;  %v3307_v50 = vrot.slane %v3292_v49, 1 }
 0x3de   :  { %v3308_v28 = vsel %vm348_vm7, %v3285_v42, %v3301_v52  ;;  %v3309_v36 = vsel %vm994_vm4, %v3302_v53, %v3303_v17  ;;  %v3318_v59 = vmul.f32 %v3270_v34, %v5599_v61  ;;  %v3319_v55 = vmul.f32 %v3271_v22, %v5618_v35 }
 0x3df   :  { %v3310_v27 = vsel %vm996_vm6, %v3308_v28, %v3309_v36  ;;  %v3311_v21 = vsel %vm3258_vm13, %v3304_v26, %v3305_v58  ;;  %v3312_v4 = vsel %vm3260_vm5, %v3306_v56, %v3307_v50  ;;  %v3320_v38 = vmul.f32 %v3272_v60, %v5646_v40 }
 0x3e0   :  { %v3313_v5 = vsel %vm3262_vm8, %v3311_v21, %v3312_v4  ;;  %v3321_v9 = vmul.f32 %v3273_v47, %v5658_v25  ;;  %v3322_v62 = vmul.f32 %v3274_v3, %v5675_v7  ;;  %v3323_v35 = vmul.f32 %v3275_v51, %v5687_v45 }
 0x3e1   :  { %v3314_v10 = vsel %vm3264_vm9, %v3310_v27, %v3313_v5  ;;  %v3324_v11 = vmul.f32 %v3276_v41, %v5702_v37 }
 0x3e2   :  { %v3316_v61 = vsub.f32 %v1055_v0, %v3314_v10 }
 0x3e4   :  { %v3326_v57 = vperm.slane %v3316_v61, 0  ;;  %v3327_v13 = vperm.slane %v3316_v61, 1  ;;  %v3328_v15 = vperm.slane %v3316_v61, 2  ;;  %v3329_v39 = vperm.slane %v3316_v61, 3 }
 0x3e5   :  { %v3330_v12 = vperm.slane %v3316_v61, 4  ;;  %v3331_v18 = vperm.slane %v3316_v61, 5  ;;  %v3332_v40 = vperm.slane %v3316_v61, 6  ;;  %v3333_v19 = vperm.slane %v3316_v61, 7 }
 0x3e6   :  { %v3342_v23 = vadd.f32 %v3326_v57, %v3317_v54  ;;  %v3343_v16 = vadd.f32 %v3327_v13, %v3318_v59  ;;  %v3344_v25 = vadd.f32 %v3328_v15, %v3319_v55  ;;  %v3345_v8 = vadd.f32 %v3329_v39, %v3320_v38 }
 0x3e7   :  { %v3346_v7 = vadd.f32 %v3330_v12, %v3321_v9  ;;  %v3347_v24 = vadd.f32 %v3331_v18, %v3322_v62  ;;  %v3348_v14 = vadd.f32 %v3332_v40, %v3323_v35  ;;  %v3349_v29 = vadd.f32 %v3333_v19, %v3324_v11 }
 0x3e8   :  { %v3350_v1 = vmul.f32 0.2, %v3342_v23  ;;  %v3351_v45 = vmul.f32 0.2, %v3343_v16  ;;  %v3352_v63 = vmul.f32 0.2, %v3344_v25 }
 0x3e9   :  { %v3353_v37 = vmul.f32 0.2, %v3345_v8  ;;  %v3354_v2 = vmul.f32 0.2, %v3346_v7  ;;  %v3355_v6 = vmul.f32 0.2, %v3347_v24 }
 0x3ea   :  { %v3356_v30 = vmul.f32 0.2, %v3348_v14  ;;  %v3357_v32 = vmul.f32 0.2, %v3349_v29  ;;  %v3358_v33 = vmax.f32 %v3342_v23, %v3350_v1  ;;  %v3359_v34 = vmax.f32 %v3343_v16, %v3351_v45 }
 0x3eb   :  { %v3360_v22 = vmax.f32 %v3344_v25, %v3352_v63  ;;  %v3361_v60 = vmax.f32 %v3345_v8, %v3353_v37  ;;  %v3362_v47 = vmax.f32 %v3346_v7, %v3354_v2  ;;  %v3363_v3 = vmax.f32 %v3347_v24, %v3355_v6 }
 0x3ec   :  { %v3364_v51 = vmax.f32 %v3348_v14, %v3356_v30  ;;  %v3365_v41 = vmax.f32 %v3349_v29, %v3357_v32  ;;  %v3366_v42 = vpack.c.bf16 %v3359_v34, %v3358_v33 }
 0x3ed   :  { %v3367_v43 = vpack.c.bf16 %v3361_v60, %v3360_v22  ;;  %v3368_v44 = vpack.c.bf16 %v3363_v3, %v3362_v47 }
 0x3ee   :  { %v3369_v20 = vpack.c.bf16 %v3365_v41, %v3364_v51  ;;  %3370 = vst [vmem:[%s5755_s6] sm:$0xff] %v3366_v42 }
 0x3ef   :  { %3371 = vst [vmem:[%s5755_s6 + $0x8] sm:$0xff] %v3367_v43 }
 0x3f0   :  { %3372 = vst [vmem:[%s5755_s6 + $0x10] sm:$0xff] %v3368_v44 }
 0x3f1   :  { %3373 = vst [vmem:[%s5755_s6 + $0x18] sm:$0xff] %v3369_v20 }
 0x3f2   :  { %3378 = vsyncpa [#allocation3], 1 }
 0x3f3   :  { %3379 = vsyncpa [#allocation5], 1 }
 0x3f4   :  { %3380 = vsyncpa [#allocation8], 1 }
 0x3f5   :  { %3381 = vsyncpa [#allocation11], 1 }

</bundles_post_ra>
